<compile_context>
chip_gen: v5e
topology: v5e:2x2
jax: 0.10.0
libtpu: 0.0.40
codegen_flags: <defaults>
</compile_context>

<pallas_src>
import functools
import math
from types import SimpleNamespace

import numpy as np
import jax
import jax.numpy as jnp
from jax.experimental import pallas as pl
from jax.experimental.pallas import tpu as pltpu


def _round_up(v, m=128):
    return -(-v // m) * m


# --------------------------------------------------------------------------------------
# static geometry + mask constants (derived from shapes only, computed in numpy)
# --------------------------------------------------------------------------------------
def _geometry(n, h, w):
    k1, k2, k3 = 3, 3, 4
    # layer 1: ConvT(30->16,k=3,s=2,p=2) == stride-1 conv over the 2x-dilated input
    hp1, wp1 = 2 * h - 1, 2 * w - 1                 # edge pad k1-1-p1 = 0
    ho1, wo1 = hp1 - (k1 - 1), wp1 - (k1 - 1)
    # layer 2: ConvT(16->10,k=3,s=(1,2),p=2): frame = width-dilated layer-1 output
    hp2, wp2 = ho1, 2 * wo1 - 1
    ho2, wo2 = hp2 - (k2 - 1), wp2 - (k2 - 1)
    # layer 3: ConvT(10->5,k=4,s=1,p=2): frame = layer-2 output zero-padded by 1
    hp3, wp3 = ho2 + 2, wo2 + 2                      # == (hp2, wp2)
    ho3, wo3 = hp3 - (k3 - 1), wp3 - (k3 - 1)

    r = hp2 * wp2                        # frame positions per image (shared 13x25 grid)
    nv = n * r                           # real frame positions (all images)
    pre = wp2 + 1                        # frame-3 -> frame-2 constant column offset
    off2 = (k2 - 1) * wp2 + (k2 - 1)     # largest layer-2 kernel shift
    off3 = (k3 - 1) * wp3 + (k3 - 1)     # largest layer-3 kernel shift

    nv_p = _round_up(nv)                 # acc3 / output width   (650 -> 768)
    ns_p = _round_up(nv_p + off3)        # acc2 / softmax width  (846 -> 896)
    qf2 = _round_up(ns_p + off2)         # layer-1 frame width   (948 -> 1024)

    # frame-2 validity mask: real, even-width (non-dilation-hole) columns only
    p = np.arange(qf2)
    v = p - pre
    m2 = ((v >= 0) & (v < nv) & (np.mod(v, wp2) % 2 == 0)).astype(np.float32)[None, :]

    # frame-3 validity mask: 1 inside the valid ho2 x wo2 layer-2 output, 0 on the border
    u = np.arange(ns_p)
    r3 = np.mod(u, r)
    h3 = r3 // wp3
    w3c = np.mod(r3, wp3)
    ms = ((u < nv) & (h3 >= 1) & (h3 <= ho2) & (w3c >= 1) & (w3c <= wo2)
          ).astype(np.float32)[None, :]

    return SimpleNamespace(k1=k1, k2=k2, k3=k3, ho1=ho1, wo1=wo1, hp2=hp2, wp2=wp2,
                           ho2=ho2, wo2=wo2, hp3=hp3, wp3=wp3, ho3=ho3, wo3=wo3,
                           r=r, nv=nv, pre=pre, nv_p=nv_p, ns_p=ns_p, qf2=qf2,
                           m2=m2, ms=ms)


# --------------------------------------------------------------------------------------
# single fused kernel: conv_t1+relu -> conv_t2+softmax(channels) -> conv_t3+sigmoid
# --------------------------------------------------------------------------------------
def _fused_kernel(x1_ref, w1_ref, b1_ref, m2_ref, w2_ref, b2_ref, ms_ref,
                  w3_ref, b3_ref, o_ref, *, k2, k3, wp2, wp3, ns_p, nv_p):
    # ---- layer 1 (+ReLU): one MXU matmul on the frame-2-ordered im2col slab ----
    f2 = jnp.dot(w1_ref[...], x1_ref[...], preferred_element_type=jnp.float32)
    f2 = jnp.maximum(f2 + b1_ref[...], 0.0) * m2_ref[...]            # (16, QF2)
    # f2[:, p] is the width-dilated layer-1 activation at frame-2 position p - PRE.

    # ---- layer 2: ONE matmul, K = 9*16, over the stacked shifted lane-slices ----
    rhs2 = jnp.concatenate(
        [f2[:, i * wp2 + j:i * wp2 + j + ns_p] for i in range(k2) for j in range(k2)],
        axis=0)                                                       # (144, NS)
    acc2 = jnp.dot(w2_ref[...], rhs2,
                   preferred_element_type=jnp.float32) + b2_ref[...]  # (16, NS)

    # channel softmax (padded rows carry a -1e30 bias -> exp == 0, sum unaffected);
    # the frame-3 border mask is folded into the (1, NS) reciprocal row (EUP).
    mx = jnp.max(acc2, axis=0, keepdims=True)
    e = jnp.exp(acc2 - mx)
    s = jnp.sum(e, axis=0, keepdims=True)
    sm = e * (pl.reciprocal(s, approx=True) * ms_ref[...])            # (16, NS)
    # sm[:, u] is now exactly the layer-3 input frame at flattened position u.

    # ---- layer 3: ONE matmul, K = 16*16; sigmoid epilogue; full-tile store ----
    rhs3 = jnp.concatenate(
        [sm[:, i * wp3 + j:i * wp3 + j + nv_p] for i in range(k3) for j in range(k3)],
        axis=0)                                                       # (256, NV)
    acc3 = jnp.dot(w3_ref[...], rhs3,
                   preferred_element_type=jnp.float32) + b3_ref[...]  # (8, NV)
    o_ref[...] = 1.0 / (1.0 + jnp.exp(-acc3))                         # exact sigmoid


def forward(x_nchw, params):
    w1, b1, w2, b2, w3, b3 = params
    n, cin1, h, w = x_nchw.shape
    cout1, cout2, cout3 = w1.shape[1], w2.shape[1], w3.shape[1]
    k1, k2, k3 = w1.shape[2], w2.shape[2], w3.shape[2]
    g = _geometry(n, h, w)
    cp2 = _round_up(cout2, 8)            # softmax rows padded to 16 (sublane aligned)
    cp3 = _round_up(cout3, 8)            # output rows padded to 8  (full-tile store)

    x = x_nchw.astype(jnp.float32)
    # stride-2 lhs-dilated layer-1 input frame (edge pad k-1-p = 0 for this layer)
    xd = jax.lax.pad(x, jnp.float32(0),
                     ((0, 0, 0), (0, 0, 0), (0, 0, 1), (0, 0, 1)))    # (N,30,Hp1,Wp1)

    # im2col over the valid layer-1 output grid; rows ordered (i*k1 + j)*Cin1 + ci
    blocks = [xd[:, :, i:i + g.ho1, j:j + g.wo1]
              for i in range(k1) for j in range(k1)]
    cols = jnp.stack(blocks, axis=0).transpose(0, 2, 1, 3, 4)         # (9,30,N,Ho1,Wo1)
    cols = cols.reshape(k1 * k1 * cin1, n, g.ho1, g.wo1)
    # stride-2 width dilation of layer-1 *output* columns (layer-2 frame order):
    # interior pad + reshape only -- no gather.
    cols = jax.lax.pad(cols, jnp.float32(0),
                       ((0, 0, 0), (0, 0, 0), (0, 0, 0), (0, 0, 1)))  # (270,N,Hp2,Wp2)
    cols = cols.reshape(k1 * k1 * cin1, n * g.r)                      # (270, N*R)
    x1slab = jax.lax.pad(cols, jnp.float32(0),
                         ((0, 0, 0), (g.pre, g.qf2 - g.pre - n * g.r, 0)))  # (270, QF2)

    # ConvTranspose weights -> flipped stride-1-conv weights in (Cout, K) matmul form
    w1f = jnp.transpose(w1, (2, 3, 0, 1))[::-1, ::-1].reshape(
        k1 * k1 * cin1, cout1).T.astype(jnp.float32)                  # (16, 270)

    w2f = jnp.transpose(w2, (2, 3, 1, 0))[::-1, ::-1].reshape(
        k2 * k2, cout2, cout1)                                        # (9, 10, 16)
    w2m = jnp.transpose(w2f, (1, 0, 2)).reshape(cout2, k2 * k2 * cout1)
    w2m = jnp.concatenate(
        [w2m, jnp.zeros((cp2 - cout2, k2 * k2 * cout1), jnp.float32)],
        axis=0).astype(jnp.float32)                                   # (16, 144)

    w3f = jnp.transpose(w3, (2, 3, 1, 0))[::-1, ::-1].reshape(
        k3 * k3, cout3, cout2)                                        # (16, 5, 10)
    w3p = jnp.concatenate(
        [w3f, jnp.zeros((k3 * k3, cout3, cp2 - cout2), jnp.float32)], axis=2)
    w3m = jnp.transpose(w3p, (1, 0, 2)).reshape(cout3, k3 * k3 * cp2)
    w3m = jnp.concatenate(
        [w3m, jnp.zeros((cp3 - cout3, k3 * k3 * cp2), jnp.float32)],
        axis=0).astype(jnp.float32)                                   # (8, 256)

    b1f = b1.reshape(cout1, 1).astype(jnp.float32)                    # (16, 1)
    b2f = jnp.concatenate(
        [b2.reshape(cout2, 1), jnp.full((cp2 - cout2, 1), -1e30)],
        axis=0).astype(jnp.float32)                                   # (16, 1)
    b3f = jnp.concatenate(
        [b3.reshape(cout3, 1), jnp.zeros((cp3 - cout3, 1))],
        axis=0).astype(jnp.float32)                                   # (8, 1)

    m2 = jnp.asarray(g.m2)                                            # (1, QF2)
    ms = jnp.asarray(g.ms)                                            # (1, NS)

    kern = functools.partial(_fused_kernel, k2=k2, k3=k3, wp2=g.wp2, wp3=g.wp3,
                             ns_p=g.ns_p, nv_p=g.nv_p)
    out_flat = pl.pallas_call(
        kern,
        out_shape=jax.ShapeDtypeStruct((cp3, g.nv_p), jnp.float32),
        in_specs=[pl.BlockSpec(memory_space=pltpu.MemorySpace.VMEM)] * 9,
        out_specs=pl.BlockSpec(memory_space=pltpu.MemorySpace.VMEM),
    )(x1slab, w1f, b1f, m2, w2m, b2f, ms, w3m, b3f)

    # (8, NV_P) -> (Cout3, N*Hp3*Wp3) -> slice valid region -> (N, Ho3, Cout3, Wo3)
    out = out_flat[:cout3, :n * g.r].reshape(cout3, n, g.hp3, g.wp3)[:, :, :g.ho3, :g.wo3]
    return jnp.transpose(out, (1, 2, 0, 3))                           # the transpose(1,2)


# ---------------- pure-JAX reference (for correctness check only) ----------------
def _ref_convt(x_nhwc, w_pt, b, stride, padding):
    _, _, kh, kw = w_pt.shape
    sh, sw = stride
    ph, pw = padding
    w_flip = jnp.transpose(w_pt, (2, 3, 0, 1))[::-1, ::-1]
    y = jax.lax.conv_general_dilated(
        x_nhwc, w_flip, window_strides=(1, 1),
        padding=((kh - 1 - ph, kh - 1 - ph), (kw - 1 - pw, kw - 1 - pw)),
        lhs_dilation=(sh, sw),
        dimension_numbers=("NHWC", "HWIO", "NHWC"),
        precision=jax.lax.Precision.HIGHEST)
    return y + b.reshape(1, 1, 1, -1)


def _ref_forward(x_nchw, params):
    w1, b1, w2, b2, w3, b3 = params
    x = jnp.transpose(x_nchw, (0, 2, 3, 1))
    v2 = jax.nn.relu(_ref_convt(x, w1, b1, (2, 2), (2, 2)))
    v4 = jax.nn.softmax(_ref_convt(v2, w2, b2, (1, 2), (2, 2)), axis=-1)
    v6 = jax.nn.sigmoid(_ref_convt(v4, w3, b3, (1, 1), (2, 2)))
    out_nchw = jnp.transpose(v6, (0, 3, 1, 2))
    return jnp.transpose(out_nchw, (0, 2, 1, 3))


def _init_convt(key, cin, cout, kh, kw):
    kw_, kb = jax.random.split(key)
    bound = 1.0 / math.sqrt(cin * kh * kw)
    wgt = jax.random.uniform(kw_, (cin, cout, kh, kw), jnp.float32, -bound, bound)
    b = jax.random.uniform(kb, (cout,), jnp.float32, -bound, bound)
    return wgt, b


if __name__ == "__main__":
    root = jax.random.PRNGKey(0)
    kx, kk1, kk2, kk3 = jax.random.split(root, 4)
    # Small input consistent with the module: in-channels fixed at 30, small spatial.
    x = jax.random.normal(kx, (2, 30, 8, 8), dtype=jnp.float32)
    w1, b1 = _init_convt(kk1, 30, 16, 3, 3)
    w2, b2 = _init_convt(kk2, 16, 10, 3, 3)
    w3, b3 = _init_convt(kk3, 10, 5, 4, 4)
    params = (w1, b1, w2, b2, w3, b3)

    out = jax.block_until_ready(jax.jit(forward)(x, params))

    ref = _ref_forward(x, params)
    assert out.shape == (2, 10, 5, 22), out.shape
    err = float(jnp.max(jnp.abs(out - ref)))
    assert jnp.allclose(out, ref, atol=1e-3, rtol=1e-3), err
    print("KERNEL_OK")
</pallas_src>

<mosaic_0001>
module attributes {stable_mosaic.version = 11 : i64} {
  func.func @_fused_kernel(%arg0: memref<270x1024xf32, #tpu.memory_space<vmem>>, %arg1: memref<16x270xf32, #tpu.memory_space<vmem>>, %arg2: memref<16x1xf32, #tpu.memory_space<vmem>>, %arg3: memref<1x1024xf32, #tpu.memory_space<vmem>>, %arg4: memref<16x144xf32, #tpu.memory_space<vmem>>, %arg5: memref<16x1xf32, #tpu.memory_space<vmem>>, %arg6: memref<1x896xf32, #tpu.memory_space<vmem>>, %arg7: memref<8x256xf32, #tpu.memory_space<vmem>>, %arg8: memref<8x1xf32, #tpu.memory_space<vmem>>, %arg9: memref<8x768xf32, #tpu.memory_space<vmem>>) attributes {dimension_semantics = [], scalar_prefetch = 0 : i64, scratch_operands = 0 : i64, tpu.core_type = #tpu.core_type<tc>} {
    %c0 = arith.constant 0 : index
    %c0_0 = arith.constant 0 : index
    %0 = vector.load %arg1[%c0, %c0_0] : memref<16x270xf32, #tpu.memory_space<vmem>>, vector<16x270xf32>
    %c0_1 = arith.constant 0 : index
    %c0_2 = arith.constant 0 : index
    %1 = vector.load %arg0[%c0_1, %c0_2] : memref<270x1024xf32, #tpu.memory_space<vmem>>, vector<270x1024xf32>
    %cst = arith.constant dense<0.000000e+00> : vector<16x1024xf32>
    %2 = tpu.matmul %0, %1, %cst {dimension_numbers = #tpu.dot_dimension_numbers<[1], [0], [0], [1], [0, 0, 1, 1], [], []>} : vector<16x270xf32>, vector<270x1024xf32>, vector<16x1024xf32> -> vector<16x1024xf32>
    %c0_3 = arith.constant 0 : index
    %c0_4 = arith.constant 0 : index
    %3 = vector.load %arg2[%c0_3, %c0_4] : memref<16x1xf32, #tpu.memory_space<vmem>>, vector<16x1xf32>
    %4 = vector.broadcast %3 : vector<16x1xf32> to vector<16x1024xf32>
    %5 = arith.addf %2, %4 : vector<16x1024xf32>
    %cst_5 = arith.constant 0.000000e+00 : f32
    %6 = vector.broadcast %cst_5 : f32 to vector<16x1024xf32>
    %7 = arith.maximumf %5, %6 : vector<16x1024xf32>
    %c0_6 = arith.constant 0 : index
    %c0_7 = arith.constant 0 : index
    %8 = vector.load %arg3[%c0_6, %c0_7] : memref<1x1024xf32, #tpu.memory_space<vmem>>, vector<1x1024xf32>
    %9 = vector.broadcast %8 : vector<1x1024xf32> to vector<16x1024xf32>
    %10 = arith.mulf %7, %9 : vector<16x1024xf32>
    %11 = vector.extract_strided_slice %10 {offsets = [0, 0], sizes = [16, 896], strides = [1, 1]} : vector<16x1024xf32> to vector<16x896xf32>
    %12 = vector.extract_strided_slice %10 {offsets = [0, 1], sizes = [16, 896], strides = [1, 1]} : vector<16x1024xf32> to vector<16x896xf32>
    %13 = vector.extract_strided_slice %10 {offsets = [0, 2], sizes = [16, 896], strides = [1, 1]} : vector<16x1024xf32> to vector<16x896xf32>
    %14 = vector.extract_strided_slice %10 {offsets = [0, 25], sizes = [16, 896], strides = [1, 1]} : vector<16x1024xf32> to vector<16x896xf32>
    %15 = vector.extract_strided_slice %10 {offsets = [0, 26], sizes = [16, 896], strides = [1, 1]} : vector<16x1024xf32> to vector<16x896xf32>
    %16 = vector.extract_strided_slice %10 {offsets = [0, 27], sizes = [16, 896], strides = [1, 1]} : vector<16x1024xf32> to vector<16x896xf32>
    %17 = vector.extract_strided_slice %10 {offsets = [0, 50], sizes = [16, 896], strides = [1, 1]} : vector<16x1024xf32> to vector<16x896xf32>
    %18 = vector.extract_strided_slice %10 {offsets = [0, 51], sizes = [16, 896], strides = [1, 1]} : vector<16x1024xf32> to vector<16x896xf32>
    %19 = vector.extract_strided_slice %10 {offsets = [0, 52], sizes = [16, 896], strides = [1, 1]} : vector<16x1024xf32> to vector<16x896xf32>
    %20 = tpu.concatenate %11, %12, %13, %14, %15, %16, %17, %18, %19 in 0 : vector<16x896xf32>, vector<16x896xf32>, vector<16x896xf32>, vector<16x896xf32>, vector<16x896xf32>, vector<16x896xf32>, vector<16x896xf32>, vector<16x896xf32>, vector<16x896xf32> -> vector<144x896xf32>
    %c0_8 = arith.constant 0 : index
    %c0_9 = arith.constant 0 : index
    %21 = vector.load %arg4[%c0_8, %c0_9] : memref<16x144xf32, #tpu.memory_space<vmem>>, vector<16x144xf32>
    %cst_10 = arith.constant dense<0.000000e+00> : vector<16x896xf32>
    %22 = tpu.matmul %21, %20, %cst_10 {dimension_numbers = #tpu.dot_dimension_numbers<[1], [0], [0], [1], [0, 0, 1, 1], [], []>} : vector<16x144xf32>, vector<144x896xf32>, vector<16x896xf32> -> vector<16x896xf32>
    %c0_11 = arith.constant 0 : index
    %c0_12 = arith.constant 0 : index
    %23 = vector.load %arg5[%c0_11, %c0_12] : memref<16x1xf32, #tpu.memory_space<vmem>>, vector<16x1xf32>
    %24 = vector.broadcast %23 : vector<16x1xf32> to vector<16x896xf32>
    %25 = arith.addf %22, %24 : vector<16x896xf32>
    %cst_13 = arith.constant dense<0xFF800000> : vector<896xf32>
    %26 = vector.multi_reduction <maximumf>, %25, %cst_13 [0] : vector<16x896xf32> to vector<896xf32>
    %27 = vector.shape_cast %26 : vector<896xf32> to vector<1x896xf32>
    %28 = vector.broadcast %27 : vector<1x896xf32> to vector<16x896xf32>
    %29 = arith.subf %25, %28 : vector<16x896xf32>
    %30 = math.exp %29 : vector<16x896xf32>
    %cst_14 = arith.constant dense<0.000000e+00> : vector<896xf32>
    %31 = vector.multi_reduction <add>, %30, %cst_14 [0] : vector<16x896xf32> to vector<896xf32>
    %32 = vector.shape_cast %31 : vector<896xf32> to vector<1x896xf32>
    %33 = tpu.reciprocal %32 {approx = true} : vector<1x896xf32> -> vector<1x896xf32>
    %c0_15 = arith.constant 0 : index
    %c0_16 = arith.constant 0 : index
    %34 = vector.load %arg6[%c0_15, %c0_16] : memref<1x896xf32, #tpu.memory_space<vmem>>, vector<1x896xf32>
    %35 = arith.mulf %33, %34 : vector<1x896xf32>
    %36 = vector.broadcast %35 : vector<1x896xf32> to vector<16x896xf32>
    %37 = arith.mulf %30, %36 : vector<16x896xf32>
    %38 = vector.extract_strided_slice %37 {offsets = [0, 0], sizes = [16, 768], strides = [1, 1]} : vector<16x896xf32> to vector<16x768xf32>
    %39 = vector.extract_strided_slice %37 {offsets = [0, 1], sizes = [16, 768], strides = [1, 1]} : vector<16x896xf32> to vector<16x768xf32>
    %40 = vector.extract_strided_slice %37 {offsets = [0, 2], sizes = [16, 768], strides = [1, 1]} : vector<16x896xf32> to vector<16x768xf32>
    %41 = vector.extract_strided_slice %37 {offsets = [0, 3], sizes = [16, 768], strides = [1, 1]} : vector<16x896xf32> to vector<16x768xf32>
    %42 = vector.extract_strided_slice %37 {offsets = [0, 25], sizes = [16, 768], strides = [1, 1]} : vector<16x896xf32> to vector<16x768xf32>
    %43 = vector.extract_strided_slice %37 {offsets = [0, 26], sizes = [16, 768], strides = [1, 1]} : vector<16x896xf32> to vector<16x768xf32>
    %44 = vector.extract_strided_slice %37 {offsets = [0, 27], sizes = [16, 768], strides = [1, 1]} : vector<16x896xf32> to vector<16x768xf32>
    %45 = vector.extract_strided_slice %37 {offsets = [0, 28], sizes = [16, 768], strides = [1, 1]} : vector<16x896xf32> to vector<16x768xf32>
    %46 = vector.extract_strided_slice %37 {offsets = [0, 50], sizes = [16, 768], strides = [1, 1]} : vector<16x896xf32> to vector<16x768xf32>
    %47 = vector.extract_strided_slice %37 {offsets = [0, 51], sizes = [16, 768], strides = [1, 1]} : vector<16x896xf32> to vector<16x768xf32>
    %48 = vector.extract_strided_slice %37 {offsets = [0, 52], sizes = [16, 768], strides = [1, 1]} : vector<16x896xf32> to vector<16x768xf32>
    %49 = vector.extract_strided_slice %37 {offsets = [0, 53], sizes = [16, 768], strides = [1, 1]} : vector<16x896xf32> to vector<16x768xf32>
    %50 = vector.extract_strided_slice %37 {offsets = [0, 75], sizes = [16, 768], strides = [1, 1]} : vector<16x896xf32> to vector<16x768xf32>
    %51 = vector.extract_strided_slice %37 {offsets = [0, 76], sizes = [16, 768], strides = [1, 1]} : vector<16x896xf32> to vector<16x768xf32>
    %52 = vector.extract_strided_slice %37 {offsets = [0, 77], sizes = [16, 768], strides = [1, 1]} : vector<16x896xf32> to vector<16x768xf32>
    %53 = vector.extract_strided_slice %37 {offsets = [0, 78], sizes = [16, 768], strides = [1, 1]} : vector<16x896xf32> to vector<16x768xf32>
    %54 = tpu.concatenate %38, %39, %40, %41, %42, %43, %44, %45, %46, %47, %48, %49, %50, %51, %52, %53 in 0 : vector<16x768xf32>, vector<16x768xf32>, vector<16x768xf32>, vector<16x768xf32>, vector<16x768xf32>, vector<16x768xf32>, vector<16x768xf32>, vector<16x768xf32>, vector<16x768xf32>, vector<16x768xf32>, vector<16x768xf32>, vector<16x768xf32>, vector<16x768xf32>, vector<16x768xf32>, vector<16x768xf32>, vector<16x768xf32> -> vector<256x768xf32>
    %c0_17 = arith.constant 0 : index
    %c0_18 = arith.constant 0 : index
    %55 = vector.load %arg7[%c0_17, %c0_18] : memref<8x256xf32, #tpu.memory_space<vmem>>, vector<8x256xf32>
    %cst_19 = arith.constant dense<0.000000e+00> : vector<8x768xf32>
    %56 = tpu.matmul %55, %54, %cst_19 {dimension_numbers = #tpu.dot_dimension_numbers<[1], [0], [0], [1], [0, 0, 1, 1], [], []>} : vector<8x256xf32>, vector<256x768xf32>, vector<8x768xf32> -> vector<8x768xf32>
    %c0_20 = arith.constant 0 : index
    %c0_21 = arith.constant 0 : index
    %57 = vector.load %arg8[%c0_20, %c0_21] : memref<8x1xf32, #tpu.memory_space<vmem>>, vector<8x1xf32>
    %58 = vector.broadcast %57 : vector<8x1xf32> to vector<8x768xf32>
    %59 = arith.addf %56, %58 : vector<8x768xf32>
    %cst_22 = arith.constant 0.000000e+00 : f32
    %60 = vector.broadcast %cst_22 : f32 to vector<8x768xf32>
    %61 = arith.subf %60, %59 : vector<8x768xf32>
    %62 = math.exp %61 : vector<8x768xf32>
    %cst_23 = arith.constant 1.000000e+00 : f32
    %63 = vector.broadcast %cst_23 : f32 to vector<8x768xf32>
    %64 = arith.addf %63, %62 : vector<8x768xf32>
    %cst_24 = arith.constant 1.000000e+00 : f32
    %65 = vector.broadcast %cst_24 : f32 to vector<8x768xf32>
    %66 = arith.divf %65, %64 : vector<8x768xf32>
    %c0_25 = arith.constant 0 : index
    %c0_26 = arith.constant 0 : index
    %67 = vector.load %arg9[%c0_25, %c0_26] : memref<8x768xf32, #tpu.memory_space<vmem>>, vector<8x768xf32>
    tpu.vector_store %arg9[%c0_25, %c0_26], %66 {strides = array<i32>} : memref<8x768xf32, #tpu.memory_space<vmem>>, vector<8x768xf32>,
    return
  }
}

</mosaic_0001>

<bundles_post_ra>
// kernel: forward.1
= control target key start
LH: loop header
LB: loop body
LE: loop exit
PB: predicated region body
PF: predicated region fallthrough
CT: control target
= control target key end

     0   :  { %vm329_vm0 = vcmask 1045504   ;;  %vm322_vm1 = vcmask 113664   ;;  %s4140_s30 = smov 103   ;;  %s4141_s10 = smov 127   ;;  %vm1431_vm2 = vcmask 621568   ;;  %vm1370_vm3 = vcmask 629760   ;;  %s7453_s0 = inlined_call_operand.vmem [shape: f32[270,1024], index: 0, kind: input, shape index: {}]   ;;  %s7454_s1 = inlined_call_operand.vmem [shape: f32[16,270], index: 1, kind: input, shape index: {}]   ;;  %s7455_s2 = inlined_call_operand.vmem [shape: f32[16,1], index: 2, kind: input, shape index: {}]   ;;  %s7456_s3 = inlined_call_operand.vmem [shape: f32[1,1024], index: 3, kind: input, shape index: {}]   ;;  %s7457_s5 = inlined_call_operand.vmem [shape: f32[16,1], index: 5, kind: input, shape index: {}]   ;;  %s7458_s4 = inlined_call_operand.vmem [shape: f32[16,144], index: 4, kind: input, shape index: {}]   ;;  %s7459_s6 = inlined_call_operand.vmem [shape: f32[1,896], index: 6, kind: input, shape index: {}]   ;;  %s7460_s7 = inlined_call_operand.vmem [shape: f32[8,256], index: 7, kind: input, shape index: {}]   ;;  %s7461_s8 = inlined_call_operand.vmem [shape: f32[8,1], index: 8, kind: input, shape index: {}]   ;;  %s7462_s9 = inlined_call_operand.vmem [shape: f32[8,768], index: 9, kind: output, shape index: {}]  }
   0x1   :  { %v158_v0 = vld [vmem:[%s7453_s0 + $0x3c0] sm:$0xff]  ;;  %v159_v3 = vld [vmem:[%s7453_s0 + $0x3c8] sm:$0xff]  ;;  %v4325_v39 = vld [vmem:[%s7454_s1 + $0x10] sm:$0xff]  ;;  %s4142_s11 = smov 77   ;;  %s4143_s12 = smov 78   ;;  %vm1309_vm4 = vcmask 637952  }
   0x2   :  { %v286_v1 = vld [vmem:[%s7453_s0 + $0x7c0] sm:$0xff]  ;;  %354 = vmatpush.msra.mxu0 %v158_v0  ;;  %423 = vmatpush.msra.mxu3 %v159_v3  ;;  %v151_v7 = vld [vmem:[%s7453_s0 + $0x388] sm:$0xff]  ;;  %s4144_s13 = smov 126   ;;  %s4145_s14 = smov 101   ;;  %vm1248_vm5 = vcmask 826368   ;;  %vm1476_vm6 = vcmask 130048  }
   0x3   :  { %v302_v2 = vld [vmem:[%s7453_s0 + $0x840] sm:$0x3f]  ;;  %377 = vmatpush.msra.mxu1 %v286_v1  ;;  %v287_v8 = vld [vmem:[%s7453_s0 + $0x7c8] sm:$0xff]  ;;  %s4146_s15 = smov 76   ;;  %vm1187_vm7 = vcmask 834560   ;;  %vm1126_vm8 = vcmask 842752  }
   0x4   :  { %v150_v4 = vld [vmem:[%s7453_s0 + $0x380] sm:$0xff]  ;;  %3169 = vmatpush.msk.msra.mxu2 %vm329_vm0, %v302_v2  ;;  %v143_v11 = vld [vmem:[%s7453_s0 + $0x348] sm:$0xff]  ;;  %424 = vmatpush.msra.mxu3 %v151_v7  ;;  %vm1065_vm9 = vcmask 1031168   ;;  %vm1004_vm10 = vcmask 1039360   ;;  %s4148_s27 = smov 100   ;;  %s4149_s28 = smov 50  }
   0x5   :  { %v278_v5 = vld [vmem:[%s7453_s0 + $0x780] sm:$0xff]  ;;  %355 = vmatpush.msra.mxu0 %v150_v4  ;;  %v279_v12 = vld [vmem:[%s7453_s0 + $0x788] sm:$0xff]  ;;  %v160_v4 = vld [vmem:[%s7453_s0 + $0x3d0] sm:$0xff]  ;;  %s4150_s29 = smov 51   ;;  %s4153_s16 = smov 75   ;;  %vm2772_vm11 = vcmask 408576  }
   0x6   :  { %v294_v6 = vld [vmem:[%s7453_s0 + $0x800] sm:$0xff]  ;;  %378 = vmatpush.msra.mxu1 %v278_v5  ;;  %v135_v15 = vld [vmem:[%s7453_s0 + $0x308] sm:$0xff]  ;;  %425 = vmatpush.msra.mxu3 %v143_v11  ;;  %v288_v5 = vld [vmem:[%s7453_s0 + $0x7d0] sm:$0xff]  ;;  %vm2351_vm12 = vcmask 818176   ;;  %vm2719_vm13 = vcmask 416768   ;;  %vm2666_vm14 = vcmask 424960  }
   0x7   :  { %v142_v9 = vld [vmem:[%s7453_s0 + $0x340] sm:$0xff]  ;;  %415 = vmatpush.msra.mxu2 %v294_v6  ;;  %v271_v16 = vld [vmem:[%s7453_s0 + $0x748] sm:$0xff]  ;;  %v161_v6 = vld [vmem:[%s7453_s0 + $0x3d8] sm:$0xff]  ;;  %vm2613_vm15 = vcmask 433152  }
   0x8   :  { %v270_v10 = vld [vmem:[%s7453_s0 + $0x740] sm:$0xff]  ;;  %356 = vmatpush.msra.mxu0 %v142_v9  ;;  %v127_v19 = vld [vmem:[%s7453_s0 + $0x2c8] sm:$0xff]  ;;  %426 = vmatpush.msra.mxu3 %v135_v15  ;;  %v152_v9 = vld [vmem:[%s7453_s0 + $0x390] sm:$0xff] }
   0x9   :  { %v134_v13 = vld [vmem:[%s7453_s0 + $0x300] sm:$0xff]  ;;  %446 = vmatpush.msrb.mxu2 %v287_v8  ;;  %379 = vmatpush.msra.mxu1 %v270_v10  ;;  %v263_v20 = vld [vmem:[%s7453_s0 + $0x708] sm:$0xff]  ;;  %v280_v10 = vld [vmem:[%s7453_s0 + $0x790] sm:$0xff] }
   0xa   :  { %v262_v14 = vld [vmem:[%s7453_s0 + $0x700] sm:$0xff]  ;;  %357 = vmatpush.msra.mxu0 %v134_v13  ;;  %v119_v23 = vld [vmem:[%s7453_s0 + $0x288] sm:$0xff]  ;;  %427 = vmatpush.msra.mxu3 %v127_v19  ;;  %v153_v11 = vld [vmem:[%s7453_s0 + $0x398] sm:$0xff] }
   0xb   :  { %v126_v17 = vld [vmem:[%s7453_s0 + $0x2c0] sm:$0xff]  ;;  %447 = vmatpush.msrb.mxu2 %v279_v12  ;;  %380 = vmatpush.msra.mxu1 %v262_v14  ;;  %v255_v24 = vld [vmem:[%s7453_s0 + $0x6c8] sm:$0xff]  ;;  %v144_v12 = vld [vmem:[%s7453_s0 + $0x350] sm:$0xff] }
   0xc   :  { %v254_v18 = vld [vmem:[%s7453_s0 + $0x6c0] sm:$0xff]  ;;  %358 = vmatpush.msra.mxu0 %v126_v17  ;;  %v111_v27 = vld [vmem:[%s7453_s0 + $0x248] sm:$0xff]  ;;  %428 = vmatpush.msra.mxu3 %v119_v23  ;;  %v272_v13 = vld [vmem:[%s7453_s0 + $0x750] sm:$0xff] }
   0xd   :  { %v118_v21 = vld [vmem:[%s7453_s0 + $0x280] sm:$0xff]  ;;  %448 = vmatpush.msrb.mxu2 %v271_v16  ;;  %381 = vmatpush.msra.mxu1 %v254_v18  ;;  %v247_v28 = vld [vmem:[%s7453_s0 + $0x688] sm:$0xff]  ;;  %v145_v14 = vld [vmem:[%s7453_s0 + $0x358] sm:$0xff] }
   0xe   :  { %v246_v22 = vld [vmem:[%s7453_s0 + $0x680] sm:$0xff]  ;;  %359 = vmatpush.msra.mxu0 %v118_v21  ;;  %v103_v31 = vld [vmem:[%s7453_s0 + $0x208] sm:$0xff]  ;;  %429 = vmatpush.msra.mxu3 %v111_v27  ;;  %v136_v15 = vld [vmem:[%s7453_s0 + $0x310] sm:$0xff]  ;;  %v4138_v21 = vmov 0  }
   0xf   :  { %v110_v25 = vld [vmem:[%s7453_s0 + $0x240] sm:$0xff]  ;;  %449 = vmatpush.msrb.mxu2 %v263_v20  ;;  %382 = vmatpush.msra.mxu1 %v246_v22  ;;  %v239_v32 = vld [vmem:[%s7453_s0 + $0x648] sm:$0xff]  ;;  %v264_v16 = vld [vmem:[%s7453_s0 + $0x710] sm:$0xff] }
  0x10   :  { %v238_v26 = vld [vmem:[%s7453_s0 + $0x640] sm:$0xff]  ;;  %360 = vmatpush.msra.mxu0 %v110_v25  ;;  %v95_v35 = vld [vmem:[%s7453_s0 + $0x1c8] sm:$0xff]  ;;  %430 = vmatpush.msra.mxu3 %v103_v31  ;;  %v137_v17 = vld [vmem:[%s7453_s0 + $0x318] sm:$0xff] }
  0x11   :  { %v102_v29 = vld [vmem:[%s7453_s0 + $0x200] sm:$0xff]  ;;  %450 = vmatpush.msrb.mxu2 %v255_v24  ;;  %383 = vmatpush.msra.mxu1 %v238_v26  ;;  %v231_v36 = vld [vmem:[%s7453_s0 + $0x608] sm:$0xff]  ;;  %v4473_v19 = vld [vmem:[%s7454_s1 + $0x18] sm:$0xff] }
  0x12   :  { %v230_v30 = vld [vmem:[%s7453_s0 + $0x600] sm:$0xff]  ;;  %361 = vmatpush.msra.mxu0 %v102_v29  ;;  %431 = vmatpush.msra.mxu3 %v95_v35  ;;  %v87_v40 = vld [vmem:[%s7453_s0 + $0x188] sm:$0xff]  ;;  %v128_v20 = vld [vmem:[%s7453_s0 + $0x2d0] sm:$0xff] }
  0x13   :  { %v94_v33 = vld [vmem:[%s7453_s0 + $0x1c0] sm:$0xff]  ;;  %451 = vmatpush.msrb.mxu2 %v247_v28  ;;  %384 = vmatpush.msra.mxu1 %v230_v30  ;;  %v223_v41 = vld [vmem:[%s7453_s0 + $0x5c8] sm:$0xff]  ;;  %v256_v22 = vld [vmem:[%s7453_s0 + $0x6d0] sm:$0xff] }
  0x14   :  { %v222_v34 = vld [vmem:[%s7453_s0 + $0x5c0] sm:$0xff]  ;;  %362 = vmatpush.msra.mxu0 %v94_v33  ;;  %3170 = vmatmul.msk.f32.vlgmr.msra.gmra.mxu2 %vm322_vm1, %v4325_v39  ;;  %v79_v44 = vld [vmem:[%s7453_s0 + $0x148] sm:$0xff]  ;;  %v129_v23 = vld [vmem:[%s7453_s0 + $0x2d8] sm:$0xff] }
  0x15   :  { %v86_v37 = vld [vmem:[%s7453_s0 + $0x180] sm:$0xff]  ;;  %452 = vmatpush.msrb.mxu2 %v239_v32  ;;  %385 = vmatpush.msra.mxu1 %v222_v34  ;;  %v215_v45 = vld [vmem:[%s7453_s0 + $0x588] sm:$0xff]  ;;  %v120_v25 = vld [vmem:[%s7453_s0 + $0x290] sm:$0xff] }
  0x16   :  { %v214_v38 = vld [vmem:[%s7453_s0 + $0x580] sm:$0xff]  ;;  %363 = vmatpush.msra.mxu0 %v86_v37  ;;  %432 = vmatpush.msra.mxu3 %v87_v40  ;;  %v71_v48 = vld [vmem:[%s7453_s0 + $0x108] sm:$0xff]  ;;  %v248_v26 = vld [vmem:[%s7453_s0 + $0x690] sm:$0xff] }
  0x17   :  { %453 = vmatpush.msrb.mxu2 %v231_v36  ;;  %v78_v42 = vld [vmem:[%s7453_s0 + $0x140] sm:$0xff]  ;;  %386 = vmatpush.msra.mxu1 %v214_v38  ;;  %v207_v49 = vld [vmem:[%s7453_s0 + $0x548] sm:$0xff]  ;;  %v121_v27 = vld [vmem:[%s7453_s0 + $0x298] sm:$0xff] }
  0x18   :  { %v206_v43 = vld [vmem:[%s7453_s0 + $0x540] sm:$0xff]  ;;  %364 = vmatpush.msra.mxu0 %v78_v42  ;;  %433 = vmatpush.msra.mxu3 %v79_v44  ;;  %v63_v52 = vld [vmem:[%s7453_s0 + $0xc8] sm:$0xff]  ;;  %v112_v28 = vld [vmem:[%s7453_s0 + $0x250] sm:$0xff] }
  0x19   :  { %454 = vmatpush.msrb.mxu2 %v223_v41  ;;  %v70_v46 = vld [vmem:[%s7453_s0 + $0x100] sm:$0xff]  ;;  %387 = vmatpush.msra.mxu1 %v206_v43  ;;  %v199_v53 = vld [vmem:[%s7453_s0 + $0x508] sm:$0xff]  ;;  %v240_v29 = vld [vmem:[%s7453_s0 + $0x650] sm:$0xff] }
  0x1a   :  { %v198_v47 = vld [vmem:[%s7453_s0 + $0x500] sm:$0xff]  ;;  %365 = vmatpush.msra.mxu0 %v70_v46  ;;  %434 = vmatpush.msra.mxu3 %v71_v48  ;;  %v4380_v56 = vld [vmem:[%s7454_s1 + $0x28] sm:$0xff]  ;;  %v113_v30 = vld [vmem:[%s7453_s0 + $0x258] sm:$0xff] }
  0x1b   :  { %455 = vmatpush.msrb.mxu2 %v215_v45  ;;  %v62_v50 = vld [vmem:[%s7453_s0 + $0xc0] sm:$0xff]  ;;  %388 = vmatpush.msra.mxu1 %v198_v47  ;;  %v55_v57 = vld [vmem:[%s7453_s0 + $0x88] sm:$0xff]  ;;  %v104_v32 = vld [vmem:[%s7453_s0 + $0x210] sm:$0xff] }
  0x1c   :  { %v190_v51 = vld [vmem:[%s7453_s0 + $0x4c0] sm:$0xff]  ;;  %366 = vmatpush.msra.mxu0 %v62_v50  ;;  %435 = vmatpush.msra.mxu3 %v63_v52  ;;  %v191_v58 = vld [vmem:[%s7453_s0 + $0x4c8] sm:$0xff]  ;;  %v232_v33 = vld [vmem:[%s7453_s0 + $0x610] sm:$0xff] }
  0x1d   :  { %456 = vmatpush.msrb.mxu2 %v207_v49  ;;  %v54_v54 = vld [vmem:[%s7453_s0 + $0x80] sm:$0xff]  ;;  %389 = vmatpush.msra.mxu1 %v190_v51  ;;  %v47_v61 = vld [vmem:[%s7453_s0 + $0x48] sm:$0xff]  ;;  %v105_v34 = vld [vmem:[%s7453_s0 + $0x218] sm:$0xff] }
  0x1e   :  { %v182_v55 = vld [vmem:[%s7453_s0 + $0x480] sm:$0xff]  ;;  %367 = vmatpush.msra.mxu0 %v54_v54  ;;  %3171 = vmatmul.msk.f32.gmra.mxu2 %vm322_vm1, %v4380_v56  ;;  %v183_v62 = vld [vmem:[%s7453_s0 + $0x488] sm:$0xff]  ;;  %v96_v36 = vld [vmem:[%s7453_s0 + $0x1d0] sm:$0xff] }
  0x1f   :  { %457 = vmatpush.msrb.mxu2 %v199_v53  ;;  %v46_v59 = vld [vmem:[%s7453_s0 + $0x40] sm:$0xff]  ;;  %390 = vmatpush.msra.mxu1 %v182_v55  ;;  %v39_v1 = vld [vmem:[%s7453_s0 + $0x8] sm:$0xff]  ;;  %v224_v37 = vld [vmem:[%s7453_s0 + $0x5d0] sm:$0xff] }
  0x20   :  { %v174_v60 = vld [vmem:[%s7453_s0 + $0x440] sm:$0xff]  ;;  %436 = vmatpush.msra.mxu3 %v55_v57  ;;  %368 = vmatpush.msra.mxu0 %v46_v59  ;;  %v175_v3 = vld [vmem:[%s7453_s0 + $0x448] sm:$0xff]  ;;  %v304_v38 = vld [vmem:[%s7453_s0 + $0x850] sm:$0x3f] }
  0x21   :  { %v38_v63 = vld [vmem:[%s7453_s0] sm:$0xff]  ;;  %458 = vmatpush.msrb.mxu2 %v191_v58  ;;  %391 = vmatpush.msra.mxu1 %v174_v60  ;;  %v4432_v7 = vld [vmem:[%s7454_s1 + $0x8] sm:$0xff]  ;;  %v97_v40 = vld [vmem:[%s7453_s0 + $0x1d8] sm:$0xff] }
  0x22   :  { %v166_v0 = vld [vmem:[%s7453_s0 + $0x400] sm:$0xff]  ;;  %437 = vmatpush.msra.mxu3 %v47_v61  ;;  %369 = vmatpush.msra.mxu0 %v38_v63  ;;  %v167_v8 = vld [vmem:[%s7453_s0 + $0x408] sm:$0xff]  ;;  %v88_v41 = vld [vmem:[%s7453_s0 + $0x190] sm:$0xff] }
  0x23   :  { %v4414_v2 = vld [vmem:[%s7454_s1] sm:$0xff]  ;;  %459 = vmatpush.msrb.mxu2 %v183_v62  ;;  %392 = vmatpush.msra.mxu1 %v166_v0  ;;  %v303_v31 = vld [vmem:[%s7453_s0 + $0x848] sm:$0x3f]  ;;  %v216_v42 = vld [vmem:[%s7453_s0 + $0x590] sm:$0xff] }
  0x24   :  { %438 = vmatpush.msra.mxu3 %v39_v1  ;;  %370 = vmatmul.f32.vlgmr.msra.gmra.mxu0 %v4414_v2  ;;  %v310_v18 = vld [vmem:[%s7455_s2] sm:$0xff]  ;;  %v295_v35 = vld [vmem:[%s7453_s0 + $0x808] sm:$0xff]  ;;  %v296_v43 = vld [vmem:[%s7453_s0 + $0x810] sm:$0xff] }
  0x25   :  { %460 = vmatpush.msrb.mxu2 %v175_v3  ;;  %492 = vmatpush.msrb.mxu1 %v160_v4  ;;  %v4488_v24 = vld [vmem:[%s7454_s1 + $0x20] sm:$0xff]  ;;  %v89_v44 = vld [vmem:[%s7453_s0 + $0x198] sm:$0xff]  ;;  %v311_v45 = vld [vmem:[%s7455_s2 + $0x8] sm:$0xff] }
  0x26   :  { %515 = vmatpush.msrb.mxu3 %v288_v5  ;;  %561 = vmatpush.msrb.mxu0 %v161_v6  ;;  %v289_v46 = vld [vmem:[%s7453_s0 + $0x7d8] sm:$0xff]  ;;  %v80_v47 = vld [vmem:[%s7453_s0 + $0x150] sm:$0xff] }
  0x27   :  { %439 = vmatmul.f32.vlgmr.msra.gmra.mxu3 %v4414_v2  ;;  %393 = vmatmul.f32.vlgmr.msra.gmra.mxu1 %v4432_v7  ;;  %v208_v48 = vld [vmem:[%s7453_s0 + $0x550] sm:$0xff]  ;;  %v81_v49 = vld [vmem:[%s7453_s0 + $0x158] sm:$0xff] }
  0x28   :  { %461 = vmatpush.msrb.mxu2 %v167_v8  ;;  %493 = vmatpush.msrb.mxu1 %v152_v9  ;;  %v281_v50 = vld [vmem:[%s7453_s0 + $0x798] sm:$0xff]  ;;  %v72_v51 = vld [vmem:[%s7453_s0 + $0x110] sm:$0xff] }
  0x29   :  { %516 = vmatpush.msrb.mxu3 %v280_v10  ;;  %562 = vmatpush.msrb.mxu0 %v153_v11  ;;  %v200_v52 = vld [vmem:[%s7453_s0 + $0x510] sm:$0xff]  ;;  %v73_v53 = vld [vmem:[%s7453_s0 + $0x118] sm:$0xff]  ;;  %v162_v10 = vld [vmem:[%s7453_s0 + $0x3e0] sm:$0xff] }
  0x2a   :  { %462 = vmatmul.f32.vlgmr.msrb.gmra.mxu2 %v4432_v7  ;;  %494 = vmatpush.msrb.mxu1 %v144_v12  ;;  %v273_v54 = vld [vmem:[%s7453_s0 + $0x758] sm:$0xff]  ;;  %v64_v55 = vld [vmem:[%s7453_s0 + $0xd0] sm:$0xff]  ;;  %v290_v11 = vld [vmem:[%s7453_s0 + $0x7e0] sm:$0xff] }
  0x2b   :  { %517 = vmatpush.msrb.mxu3 %v272_v13  ;;  %563 = vmatpush.msrb.mxu0 %v145_v14  ;;  %v192_v57 = vld [vmem:[%s7453_s0 + $0x4d0] sm:$0xff]  ;;  %v65_v58 = vld [vmem:[%s7453_s0 + $0xd8] sm:$0xff]  ;;  %v154_v14 = vld [vmem:[%s7453_s0 + $0x3a0] sm:$0xff] }
  0x2c   :  { %3223 = vset.pattern.permute.xlu0 %v4138_v21  ;;  %495 = vmatpush.msrb.mxu1 %v136_v15  ;;  %v265_v59 = vld [vmem:[%s7453_s0 + $0x718] sm:$0xff]  ;;  %v56_v60 = vld [vmem:[%s7453_s0 + $0x90] sm:$0xff]  ;;  %v282_v15 = vld [vmem:[%s7453_s0 + $0x7a0] sm:$0xff] }
  0x2d   :  { %518 = vmatpush.msrb.mxu3 %v264_v16  ;;  %564 = vmatpush.msrb.mxu0 %v137_v17  ;;  %v184_v61 = vld [vmem:[%s7453_s0 + $0x490] sm:$0xff]  ;;  %v57_v62 = vld [vmem:[%s7453_s0 + $0x98] sm:$0xff]  ;;  %v146_v17 = vld [vmem:[%s7453_s0 + $0x360] sm:$0xff] }
  0x2e   :  { %314 = vperm.xlu0 %3223, %v310_v18   ;;  %373 = vmatmul.f32.gmra.mxu0 %v4473_v19  ;;  %v48_v63 = vld [vmem:[%s7453_s0 + $0x50] sm:$0xff]  ;;  %v257_v0 = vld [vmem:[%s7453_s0 + $0x6d8] sm:$0xff]  ;;  %v274_v18 = vld [vmem:[%s7453_s0 + $0x760] sm:$0xff] }
  0x2f   :  { %496 = vmatpush.msrb.mxu1 %v128_v20  ;;  %519 = vmatpush.msrb.mxu3 %v256_v22  ;;  %v176_v1 = vld [vmem:[%s7453_s0 + $0x450] sm:$0xff]  ;;  %v49_v3 = vld [vmem:[%s7453_s0 + $0x58] sm:$0xff] }
  0x30   :  { %565 = vmatpush.msrb.mxu0 %v129_v23  ;;  %442 = vmatmul.f32.gmra.mxu3 %v4473_v19  ;;  %v40_v4 = vld [vmem:[%s7453_s0 + $0x10] sm:$0xff]  ;;  %v249_v5 = vld [vmem:[%s7453_s0 + $0x698] sm:$0xff]  ;;  %v138_v23 = vld [vmem:[%s7453_s0 + $0x320] sm:$0xff] }
  0x31   :  { %396 = vmatmul.f32.gmra.mxu1 %v4488_v24  ;;  %520 = vmatpush.msrb.mxu3 %v248_v26  ;;  %v168_v6 = vld [vmem:[%s7453_s0 + $0x410] sm:$0xff]  ;;  %v41_v8 = vld [vmem:[%s7453_s0 + $0x18] sm:$0xff] }
  0x32   :  { %497 = vmatpush.msrb.mxu1 %v120_v25  ;;  %566 = vmatpush.msrb.mxu0 %v121_v27  ;;  %v241_v9 = vld [vmem:[%s7453_s0 + $0x658] sm:$0xff]  ;;  %v266_v25 = vld [vmem:[%s7453_s0 + $0x720] sm:$0xff] }
  0x33   :  { %465 = vmatmul.f32.gmra.mxu2 %v4488_v24  ;;  %521 = vmatpush.msrb.mxu3 %v240_v29  ;;  %v305_v12 = vld [vmem:[%s7453_s0 + $0x858] sm:$0x3f]  ;;  %v130_v27 = vld [vmem:[%s7453_s0 + $0x2e0] sm:$0xff] }
  0x34   :  { %498 = vmatpush.msrb.mxu1 %v112_v28  ;;  %567 = vmatpush.msrb.mxu0 %v113_v30  ;;  %v233_v13 = vld [vmem:[%s7453_s0 + $0x618] sm:$0xff]  ;;  %v258_v28 = vld [vmem:[%s7453_s0 + $0x6e0] sm:$0xff] }
  0x35   :  { %3172 = vmatpush.msk.msra.mxu2 %vm329_vm0, %v303_v31  ;;  %522 = vmatpush.msrb.mxu3 %v232_v33  ;;  %v225_v16 = vld [vmem:[%s7453_s0 + $0x5d8] sm:$0xff]  ;;  %v306_v29 = vld [vmem:[%s7453_s0 + $0x860] sm:$0x3f] }
  0x36   :  { %499 = vmatpush.msrb.mxu1 %v104_v32  ;;  %568 = vmatpush.msrb.mxu0 %v105_v34  ;;  %v297_v20 = vld [vmem:[%s7453_s0 + $0x818] sm:$0xff]  ;;  %v122_v31 = vld [vmem:[%s7453_s0 + $0x2a0] sm:$0xff] }
  0x37   :  { %484 = vmatpush.msra.mxu2 %v295_v35  ;;  %523 = vmatpush.msrb.mxu3 %v224_v37  ;;  %v217_v22 = vld [vmem:[%s7453_s0 + $0x598] sm:$0xff]  ;;  %v250_v32 = vld [vmem:[%s7453_s0 + $0x6a0] sm:$0xff] }
  0x38   :  { %500 = vmatpush.msrb.mxu1 %v96_v36  ;;  %569 = vmatpush.msrb.mxu0 %v97_v40  ;;  %v209_v26 = vld [vmem:[%s7453_s0 + $0x558] sm:$0xff]  ;;  %v114_v34 = vld [vmem:[%s7453_s0 + $0x260] sm:$0xff] }
  0x39   :  { %3175 = vmatpush.msk.msrb.mxu2 %vm329_vm0, %v304_v38  ;;  %524 = vmatpush.msrb.mxu3 %v216_v42  ;;  %v201_v30 = vld [vmem:[%s7453_s0 + $0x518] sm:$0xff]  ;;  %v242_v35 = vld [vmem:[%s7453_s0 + $0x660] sm:$0xff] }
  0x3a   :  { %501 = vmatpush.msrb.mxu1 %v88_v41  ;;  %570 = vmatpush.msrb.mxu0 %v89_v44  ;;  %v193_v33 = vld [vmem:[%s7453_s0 + $0x4d8] sm:$0xff]  ;;  %v298_v36 = vld [vmem:[%s7453_s0 + $0x820] sm:$0xff]  ;;  %v291_v44 = vld [vmem:[%s7453_s0 + $0x7e8] sm:$0xff] }
  0x3b   :  { %553 = vmatpush.msrb.mxu2 %v296_v43  ;;  %319 = vperm.xlu0 %3223, %v311_v45   ;;  %v185_v37 = vld [vmem:[%s7453_s0 + $0x498] sm:$0xff]  ;;  %v106_v38 = vld [vmem:[%s7453_s0 + $0x220] sm:$0xff] }
  0x3c   :  { %3173 = vmatmul.msk.f32.vlgmr.msra.gmra.mxu2 %vm322_vm1, %v4325_v39  ;;  %502 = vmatpush.msrb.mxu1 %v80_v47  ;;  %v234_v40 = vld [vmem:[%s7453_s0 + $0x620] sm:$0xff]  ;;  %v177_v41 = vld [vmem:[%s7453_s0 + $0x458] sm:$0xff] }
  0x3d   :  { %584 = vmatpush.msra.mxu2 %v289_v46  ;;  %525 = vmatpush.msrb.mxu3 %v208_v48  ;;  %v98_v42 = vld [vmem:[%s7453_s0 + $0x1e0] sm:$0xff]  ;;  %v169_v45 = vld [vmem:[%s7453_s0 + $0x418] sm:$0xff]  ;;  %v283_v48 = vld [vmem:[%s7453_s0 + $0x7a8] sm:$0xff] }
  0x3e   :  { %571 = vmatpush.msrb.mxu0 %v81_v49  ;;  %503 = vmatpush.msrb.mxu1 %v72_v51  ;;  %v226_v43 = vld [vmem:[%s7453_s0 + $0x5e0] sm:$0xff]  ;;  %v163_v49 = vld [vmem:[%s7453_s0 + $0x3e8] sm:$0xff] }
  0x3f   :  { %585 = vmatpush.msra.mxu2 %v281_v50  ;;  %526 = vmatpush.msrb.mxu3 %v200_v52  ;;  %v90_v46 = vld [vmem:[%s7453_s0 + $0x1a0] sm:$0xff]  ;;  %v275_v52 = vld [vmem:[%s7453_s0 + $0x768] sm:$0xff] }
  0x40   :  { %572 = vmatpush.msrb.mxu0 %v73_v53  ;;  %504 = vmatpush.msrb.mxu1 %v64_v55  ;;  %v218_v47 = vld [vmem:[%s7453_s0 + $0x5a0] sm:$0xff]  ;;  %v155_v53 = vld [vmem:[%s7453_s0 + $0x3a8] sm:$0xff] }
  0x41   :  { %586 = vmatpush.msra.mxu2 %v273_v54  ;;  %527 = vmatpush.msrb.mxu3 %v192_v57  ;;  %v82_v50 = vld [vmem:[%s7453_s0 + $0x160] sm:$0xff]  ;;  %v267_v57 = vld [vmem:[%s7453_s0 + $0x728] sm:$0xff] }
  0x42   :  { %573 = vmatpush.msrb.mxu0 %v65_v58  ;;  %505 = vmatpush.msrb.mxu1 %v56_v60  ;;  %v210_v51 = vld [vmem:[%s7453_s0 + $0x560] sm:$0xff]  ;;  %v147_v58 = vld [vmem:[%s7453_s0 + $0x368] sm:$0xff] }
  0x43   :  { %587 = vmatpush.msra.mxu2 %v265_v59  ;;  %528 = vmatpush.msrb.mxu3 %v184_v61  ;;  %v74_v54 = vld [vmem:[%s7453_s0 + $0x120] sm:$0xff]  ;;  %v259_v61 = vld [vmem:[%s7453_s0 + $0x6e8] sm:$0xff] }
  0x44   :  { %574 = vmatpush.msrb.mxu0 %v57_v62  ;;  %3174 = vmatmul.msk.f32.gmra.mxu2 %vm322_vm1, %v4380_v56  ;;  %v202_v55 = vld [vmem:[%s7453_s0 + $0x520] sm:$0xff]  ;;  %v139_v62 = vld [vmem:[%s7453_s0 + $0x328] sm:$0xff] }
  0x45   :  { %506 = vmatpush.msrb.mxu1 %v48_v63  ;;  %588 = vmatpush.msra.mxu2 %v257_v0  ;;  %v66_v59 = vld [vmem:[%s7453_s0 + $0xe0] sm:$0xff] }
  0x46   :  { %529 = vmatpush.msrb.mxu3 %v176_v1  ;;  %575 = vmatpush.msrb.mxu0 %v49_v3  ;;  %v194_v60 = vld [vmem:[%s7453_s0 + $0x4e0] sm:$0xff]  ;;  %v251_v1 = vld [vmem:[%s7453_s0 + $0x6a8] sm:$0xff] }
  0x47   :  { %507 = vmatpush.msrb.mxu1 %v40_v4  ;;  %589 = vmatpush.msra.mxu2 %v249_v5  ;;  %v58_v63 = vld [vmem:[%s7453_s0 + $0xa0] sm:$0xff]  ;;  %v131_v3 = vld [vmem:[%s7453_s0 + $0x2e8] sm:$0xff] }
  0x48   :  { %530 = vmatpush.msrb.mxu3 %v168_v6  ;;  %576 = vmatpush.msrb.mxu0 %v41_v8  ;;  %v186_v0 = vld [vmem:[%s7453_s0 + $0x4a0] sm:$0xff]  ;;  %v243_v6 = vld [vmem:[%s7453_s0 + $0x668] sm:$0xff] }
  0x49   :  { %508 = vmatmul.f32.vlgmr.msrb.gmra.mxu1 %v4414_v2  ;;  %531 = vmatmul.f32.vlgmr.msrb.gmra.mxu3 %v4432_v7  ;;  %v50_v4 = vld [vmem:[%s7453_s0 + $0x60] sm:$0xff]  ;;  %v123_v8 = vld [vmem:[%s7453_s0 + $0x2a8] sm:$0xff] }
  0x4a   :  { %577 = vmatmul.f32.vlgmr.msrb.gmra.mxu0 %v4414_v2  ;;  %590 = vmatpush.msra.mxu2 %v241_v9  ;;  %v178_v5 = vld [vmem:[%s7453_s0 + $0x460] sm:$0xff] }
  0x4b   :  { %630 = vmatpush.msra.mxu3 %v162_v10  ;;  %653 = vmatpush.msra.mxu0 %v290_v11  ;;  %v42_v9 = vld [vmem:[%s7453_s0 + $0x20] sm:$0xff]  ;;  %v235_v11 = vld [vmem:[%s7453_s0 + $0x628] sm:$0xff] }
  0x4c   :  { %3178 = vmatpush.msk.msra.mxu1 %vm329_vm0, %v305_v12  ;;  %591 = vmatpush.msra.mxu2 %v233_v13  ;;  %v170_v10 = vld [vmem:[%s7453_s0 + $0x420] sm:$0xff]  ;;  %v115_v12 = vld [vmem:[%s7453_s0 + $0x268] sm:$0xff] }
  0x4d   :  { %631 = vmatpush.msra.mxu3 %v154_v14  ;;  %654 = vmatpush.msra.mxu0 %v282_v15  ;;  %v307_v13 = vld [vmem:[%s7453_s0 + $0x868] sm:$0x3f]  ;;  %v164_v14 = vld [vmem:[%s7453_s0 + $0x3f0] sm:$0xff] }
  0x4e   :  { %3176 = vmatmul.msk.f32.vlgmr.msrb.gmra.mxu2 %vm322_vm1, %v4325_v39  ;;  %622 = vmatpush.msra.mxu1 %v297_v20  ;;  %v227_v15 = vld [vmem:[%s7453_s0 + $0x5e8] sm:$0xff] }
  0x4f   :  { %592 = vmatpush.msra.mxu2 %v225_v16  ;;  %632 = vmatpush.msra.mxu3 %v146_v17  ;;  %v107_v16 = vld [vmem:[%s7453_s0 + $0x228] sm:$0xff] }
  0x50   :  { %655 = vmatpush.msra.mxu0 %v274_v18  ;;  %3181 = vmatpush.msk.msrb.mxu1 %vm329_vm0, %v306_v29  ;;  %v299_v17 = vld [vmem:[%s7453_s0 + $0x828] sm:$0xff]  ;;  %v156_v18 = vld [vmem:[%s7453_s0 + $0x3b0] sm:$0xff] }
  0x51   :  { %593 = vmatpush.msra.mxu2 %v217_v22  ;;  %633 = vmatpush.msra.mxu3 %v138_v23  ;;  %v219_v20 = vld [vmem:[%s7453_s0 + $0x5a8] sm:$0xff]  ;;  %v292_v22 = vld [vmem:[%s7453_s0 + $0x7f0] sm:$0xff] }
  0x52   :  { %656 = vmatpush.msra.mxu0 %v266_v25  ;;  %511 = vmatmul.f32.gmra.mxu1 %v4473_v19  ;;  %v99_v23 = vld [vmem:[%s7453_s0 + $0x1e8] sm:$0xff]  ;;  %v148_v25 = vld [vmem:[%s7453_s0 + $0x370] sm:$0xff] }
  0x53   :  { %534 = vmatmul.f32.gmra.mxu3 %v4488_v24  ;;  %580 = vmatmul.f32.gmra.mxu0 %v4473_v19  ;;  %v140_v29 = vld [vmem:[%s7453_s0 + $0x330] sm:$0xff] }
  0x54   :  { %594 = vmatpush.msra.mxu2 %v209_v26  ;;  %634 = vmatpush.msra.mxu3 %v130_v27  ;;  %v211_v26 = vld [vmem:[%s7453_s0 + $0x568] sm:$0xff]  ;;  %v284_v27 = vld [vmem:[%s7453_s0 + $0x7b0] sm:$0xff] }
  0x55   :  { %657 = vmatpush.msra.mxu0 %v258_v28  ;;  %691 = vmatpush.msrb.mxu1 %v298_v36  ;;  %v91_v28 = vld [vmem:[%s7453_s0 + $0x1a8] sm:$0xff] }
  0x56   :  { %595 = vmatpush.msra.mxu2 %v201_v30  ;;  %635 = vmatpush.msra.mxu3 %v122_v31  ;;  %v203_v30 = vld [vmem:[%s7453_s0 + $0x528] sm:$0xff]  ;;  %v276_v31 = vld [vmem:[%s7453_s0 + $0x770] sm:$0xff] }
  0x57   :  { %658 = vmatpush.msra.mxu0 %v250_v32  ;;  %3177 = vmatmul.msk.f32.gmra.mxu2 %vm322_vm1, %v4380_v56  ;;  %v83_v32 = vld [vmem:[%s7453_s0 + $0x168] sm:$0xff] }
  0x58   :  { %596 = vmatpush.msra.mxu2 %v193_v33  ;;  %636 = vmatpush.msra.mxu3 %v114_v34  ;;  %v132_v33 = vld [vmem:[%s7453_s0 + $0x2f0] sm:$0xff]  ;;  %v195_v34 = vld [vmem:[%s7453_s0 + $0x4e8] sm:$0xff] }
  0x59   :  { %659 = vmatpush.msra.mxu0 %v242_v35  ;;  %v268_v35 = vld [vmem:[%s7453_s0 + $0x730] sm:$0xff]  ;;  %v75_v36 = vld [vmem:[%s7453_s0 + $0x128] sm:$0xff]  ;;  %3539 = vset.pattern.permute.xlu1 %v4138_v21 }
  0x5a   :  { %597 = vmatpush.msra.mxu2 %v185_v37  ;;  %637 = vmatpush.msra.mxu3 %v106_v38  ;;  %v124_v37 = vld [vmem:[%s7453_s0 + $0x2b0] sm:$0xff]  ;;  %v187_v38 = vld [vmem:[%s7453_s0 + $0x4a8] sm:$0xff] }
  0x5b   :  { %660 = vmatpush.msra.mxu0 %v234_v40  ;;  %3179 = vmatmul.msk.f32.vlgmr.msra.gmra.mxu1 %vm322_vm1, %v4325_v39  ;;  %v260_v40 = vld [vmem:[%s7453_s0 + $0x6f0] sm:$0xff] }
  0x5c   :  { %598 = vmatpush.msra.mxu2 %v177_v41  ;;  %638 = vmatpush.msra.mxu3 %v98_v42  ;;  %v67_v41 = vld [vmem:[%s7453_s0 + $0xe8] sm:$0xff]  ;;  %v116_v42 = vld [vmem:[%s7453_s0 + $0x270] sm:$0xff] }
  0x5d   :  { %661 = vmatpush.msra.mxu0 %v226_v43  ;;  %722 = vmatpush.msra.mxu1 %v291_v44  ;;  %v179_v43 = vld [vmem:[%s7453_s0 + $0x468] sm:$0xff]  ;;  %v252_v44 = vld [vmem:[%s7453_s0 + $0x6b0] sm:$0xff] }
  0x5e   :  { %599 = vmatpush.msra.mxu2 %v169_v45  ;;  %639 = vmatpush.msra.mxu3 %v90_v46  ;;  %v59_v45 = vld [vmem:[%s7453_s0 + $0xa8] sm:$0xff]  ;;  %v108_v46 = vld [vmem:[%s7453_s0 + $0x230] sm:$0xff] }
  0x5f   :  { %662 = vmatpush.msra.mxu0 %v218_v47  ;;  %723 = vmatpush.msra.mxu1 %v283_v48  ;;  %v171_v47 = vld [vmem:[%s7453_s0 + $0x428] sm:$0xff]  ;;  %v244_v48 = vld [vmem:[%s7453_s0 + $0x670] sm:$0xff] }
  0x60   :  { %699 = vmatpush.msrb.mxu2 %v163_v49  ;;  %640 = vmatpush.msra.mxu3 %v82_v50  ;;  %v51_v49 = vld [vmem:[%s7453_s0 + $0x68] sm:$0xff]  ;;  %v100_v50 = vld [vmem:[%s7453_s0 + $0x1f0] sm:$0xff] }
  0x61   :  { %600 = vmatmul.f32.vlgmr.msra.gmra.mxu2 %v4432_v7  ;;  %663 = vmatpush.msra.mxu0 %v210_v51  ;;  %v165_v51 = vld [vmem:[%s7453_s0 + $0x3f8] sm:$0xff] }
  0x62   :  { %724 = vmatpush.msra.mxu1 %v275_v52  ;;  %700 = vmatpush.msrb.mxu2 %v155_v53  ;;  %v236_v52 = vld [vmem:[%s7453_s0 + $0x630] sm:$0xff]  ;;  %v43_v53 = vld [vmem:[%s7453_s0 + $0x28] sm:$0xff] }
  0x63   :  { %641 = vmatpush.msra.mxu3 %v74_v54  ;;  %664 = vmatpush.msra.mxu0 %v202_v55  ;;  %v92_v54 = vld [vmem:[%s7453_s0 + $0x1b0] sm:$0xff]  ;;  %v157_v55 = vld [vmem:[%s7453_s0 + $0x3b8] sm:$0xff] }
  0x64   :  { %725 = vmatpush.msra.mxu1 %v267_v57  ;;  %701 = vmatpush.msrb.mxu2 %v147_v58  ;;  %v228_v57 = vld [vmem:[%s7453_s0 + $0x5f0] sm:$0xff] }
  0x65   :  { %642 = vmatpush.msra.mxu3 %v66_v59  ;;  %665 = vmatpush.msra.mxu0 %v194_v60  ;;  %v308_v58 = vld [vmem:[%s7453_s0 + $0x870] sm:$0x3f]  ;;  %v149_v60 = vld [vmem:[%s7453_s0 + $0x378] sm:$0xff] }
  0x66   :  { %726 = vmatpush.msra.mxu1 %v259_v61  ;;  %702 = vmatpush.msrb.mxu2 %v139_v62  ;;  %v84_v59 = vld [vmem:[%s7453_s0 + $0x170] sm:$0xff] }
  0x67   :  { %643 = vmatpush.msra.mxu3 %v58_v63  ;;  %666 = vmatpush.msra.mxu0 %v186_v0  ;;  %v220_v61 = vld [vmem:[%s7453_s0 + $0x5b0] sm:$0xff]  ;;  %v141_v0 = vld [vmem:[%s7453_s0 + $0x338] sm:$0xff] }
  0x68   :  { %727 = vmatpush.msra.mxu1 %v251_v1  ;;  %703 = vmatpush.msrb.mxu2 %v131_v3  ;;  %v300_v62 = vld [vmem:[%s7453_s0 + $0x830] sm:$0xff]  ;;  %v293_v1 = vld [vmem:[%s7453_s0 + $0x7f8] sm:$0xff] }
  0x69   :  { %603 = vmatmul.f32.gmra.mxu2 %v4488_v24  ;;  %644 = vmatpush.msra.mxu3 %v50_v4  ;;  %v76_v63 = vld [vmem:[%s7453_s0 + $0x130] sm:$0xff] }
  0x6a   :  { %667 = vmatpush.msra.mxu0 %v178_v5  ;;  %728 = vmatpush.msra.mxu1 %v243_v6  ;;  %v212_v3 = vld [vmem:[%s7453_s0 + $0x570] sm:$0xff]  ;;  %v133_v5 = vld [vmem:[%s7453_s0 + $0x2f8] sm:$0xff] }
  0x6b   :  { %704 = vmatpush.msrb.mxu2 %v123_v8  ;;  %645 = vmatpush.msra.mxu3 %v42_v9  ;;  %v68_v4 = vld [vmem:[%s7453_s0 + $0xf0] sm:$0xff]  ;;  %v285_v6 = vld [vmem:[%s7453_s0 + $0x7b8] sm:$0xff] }
  0x6c   :  { %668 = vmatpush.msra.mxu0 %v170_v10  ;;  %729 = vmatpush.msra.mxu1 %v235_v11  ;;  %v204_v8 = vld [vmem:[%s7453_s0 + $0x530] sm:$0xff]  ;;  %v125_v10 = vld [vmem:[%s7453_s0 + $0x2b8] sm:$0xff] }
  0x6d   :  { %646 = vmatmul.f32.vlgmr.msra.gmra.mxu3 %v4414_v2  ;;  %705 = vmatpush.msrb.mxu2 %v115_v12  ;;  %v60_v9 = vld [vmem:[%s7453_s0 + $0xb0] sm:$0xff]  ;;  %v277_v11 = vld [vmem:[%s7453_s0 + $0x778] sm:$0xff] }
  0x6e   :  { %3184 = vmatpush.msk.msrb.mxu3 %vm329_vm0, %v307_v13  ;;  %768 = vmatpush.msrb.mxu0 %v164_v14  ;;  %v196_v12 = vld [vmem:[%s7453_s0 + $0x4f0] sm:$0xff]  ;;  %v117_v14 = vld [vmem:[%s7453_s0 + $0x278] sm:$0xff] }
  0x6f   :  { %730 = vmatpush.msra.mxu1 %v227_v15  ;;  %706 = vmatpush.msrb.mxu2 %v107_v16  ;;  %v52_v13 = vld [vmem:[%s7453_s0 + $0x70] sm:$0xff]  ;;  %v269_v15 = vld [vmem:[%s7453_s0 + $0x738] sm:$0xff] }
  0x70   :  { %3180 = vmatmul.msk.f32.gmra.mxu1 %vm322_vm1, %v4380_v56  ;;  %760 = vmatpush.msrb.mxu3 %v299_v17  ;;  %v188_v16 = vld [vmem:[%s7453_s0 + $0x4b0] sm:$0xff] }
  0x71   :  { %769 = vmatpush.msrb.mxu0 %v156_v18  ;;  %731 = vmatpush.msra.mxu1 %v219_v20  ;;  %v44_v17 = vld [vmem:[%s7453_s0 + $0x30] sm:$0xff]  ;;  %v109_v18 = vld [vmem:[%s7453_s0 + $0x238] sm:$0xff] }
  0x72   :  { %791 = vmatpush.msra.mxu3 %v292_v22  ;;  %707 = vmatpush.msrb.mxu2 %v99_v23  ;;  %v261_v20 = vld [vmem:[%s7453_s0 + $0x6f8] sm:$0xff]  ;;  %v180_v22 = vld [vmem:[%s7453_s0 + $0x470] sm:$0xff] }
  0x73   :  { %770 = vmatpush.msrb.mxu0 %v148_v25  ;;  %732 = vmatpush.msra.mxu1 %v211_v26  ;;  %v101_v23 = vld [vmem:[%s7453_s0 + $0x1f8] sm:$0xff] }
  0x74   :  { %792 = vmatpush.msra.mxu3 %v284_v27  ;;  %708 = vmatpush.msrb.mxu2 %v91_v28  ;;  %v253_v25 = vld [vmem:[%s7453_s0 + $0x6b8] sm:$0xff]  ;;  %v172_v27 = vld [vmem:[%s7453_s0 + $0x430] sm:$0xff] }
  0x75   :  { %771 = vmatpush.msrb.mxu0 %v140_v29  ;;  %733 = vmatpush.msra.mxu1 %v203_v30  ;;  %v309_v26 = vld [vmem:[%s7453_s0 + $0x878] sm:$0x3f] }
  0x76   :  { %793 = vmatpush.msra.mxu3 %v276_v31  ;;  %669 = vmatmul.f32.vlgmr.msra.gmra.mxu0 %v4432_v7  ;;  %v93_v28 = vld [vmem:[%s7453_s0 + $0x1b8] sm:$0xff] }
  0x77   :  { %649 = vmatmul.f32.gmra.mxu3 %v4473_v19  ;;  %709 = vmatpush.msrb.mxu2 %v83_v32  ;;  %v245_v29 = vld [vmem:[%s7453_s0 + $0x678] sm:$0xff] }
  0x78   :  { %772 = vmatpush.msrb.mxu0 %v132_v33  ;;  %734 = vmatpush.msra.mxu1 %v195_v34  ;;  %v85_v30 = vld [vmem:[%s7453_s0 + $0x178] sm:$0xff] }
  0x79   :  { %794 = vmatpush.msra.mxu3 %v268_v35  ;;  %3182 = vmatmul.msk.f32.vlgmr.msrb.gmra.mxu1 %vm322_vm1, %v4325_v39  ;;  %v237_v31 = vld [vmem:[%s7453_s0 + $0x638] sm:$0xff] }
  0x7a   :  { %710 = vmatpush.msrb.mxu2 %v75_v36  ;;  %773 = vmatpush.msrb.mxu0 %v124_v37  ;;  %v301_v32 = vld [vmem:[%s7453_s0 + $0x838] sm:$0xff] }
  0x7b   :  { %735 = vmatpush.msra.mxu1 %v187_v38  ;;  %795 = vmatpush.msra.mxu3 %v260_v40  ;;  %v77_v33 = vld [vmem:[%s7453_s0 + $0x138] sm:$0xff] }
  0x7c   :  { %711 = vmatpush.msrb.mxu2 %v67_v41  ;;  %774 = vmatpush.msrb.mxu0 %v116_v42  ;;  %v229_v34 = vld [vmem:[%s7453_s0 + $0x5f8] sm:$0xff] }
  0x7d   :  { %736 = vmatpush.msra.mxu1 %v179_v43  ;;  %796 = vmatpush.msra.mxu3 %v252_v44  ;;  %v69_v35 = vld [vmem:[%s7453_s0 + $0xf8] sm:$0xff] }
  0x7e   :  { %712 = vmatpush.msrb.mxu2 %v59_v45  ;;  %775 = vmatpush.msrb.mxu0 %v108_v46  ;;  %v221_v36 = vld [vmem:[%s7453_s0 + $0x5b8] sm:$0xff]  ;;  %v4137_v46 = vld [vmem:[%s7454_s1 + $0x10] sm:$0xff]  ;;  %s4152_s1 = smov 53  }
  0x7f   :  { %737 = vmatpush.msra.mxu1 %v171_v47  ;;  %797 = vmatpush.msra.mxu3 %v244_v48  ;;  %v213_v38 = vld [vmem:[%s7453_s0 + $0x578] sm:$0xff] }
  0x80   :  { %672 = vmatmul.f32.gmra.mxu0 %v4488_v24  ;;  %713 = vmatpush.msrb.mxu2 %v51_v49  ;;  %v53_v40 = vld [vmem:[%s7453_s0 + $0x78] sm:$0xff] }
  0x81   :  { %776 = vmatpush.msrb.mxu0 %v100_v50  ;;  %837 = vmatpush.msrb.mxu1 %v165_v51  ;;  %v205_v41 = vld [vmem:[%s7453_s0 + $0x538] sm:$0xff] }
  0x82   :  { %798 = vmatpush.msra.mxu3 %v236_v52  ;;  %3183 = vmatmul.msk.f32.gmra.mxu1 %vm322_vm1, %v4380_v56  ;;  %v197_v42 = vld [vmem:[%s7453_s0 + $0x4f8] sm:$0xff] }
  0x83   :  { %714 = vmatpush.msrb.mxu2 %v43_v53  ;;  %3185 = vmatmul.msk.f32.vlgmr.msrb.gmra.mxu3 %vm322_vm1, %v4325_v39  ;;  %v189_v43 = vld [vmem:[%s7453_s0 + $0x4b8] sm:$0xff] }
  0x84   :  { %777 = vmatpush.msrb.mxu0 %v92_v54  ;;  %838 = vmatpush.msrb.mxu1 %v157_v55  ;;  %v181_v45 = vld [vmem:[%s7453_s0 + $0x478] sm:$0xff] }
  0x85   :  { %715 = vmatmul.f32.vlgmr.msrb.gmra.mxu2 %v4414_v2  ;;  %799 = vmatpush.msra.mxu3 %v228_v57  ;;  %v173_v47 = vld [vmem:[%s7453_s0 + $0x438] sm:$0xff] }
  0x86   :  { %3187 = vmatpush.msk.msra.mxu2 %vm329_vm0, %v308_v58  ;;  %778 = vmatpush.msrb.mxu0 %v84_v59 }
  0x87   :  { %839 = vmatpush.msrb.mxu1 %v149_v60  ;;  %800 = vmatpush.msra.mxu3 %v220_v61 }
  0x88   :  { %829 = vmatpush.msra.mxu2 %v300_v62  ;;  %779 = vmatpush.msrb.mxu0 %v76_v63 }
  0x89   :  { %840 = vmatpush.msrb.mxu1 %v141_v0  ;;  %801 = vmatpush.msra.mxu3 %v212_v3 }
  0x8a   :  { %860 = vmatpush.msrb.mxu2 %v293_v1  ;;  %780 = vmatpush.msrb.mxu0 %v68_v4 }
  0x8b   :  { %841 = vmatpush.msrb.mxu1 %v133_v5  ;;  %802 = vmatpush.msra.mxu3 %v204_v8 }
  0x8c   :  { %861 = vmatpush.msrb.mxu2 %v285_v6  ;;  %781 = vmatpush.msrb.mxu0 %v60_v9 }
  0x8d   :  { %3186 = vmatmul.msk.f32.gmra.mxu3 %vm322_vm1, %v4380_v56  ;;  %842 = vmatpush.msrb.mxu1 %v125_v10 }
  0x8e   :  { %862 = vmatpush.msrb.mxu2 %v277_v11  ;;  %738 = vmatmul.f32.vlgmr.msra.gmra.mxu1 %v4432_v7 }
  0x8f   :  { %718 = vmatmul.f32.gmra.mxu2 %v4473_v19  ;;  %803 = vmatpush.msra.mxu3 %v196_v12 }
  0x90   :  { %782 = vmatpush.msrb.mxu0 %v52_v13  ;;  %843 = vmatpush.msrb.mxu1 %v117_v14 }
  0x91   :  { %863 = vmatpush.msrb.mxu2 %v269_v15  ;;  %804 = vmatpush.msra.mxu3 %v188_v16 }
  0x92   :  { %783 = vmatpush.msrb.mxu0 %v44_v17  ;;  %844 = vmatpush.msrb.mxu1 %v109_v18 }
  0x93   :  { %864 = vmatpush.msrb.mxu2 %v261_v20  ;;  %784 = vmatmul.f32.vlgmr.msrb.gmra.mxu0 %v4414_v2 }
  0x94   :  { %805 = vmatpush.msra.mxu3 %v180_v22  ;;  %845 = vmatpush.msrb.mxu1 %v101_v23 }
  0x95   :  { %865 = vmatpush.msrb.mxu2 %v253_v25  ;;  %3190 = vmatpush.msk.msra.mxu0 %vm329_vm0, %v309_v26  ;;  %vm2142_vm0 = vcmask 1022976  }
  0x96   :  { %806 = vmatpush.msra.mxu3 %v172_v27  ;;  %846 = vmatpush.msrb.mxu1 %v93_v28 }
  0x97   :  { %807 = vmatmul.f32.vlgmr.msra.gmra.mxu3 %v4432_v7  ;;  %866 = vmatpush.msrb.mxu2 %v245_v29  ;;  %v417_v37 = vpop.f32.mrf.mxu2 }
  0x98   :  { %741 = vmatmul.f32.gmra.mxu1 %v4488_v24  ;;  %3188 = vmatmul.msk.f32.vlgmr.msra.gmra.mxu2 %vm322_vm1, %v4325_v39  ;;  %v61_v39 = vld [vmem:[%s7453_s0 + $0xb8] sm:$0xff] }
  0x99   :  { %847 = vmatpush.msrb.mxu1 %v85_v30  ;;  %867 = vmatpush.msrb.mxu2 %v237_v31 }
  0x9a   :  { %898 = vmatpush.msra.mxu0 %v301_v32  ;;  %4070 = vset.pattern.permute.xlu2 %v4138_v21  ;;  %v45_v21 = vld [vmem:[%s7453_s0 + $0x38] sm:$0xff]  ;;  %s4151_s0 = smov 52  }
  0x9b   :  { %848 = vmatpush.msrb.mxu1 %v77_v33  ;;  %868 = vmatpush.msrb.mxu2 %v229_v34 }
  0x9c   :  { %787 = vmatmul.f32.gmra.mxu0 %v4473_v19 }
  0x9d   :  { %849 = vmatpush.msrb.mxu1 %v69_v35  ;;  %869 = vmatpush.msrb.mxu2 %v221_v36 }
  0x9f   :  { %810 = vmatmul.f32.gmra.mxu3 %v4488_v24  ;;  %850 = vmatpush.msrb.mxu1 %v61_v39 }
  0xa0   :  { %870 = vmatpush.msrb.mxu2 %v213_v38  ;;  %v5132_v48 = vpop.permute.xlu0 %314 }
  0xa1   :  { %3189 = vmatmul.msk.f32.gmra.mxu2 %vm322_vm1, %v4380_v56  ;;  %851 = vmatpush.msrb.mxu1 %v53_v40  ;;  %v420_v44 = vpop.f32.mrf.mxu2  ;;  %v371_v49 = vpop.f32.mrf.mxu0 }
  0xa2   :  { %871 = vmatpush.msrb.mxu2 %v205_v41  ;;  %v372_v50 = vadd.f32 %v371_v49, %v5132_v48 }
  0xa3   :  { %852 = vmatpush.msrb.mxu1 %v45_v21 }
  0xa4   :  { %872 = vmatpush.msrb.mxu2 %v197_v42  ;;  %853 = vmatmul.f32.vlgmr.msrb.gmra.mxu1 %v4414_v2  ;;  %v394_v51 = vpop.f32.mrf.mxu1 }
  0xa5   :  { %3191 = vmatmul.msk.f32.vlgmr.msra.gmra.mxu0 %vm322_vm1, %v4137_v46  ;;  %v395_v54 = vadd.f32 %v394_v51, %v372_v50 }
  0xa6   :  { %873 = vmatpush.msrb.mxu2 %v189_v43 }
  0xa8   :  { %874 = vmatpush.msrb.mxu2 %v181_v45 }
  0xaa   :  { %875 = vmatpush.msrb.mxu2 %v173_v47  ;;  %v440_v53 = vpop.f32.mrf.mxu3 }
  0xab   :  { %876 = vmatmul.f32.vlgmr.msrb.gmra.mxu2 %v4432_v7  ;;  %v441_v55 = vadd.f32 %v440_v53, %v5132_v48  ;;  %v418_v7 = vadd.f32 %v417_v37, %v395_v54 }
  0xac   :  { %856 = vmatmul.f32.gmra.mxu1 %v4473_v19  ;;  %v5140_v19 = vld [vmem:[%s7456_s3] sm:$0xff]  ;;  %s4139_s3 = smov 102  }
  0xad   :  { %3192 = vmatmul.msk.f32.gmra.mxu0 %vm322_vm1, %v4380_v56  ;;  %v463_v2 = vpop.f32.mrf.mxu2  ;;  %v906_v58 = vmax.f32 %v418_v7, 0.0  ;;  %v924_v59 = vperm.slane %v5140_v19, 0  ;;  %v925_v61 = vperm.slane %v5140_v19, 1  ;;  %v5144_v62 = vpop.permute.xlu0 %319  ;;  %v927_v36 = vperm.slane %v5140_v19, 3 }
  0xae   :  { %v464_v56 = vadd.f32 %v463_v2, %v441_v55  ;;  %v397_v6 = vpop.f32.mrf.mxu1  ;;  %v926_v39 = vperm.slane %v5140_v19, 2  ;;  %vm2560_vm1 = vcmask 613376  }
  0xaf   :  { %v5146_v1 = vmul.f32 %v924_v59, %v906_v58 }
  0xb3   :  { %879 = vmatmul.f32.gmra.mxu2 %v4488_v24  ;;  %v374_v24 = vpop.f32.mrf.mxu0  ;;  %v443_v63 = vpop.f32.mrf.mxu3 }
  0xb4   :  { %v375_v3 = vadd.f32 %v374_v24, %v5144_v62  ;;  %v444_v4 = vadd.f32 %v443_v63, %v5144_v62 }
  0xb6   :  { %v466_v52 = vpop.f32.mrf.mxu2  ;;  %v398_v9 = vadd.f32 %v397_v6, %v375_v3 }
  0xb7   :  { %v467_v10 = vadd.f32 %v466_v52, %v444_v4 }
  0xb8   :  { %v421_v13 = vadd.f32 %v420_v44, %v398_v9 }
  0xba   :  { %v914_v15 = vmax.f32 %v421_v13, 0.0 }
  0xbc   :  { %v5162_v20 = vmul.f32 %v924_v59, %v914_v15 }
  0xbf   :  { %v486_v57 = vpop.f32.mrf.mxu2 }
  0xc0   :  { %v487_v60 = vadd.f32 %v486_v57, %v464_v56 }
  0xc2   :  { %v907_v0 = vmax.f32 %v487_v60, 0.0 }
  0xc4   :  { %v5150_v5 = vmul.f32 %v925_v61, %v907_v0 }
  0xc6   :  { %v3239_v8 = vpack.i.bf16 %v5150_v5, %v5146_v1  ;;  %v509_v16 = vpop.f32.mrf.mxu1 }
  0xc7   :  { %v489_v11 = vpop.f32.mrf.mxu2  ;;  %v578_v26 = vpop.f32.mrf.mxu0  ;;  %v510_v28 = vadd.f32 %v509_v16, %v5132_v48 }
  0xc8   :  { %3240 = vrot.lane.b32.xlu2 %v3239_v8, %s4139_s3  ;;  %3235 = vrot.lane.b32.xlu0 %v3239_v8, %s4140_s30  ;;  %v490_v12 = vadd.f32 %v489_v11, %v467_v10  ;;  %v579_v30 = vadd.f32 %v578_v26, %v5132_v48  ;;  %v929_v10 = vperm.slane %v5140_v19, 5 }
  0xc9   :  { %3225 = vrot.lane.b32.xlu1 %v3239_v8, %s4141_s10 }
  0xca   :  { %v915_v14 = vmax.f32 %v490_v12, 0.0  ;;  %v928_v12 = vperm.slane %v5140_v19, 4 }
  0xcc   :  { %v5160_v18 = vmul.f32 %v925_v61, %v915_v14  ;;  %v532_v27 = vpop.f32.mrf.mxu3 }
  0xcd   :  { %v533_v29 = vadd.f32 %v532_v27, %v510_v28 }
  0xce   :  { %v3269_v22 = vpack.i.bf16 %v5160_v18, %v5162_v20 }
  0xcf   :  { %v512_v25 = vpop.f32.mrf.mxu1 }
  0xd0   :  { %3255 = vrot.lane.b32.xlu2 %v3239_v8, %s4142_s11  ;;  %3250 = vrot.lane.b32.xlu0 %v3239_v8, %s4143_s12  ;;  %v581_v38 = vpop.f32.mrf.mxu0  ;;  %v513_v2 = vadd.f32 %v512_v25, %v5144_v62 }
  0xd1   :  { %v555_v17 = vpop.f32.mrf.mxu2  ;;  %3230 = vrot.lane.b32.xlu1 %v3239_v8, %s4144_s13  ;;  %v582_v21 = vadd.f32 %v581_v38, %v5144_v62 }
  0xd2   :  { %v556_v32 = vadd.f32 %v555_v17, %v533_v29 }
  0xd4   :  { %v908_v37 = vmax.f32 %v556_v32, 0.0 }
  0xd6   :  { %v5182_v42 = vmul.f32 %v926_v39, %v908_v37  ;;  %v535_v47 = vpop.f32.mrf.mxu3 }
  0xd7   :  { %v536_v49 = vadd.f32 %v535_v47, %v513_v2 }
  0xd8   :  { %3270 = vrot.lane.b32.xlu2 %v3269_v22, %s4144_s13  ;;  %3265 = vrot.lane.b32.xlu0 %v3269_v22, %s4141_s10  ;;  %v624_v31 = vpop.f32.mrf.mxu1 }
  0xd9   :  { %3245 = vrot.lane.b32.xlu1 %v3239_v8, %s4145_s14 }
  0xda   :  { %v558_v23 = vpop.f32.mrf.mxu2 }
  0xdb   :  { %v559_v51 = vadd.f32 %v558_v23, %v536_v49 }
  0xdd   :  { %v916_v54 = vmax.f32 %v559_v51, 0.0 }
  0xdf   :  { %v5195_v56 = vmul.f32 %v926_v39, %v916_v54 }
  0xe0   :  { %3285 = vrot.lane.b32.xlu2 %v3269_v22, %s4145_s14  ;;  %3280 = vrot.lane.b32.xlu0 %v3269_v22, %s4139_s3 }
  0xe1   :  { %3260 = vrot.lane.b32.xlu1 %v3239_v8, %s4146_s15 }
  0xe4   :  { %v601_v33 = vpop.f32.mrf.mxu2 }
  0xe5   :  { %v602_v34 = vadd.f32 %v601_v33, %v579_v30 }
  0xe7   :  { %v625_v35 = vadd.f32 %v624_v31, %v602_v34 }
  0xe8   :  { %3300 = vrot.lane.b32.xlu2 %v3269_v22, %s4146_s15  ;;  %3295 = vrot.lane.b32.xlu0 %v3269_v22, %s4142_s11 }
  0xe9   :  { %v909_v40 = vmax.f32 %v625_v35, 0.0  ;;  %3275 = vrot.lane.b32.xlu1 %v3269_v22, %s4140_s30 }
  0xeb   :  { %v5179_v41 = vmul.f32 %v927_v36, %v909_v40 }
  0xec   :  { %v604_v43 = vpop.f32.mrf.mxu2 }
  0xed   :  { %v627_v44 = vpop.f32.mrf.mxu1  ;;  %v605_v45 = vadd.f32 %v604_v43, %v582_v21  ;;  %v3309_v46 = vpack.i.bf16 %v5179_v41, %v5182_v42 }
  0xef   :  { %v628_v50 = vadd.f32 %v627_v44, %v605_v45 }
  0xf0   :  { %3310 = vrot.lane.b32.xlu2 %v3309_v46, %s4144_s13  ;;  %3320 = vrot.lane.b32.xlu0 %v3309_v46, %s4139_s3  ;;  %v647_v7 = vpop.f32.mrf.mxu3 }
  0xf1   :  { %3290 = vrot.lane.b32.xlu1 %v3269_v22, %s4143_s12  ;;  %v917_v52 = vmax.f32 %v628_v50, 0.0  ;;  %v648_v59 = vadd.f32 %v647_v7, %v5132_v48 }
  0xf3   :  { %v5193_v55 = vmul.f32 %v927_v36, %v917_v52  ;;  %v670_v24 = vpop.f32.mrf.mxu0 }
  0xf4   :  { %v671_v61 = vadd.f32 %v670_v24, %v648_v59 }
  0xf5   :  { %v3349_v57 = vpack.i.bf16 %v5193_v55, %v5195_v56 }
  0xf6   :  { %v693_v53 = vpop.f32.mrf.mxu1 }
  0xf7   :  { %v694_v4 = vadd.f32 %v693_v53, %v671_v61 }
  0xf8   :  { %3325 = vrot.lane.b32.xlu2 %v3309_v46, %s4145_s14  ;;  %3335 = vrot.lane.b32.xlu0 %v3309_v46, %s4142_s11 }
  0xf9   :  { %3305 = vrot.lane.b32.xlu1 %v3309_v46, %s4141_s10  ;;  %v910_v11 = vmax.f32 %v694_v4, 0.0 }
  0xfa   :  { %v650_v60 = vpop.f32.mrf.mxu3 }
  0xfb   :  { %v5214_v16 = vmul.f32 %v928_v12, %v910_v11  ;;  %v651_v27 = vadd.f32 %v650_v60, %v5144_v62 }
  0xfd   :  { %v673_v17 = vpop.f32.mrf.mxu0 }
  0xfe   :  { %v674_v30 = vadd.f32 %v673_v17, %v651_v27 }
  0xff   :  { %v696_v58 = vpop.f32.mrf.mxu1 }
 0x100   :  { %3340 = vrot.lane.b32.xlu2 %v3309_v46, %s4146_s15  ;;  %3350 = vrot.lane.b32.xlu0 %v3349_v57, %s4144_s13  ;;  %v697_v34 = vadd.f32 %v696_v58, %v674_v30  ;;  %v930_v58 = vperm.slane %v5140_v19, 6 }
 0x101   :  { %3315 = vrot.lane.b32.xlu1 %v3309_v46, %s4140_s30 }
 0x102   :  { %v918_v39 = vmax.f32 %v697_v34, 0.0 }
 0x104   :  { %v5235_v43 = vmul.f32 %v928_v12, %v918_v39 }
 0x106   :  { %v762_v8 = vpop.f32.mrf.mxu3 }
 0x108   :  { %v716_v63 = vpop.f32.mrf.mxu2  ;;  %3355 = vrot.lane.b32.xlu2 %v3349_v57, %s4140_s30  ;;  %3365 = vrot.lane.b32.xlu0 %v3349_v57, %s4145_s14 }
 0x109   :  { %v717_v0 = vadd.f32 %v716_v63, %v5132_v48  ;;  %3330 = vrot.lane.b32.xlu1 %v3309_v46, %s4143_s12 }
 0x10b   :  { %v739_v3 = vpop.f32.mrf.mxu1 }
 0x10c   :  { %v740_v6 = vadd.f32 %v739_v3, %v717_v0 }
 0x10e   :  { %v763_v9 = vadd.f32 %v762_v8, %v740_v6 }
 0x110   :  { %v911_v13 = vmax.f32 %v763_v9, 0.0  ;;  %3370 = vrot.lane.b32.xlu2 %v3349_v57, %s4143_s12  ;;  %3380 = vrot.lane.b32.xlu0 %v3349_v57, %s4146_s15  ;;  %v785_v28 = vpop.f32.mrf.mxu0  ;;  %v765_v31 = vpop.f32.mrf.mxu3 }
 0x111   :  { %3345 = vrot.lane.b32.xlu1 %v3349_v57, %s4141_s10  ;;  %v786_v46 = vadd.f32 %v785_v28, %v5132_v48 }
 0x112   :  { %v5212_v14 = vmul.f32 %v929_v10, %v911_v13  ;;  %v719_v15 = vpop.f32.mrf.mxu2 }
 0x113   :  { %v720_v23 = vadd.f32 %v719_v15, %v5144_v62 }
 0x114   :  { %7631 = vst [vmem:[#allocation2_spill] sm:$0xff] %v5212_v14  ;;  %v3384_v22 = vpack.i.bf16 %v5212_v14, %v5214_v16 }
 0x115   :  { %v742_v25 = vpop.f32.mrf.mxu1 }
 0x116   :  { %v743_v29 = vadd.f32 %v742_v25, %v720_v23 }
 0x118   :  { %3385 = vrot.lane.b32.xlu2 %v3384_v22, %s4141_s10  ;;  %3390 = vrot.lane.b32.xlu0 %v3384_v22, %s4144_s13  ;;  %v766_v32 = vadd.f32 %v765_v31, %v743_v29 }
 0x119   :  { %3360 = vrot.lane.b32.xlu1 %v3349_v57, %s4139_s3  ;;  %v788_v37 = vpop.f32.mrf.mxu0 }
 0x11a   :  { %v919_v36 = vmax.f32 %v766_v32, 0.0  ;;  %v808_v44 = vpop.f32.mrf.mxu3  ;;  %v789_v6 = vadd.f32 %v788_v37, %v5144_v62 }
 0x11b   :  { %v831_v26 = vpop.f32.mrf.mxu2  ;;  %v809_v51 = vadd.f32 %v808_v44, %v786_v46 }
 0x11c   :  { %v5231_v38 = vmul.f32 %v929_v10, %v919_v36 }
 0x11d   :  { %v832_v54 = vadd.f32 %v831_v26, %v809_v51 }
 0x11e   :  { %v3424_v2 = vpack.i.bf16 %v5231_v38, %v5235_v43 }
 0x120   :  { %3395 = vrot.lane.b32.xlu2 %v3384_v22, %s4140_s30  ;;  %3405 = vrot.lane.b32.xlu0 %v3384_v22, %s4145_s14 }
 0x121   :  { %3375 = vrot.lane.b32.xlu1 %v3349_v57, %s4142_s11  ;;  %v854_v40 = vpop.f32.mrf.mxu1  ;;  %v912_v57 = vmax.f32 %v832_v54, 0.0 }
 0x122   :  { %v5226_v33 = vpop.permute.xlu2 %3240  ;;  %v855_v45 = vadd.f32 %v854_v40, %v5132_v48  ;;  %v900_v50 = vpop.f32.mrf.mxu0  ;;  %v931_v48 = vperm.slane %v5140_v19, 7 }
 0x123   :  { %v5257_v3 = vmul.f32 %v930_v58, %v912_v57  ;;  %v811_v19 = vpop.f32.mrf.mxu3 }
 0x124   :  { %v834_v35 = vpop.f32.mrf.mxu2  ;;  %v812_v11 = vadd.f32 %v811_v19, %v789_v6 }
 0x125   :  { %7632 = vst [vmem:[#allocation3_spill] sm:$0xff] %v5257_v3 }
 0x128   :  { %3410 = vrot.lane.b32.xlu2 %v3384_v22, %s4143_s12  ;;  %3420 = vrot.lane.b32.xlu0 %v3384_v22, %s4146_s15 }
 0x129   :  { %3400 = vrot.lane.b32.xlu1 %v3384_v22, %s4139_s3  ;;  %v857_v59 = vpop.f32.mrf.mxu1 }
 0x12a   :  { %v5233_v21 = vpop.permute.xlu2 %3255  ;;  %v858_v4 = vadd.f32 %v857_v59, %v5144_v62  ;;  %v903_v10 = vpop.f32.mrf.mxu0  ;;  %v835_v62 = vadd.f32 %v834_v35, %v812_v11 }
 0x12b   :  { %v3257_v51 = vunpack.i.l.bf16 %v5233_v21 }
 0x12c   :  { %v920_v27 = vmax.f32 %v835_v62, 0.0 }
 0x12e   :  { %v877_v47 = vpop.f32.mrf.mxu2  ;;  %v5285_v32 = vmul.f32 %v930_v58, %v920_v27 }
 0x12f   :  { %v878_v49 = vadd.f32 %v877_v47, %v855_v45 }
 0x130   :  { %3425 = vrot.lane.b32.xlu2 %v3424_v2, %s4141_s10  ;;  %3435 = vrot.lane.b32.xlu0 %v3424_v2, %s4140_s30  ;;  %7633 = vst [vmem:[#allocation4_spill] sm:$0xff] %v5285_v32 }
 0x131   :  { %3415 = vrot.lane.b32.xlu1 %v3384_v22, %s4142_s11  ;;  %v901_v52 = vadd.f32 %v900_v50, %v878_v49  ;;  %v3258_v50 = vunpack.i.h.bf16 %v5233_v21 }
 0x132   :  { %v5244_v53 = vpop.permute.xlu2 %3270 }
 0x133   :  { %v913_v7 = vmax.f32 %v901_v52, 0.0  ;;  %v1371_v54 = vsel %vm1370_vm3, %v3257_v51, %v3258_v50 }
 0x135   :  { %v947_v24 = vmul.f32 %v931_v48, %v913_v7 }
 0x136   :  { %v880_v60 = vpop.f32.mrf.mxu2 }
 0x137   :  { %v881_v8 = vadd.f32 %v880_v60, %v858_v4  ;;  %v3474_v9 = vpack.i.bf16 %v947_v24, %v5257_v3  ;;  %v1464_v4 = vld [vmem:[%s7457_s5] sm:$0xff] }
 0x138   :  { %3440 = vrot.lane.b32.xlu2 %v3424_v2, %s4139_s3  ;;  %3450 = vrot.lane.b32.xlu0 %v3424_v2, %s4143_s12 }
 0x139   :  { %3430 = vrot.lane.b32.xlu1 %v3424_v2, %s4144_s13  ;;  %v904_v12 = vadd.f32 %v903_v10, %v881_v8 }
 0x13a   :  { %v5251_v61 = vpop.permute.xlu0 %3235  ;;  %v5253_v63 = vpop.permute.xlu2 %3285 }
 0x13b   :  { %v5255_v0 = vpop.permute.xlu1 %3225  ;;  %v921_v25 = vmax.f32 %v904_v12, 0.0  ;;  %v7474_v19 = vunpack.i.h.bf16 %v5253_v63  ;;  %v3287_v6 = vunpack.i.l.bf16 %v5253_v63 }
 0x13d   :  { %v955_v28 = vmul.f32 %v931_v48, %v921_v25  ;;  %v1256_v25 = vsel %vm1248_vm5, %v3287_v6, %v7474_v19  ;;  %v5395_v6 = vld [vmem:[%s7458_s4 + $0x18] sm:$0xff] }
 0x13f   :  { %v5288_v34 = vpack.i.bf16 %v955_v28, %v5285_v32 }
 0x140   :  { %3455 = vrot.lane.b32.xlu2 %v3424_v2, %s4142_s11  ;;  %3475 = vrot.lane.b32.xlu0 %v3474_v9, %s4140_s30 }
 0x141   :  { %3445 = vrot.lane.b32.xlu1 %v3424_v2, %s4145_s14 }
 0x142   :  { %v5265_v13 = vpop.permute.xlu0 %3250  ;;  %v5267_v15 = vpop.permute.xlu2 %3300 }
 0x143   :  { %v5269_v17 = vpop.permute.xlu1 %3230  ;;  %v3303_v22 = vunpack.i.h.bf16 %v5267_v15  ;;  %v3302_v23 = vunpack.i.l.bf16 %v5267_v15  ;;  %v7475_v58 = vunpack.i.h.bf16 %v5265_v13  ;;  %v3252_v59 = vunpack.i.l.bf16 %v5265_v13  ;;  %v5475_v15 = vld [vmem:[%s7458_s4 + $0x10] sm:$0xff] }
 0x145   :  { %v1439_v26 = vsel %vm1431_vm2, %v3302_v23, %v3303_v22  ;;  %v1310_v11 = vsel %vm1309_vm4, %v3252_v59, %v7475_v58  ;;  %v7466_v59 = vunpack.i.h.bf16 %v5251_v61 }
 0x146   :  { %1520 = vmatpush.msrb.mxu0 %v1439_v26  ;;  %v5367_v26 = vld [vmem:[%s7458_s4 + $0x8] sm:$0xff] }
 0x148   :  { %3465 = vrot.lane.b32.xlu2 %v3474_v9, %s4141_s10  ;;  %3490 = vrot.lane.b32.xlu0 %v3474_v9, %s4143_s12 }
 0x149   :  { %3460 = vrot.lane.b32.xlu1 %v3424_v2, %s4146_s15 }
 0x14a   :  { %v5279_v29 = vpop.permute.xlu0 %3265  ;;  %v5281_v30 = vpop.permute.xlu2 %3310 }
 0x14b   :  { %v5283_v31 = vpop.permute.xlu1 %3245 }
 0x14c   :  { %v3247_v10 = vunpack.i.l.bf16 %v5283_v31 }
 0x150   :  { %3480 = vrot.lane.b32.xlu2 %v3474_v9, %s4139_s3  ;;  %3505 = vrot.lane.b32.xlu0 %v5288_v34, %s4141_s10 }
 0x151   :  { %3470 = vrot.lane.b32.xlu1 %v3474_v9, %s4144_s13 }
 0x152   :  { %v5294_v35 = vpop.permute.xlu0 %3280  ;;  %v5296_v36 = vpop.permute.xlu2 %3325 }
 0x153   :  { %v5298_v37 = vpop.permute.xlu1 %3260  ;;  %v7465_v12 = vunpack.i.h.bf16 %v5294_v35  ;;  %v3282_v62 = vunpack.i.l.bf16 %v5294_v35 }
 0x154   :  { %v3263_v39 = vunpack.i.h.bf16 %v5298_v37  ;;  %v3262_v40 = vunpack.i.l.bf16 %v5298_v37 }
 0x156   :  { %v1432_v44 = vsel %vm1431_vm2, %v3262_v40, %v3263_v39  ;;  %v7464_v40 = vunpack.i.h.bf16 %v5226_v33 }
 0x157   :  { %1521 = vmatpush.msrb.mxu0 %v1432_v44  ;;  %v3242_v44 = vunpack.i.l.bf16 %v5226_v33 }
 0x158   :  { %3495 = vrot.lane.b32.xlu2 %v3474_v9, %s4142_s11  ;;  %3520 = vrot.lane.b32.xlu0 %v5288_v34, %s4139_s3 }
 0x159   :  { %3485 = vrot.lane.b32.xlu1 %v3474_v9, %s4145_s14  ;;  %3193 = vmatmul.msk.f32.vlgmr.msrb.gmra.mxu0 %vm1476_vm6, %v5367_v26 }
 0x15a   :  { %v5309_v45 = vpop.permute.xlu0 %3295  ;;  %v5311_v46 = vpop.permute.xlu2 %3340 }
 0x15b   :  { %v3298_v47 = vunpack.i.h.bf16 %v5309_v45  ;;  %v3297_v2 = vunpack.i.l.bf16 %v5309_v45  ;;  %v5315_v49 = vpop.permute.xlu1 %3275 }
 0x15c   :  { %v7463_v51 = vunpack.i.h.bf16 %v5315_v49 }
 0x15d   :  { %v1378_v52 = vsel %vm1370_vm3, %v3297_v2, %v3298_v47 }
 0x15e   :  { %1483 = vmatpush.msrb.mxu3 %v1378_v52  ;;  %v3277_v52 = vunpack.i.l.bf16 %v5315_v49 }
 0x160   :  { %3510 = vrot.lane.b32.xlu2 %v5288_v34, %s4144_s13  ;;  %3535 = vrot.lane.b32.xlu0 %v5288_v34, %s4142_s11 }
 0x161   :  { %1484 = vmatpush.msrb.mxu3 %v1371_v54  ;;  %3500 = vrot.lane.b32.xlu1 %v3474_v9, %s4146_s15  ;;  %v7473_v9 = vunpack.i.h.bf16 %v5283_v31  ;;  %v1195_v54 = vsel %vm1187_vm7, %v3282_v62, %v7465_v12  ;;  %v1134_v62 = vsel %vm1126_vm8, %v3277_v52, %v7463_v51  ;;  %v7468_v52 = vunpack.i.h.bf16 %v5279_v29 }
 0x162   :  { %v5330_v7 = vpop.permute.xlu0 %3320  ;;  %v5332_v48 = vpop.permute.xlu2 %3355  ;;  %3194 = vmatmul.msk.f32.gmra.mxu0 %vm1476_vm6, %v5395_v6  ;;  %v7467_v51 = vunpack.i.h.bf16 %v5255_v0 }
 0x163   :  { %v5334_v57 = vpop.permute.xlu1 %3290  ;;  %v1249_v2 = vsel %vm1248_vm5, %v3247_v10, %v7473_v9  ;;  %v3272_v10 = vunpack.i.l.bf16 %v5244_v53 }
 0x164   :  { %v7476_v24 = vunpack.i.h.bf16 %v5334_v57  ;;  %v3292_v60 = vunpack.i.l.bf16 %v5334_v57 }
 0x166   :  { %v1317_v8 = vsel %vm1309_vm4, %v3292_v60, %v7476_v24  ;;  %v3237_v60 = vunpack.i.l.bf16 %v5251_v61 }
 0x167   :  { %1485 = vmatpush.msrb.mxu3 %v1317_v8  ;;  %v7470_v8 = vunpack.i.h.bf16 %v5244_v53 }
 0x168   :  { %3525 = vrot.lane.b32.xlu2 %v5288_v34, %s4145_s14  ;;  %1468 = vperm.xlu0 %3223, %v1464_v4   ;;  %v1188_v4 = vsel %vm1187_vm7, %v3242_v44, %v7464_v40  ;;  %v3227_v40 = vunpack.i.l.bf16 %v5255_v0 }
 0x169   :  { %3515 = vrot.lane.b32.xlu1 %v5288_v34, %s4140_s30  ;;  %1486 = vmatpush.msrb.mxu3 %v1310_v11 }
 0x16a   :  { %v5359_v23 = vpop.permute.xlu0 %3335  ;;  %v5369_v27 = vpop.permute.xlu2 %3370 }
 0x16b   :  { %v5371_v28 = vpop.permute.xlu1 %3305  ;;  %1487 = vmatpush.msrb.mxu3 %v1256_v25  ;;  %v3372_v9 = vunpack.i.l.bf16 %v5369_v27  ;;  %v7636_v21 = vunpack.i.h.bf16 %v5369_v27 }
 0x16d   :  { %1488 = vmatpush.msrb.mxu3 %v1249_v2  ;;  %v3232_v2 = vunpack.i.l.bf16 %v5269_v17 }
 0x16f   :  { %1489 = vmatpush.msrb.mxu3 %v1195_v54  ;;  %v1127_v54 = vsel %vm1126_vm8, %v3237_v60, %v7466_v59 }
 0x170   :  { %3541 = vrot.lane.b32.xlu2 %v5288_v34, %s4146_s15 }
 0x171   :  { %3530 = vrot.lane.b32.xlu1 %v5288_v34, %s4143_s12  ;;  %1490 = vmatpush.msrb.mxu3 %v1188_v4  ;;  %v7469_v34 = vunpack.i.h.bf16 %v5269_v17  ;;  %v3267_v4 = vunpack.i.l.bf16 %v5279_v29 }
 0x172   :  { %v5401_v11 = vpop.permute.xlu0 %3350  ;;  %v5406_v25 = vpop.permute.xlu2 %3385 }
 0x173   :  { %v5408_v44 = vpop.permute.xlu1 %3315  ;;  %1491 = vmatpush.msrb.mxu3 %v1134_v62  ;;  %v1073_v62 = vsel %vm1065_vm9, %v3272_v10, %v7470_v8  ;;  %v1066_v12 = vsel %vm1065_vm9, %v3232_v2, %v7469_v34  ;;  %v5446_v2 = vld [vmem:[%s7458_s4] sm:$0xff] }
 0x175   :  { %1492 = vmatpush.msrb.mxu3 %v1127_v54  ;;  %v1012_v54 = vsel %vm1004_vm10, %v3267_v4, %v7468_v52 }
 0x177   :  { %1493 = vmatpush.msrb.mxu3 %v1073_v62  ;;  %v1005_v62 = vsel %vm1004_vm10, %v3227_v40, %v7467_v51  ;;  %v7471_v40 = vunpack.i.h.bf16 %v5311_v46 }
 0x179   :  { %1494 = vmatpush.msrb.mxu3 %v1066_v12  ;;  %v1465_v12 = vld [vmem:[%s7457_s5 + $0x8] sm:$0xff] }
 0x17a   :  { %v5427_v60 = vpop.permute.xlu0 %3365  ;;  %v5432_v59 = vpop.permute.xlu2 %3395  ;;  %1473 = vperm.xlu1 %3539, %v1465_v12  }
 0x17b   :  { %v5434_v10 = vpop.permute.xlu1 %3330  ;;  %1495 = vmatpush.msrb.mxu3 %v1012_v54  ;;  %v3342_v54 = vunpack.i.l.bf16 %v5311_v46 }
 0x17c   :  { %v7481_v24 = vunpack.i.h.bf16 %v5434_v10 }
 0x17d   :  { %1496 = vmatpush.msrb.mxu3 %v1005_v62  ;;  %v1433_v34 = vsel %vm1431_vm2, %v3263_v39, %v3342_v54  ;;  %v1434_v8 = vsel %vm1431_vm2, %v3342_v54, %v7471_v40  ;;  %v3332_v54 = vunpack.i.l.bf16 %v5434_v10 }
 0x17f   :  { %1497 = vmatpush.msrb.mxu3 %v5162_v20 }
 0x181   :  { %1498 = vmatpush.msrb.mxu3 %v5146_v1 }
 0x182   :  { %1499 = vmatmul.f32.vlgmr.msrb.gmra.mxu3 %v5446_v2  ;;  %v5450_v4 = vpop.permute.xlu0 %3380  ;;  %v5454_v51 = vpop.permute.xlu2 %3410 }
 0x183   :  { %v7472_v62 = vunpack.i.h.bf16 %v5450_v4  ;;  %v3382_v20 = vunpack.i.l.bf16 %v5450_v4  ;;  %v5458_v12 = vpop.permute.xlu1 %3345 }
 0x185   :  { %v1440_v1 = vsel %vm1431_vm2, %v3303_v22, %v3382_v20  ;;  %v1441_v52 = vsel %vm1431_vm2, %v3382_v20, %v7472_v62  ;;  %v3337_v20 = vunpack.i.l.bf16 %v5359_v23  ;;  %v7634_v62 = vunpack.i.h.bf16 %v5359_v23 }
 0x186   :  { %1566 = vmatpush.msra.mxu2 %v1440_v1  ;;  %1612 = vmatpush.msra.mxu3 %v1441_v52 }
 0x187   :  { %v1373_v3 = vsel %vm1370_vm3, %v3337_v20, %v7634_v62  ;;  %v7638_v62 = vunpack.i.h.bf16 %v5253_v63  ;;  %v3322_v63 = vunpack.i.l.bf16 %v5330_v7 }
 0x188   :  { %1567 = vmatpush.msra.mxu2 %v1433_v34  ;;  %1613 = vmatpush.msra.mxu3 %v1434_v8 }
 0x189   :  { %3195 = vmatmul.msk.f32.vlgmr.msra.gmra.mxu2 %vm1476_vm6, %v5367_v26 }
 0x18a   :  { %1502 = vmatmul.f32.gmra.mxu3 %v5475_v15  ;;  %v5480_v22 = vpop.permute.xlu0 %3390  ;;  %v5482_v37 = vpop.permute.xlu2 %3425 }
 0x18b   :  { %v5484_v39 = vpop.permute.xlu1 %3360 }
 0x191   :  { %3196 = vmatmul.msk.f32.gmra.mxu2 %vm1476_vm6, %v5395_v6 }
 0x192   :  { %v5488_v52 = vpop.permute.xlu0 %3405  ;;  %3197 = vmatmul.msk.f32.vlgmr.msra.gmra.mxu3 %vm1476_vm6, %v5367_v26  ;;  %v5492_v8 = vpop.permute.xlu2 %3440 }
 0x193   :  { %v3376_v34 = vpop.permute.xlu1 %3375 }
 0x194   :  { %v3378_v1 = vunpack.i.h.bf16 %v3376_v34  ;;  %v3377_v40 = vunpack.i.l.bf16 %v3376_v34  ;;  %v1372_v34 = vsel %vm1370_vm3, %v3258_v50, %v3337_v20  ;;  %v1319_v50 = vsel %vm1309_vm4, %v3372_v9, %v7636_v21 }
 0x195   :  { %v3327_v20 = vunpack.i.l.bf16 %v5296_v36  ;;  %v1312_v21 = vsel %vm1309_vm4, %v3332_v54, %v7481_v24 }
 0x196   :  { %v1379_v19 = vsel %vm1370_vm3, %v3298_v47, %v3377_v40  ;;  %v1380_v58 = vsel %vm1370_vm3, %v3377_v40, %v3378_v1  ;;  %v3367_v47 = vunpack.i.l.bf16 %v5427_v60 }
 0x197   :  { %1529 = vmatpush.msra.mxu1 %v1379_v19  ;;  %1575 = vmatpush.msra.mxu0 %v1380_v58  ;;  %v7635_v58 = vunpack.i.h.bf16 %v5334_v57  ;;  %v7480_v57 = vunpack.i.h.bf16 %v5484_v39 }
 0x198   :  { %v1257_v14 = vsel %vm1248_vm5, %v7638_v62, %v3367_v47 }
 0x199   :  { %1530 = vmatpush.msra.mxu1 %v1372_v34  ;;  %1576 = vmatpush.msra.mxu0 %v1373_v3  ;;  %v1318_v40 = vsel %vm1309_vm4, %v7635_v58, %v3372_v9  ;;  %v7637_v58 = vunpack.i.h.bf16 %v5265_v13  ;;  %v3362_v13 = vunpack.i.l.bf16 %v5484_v39 }
 0x19a   :  { %v5512_v19 = vpop.permute.xlu0 %3420  ;;  %3198 = vmatmul.msk.f32.gmra.mxu3 %vm1476_vm6, %v5395_v6  ;;  %v5524_v45 = vpop.permute.xlu2 %3455 }
 0x19b   :  { %v5526_v3 = vpop.permute.xlu1 %3400  ;;  %1531 = vmatpush.msra.mxu1 %v1318_v40  ;;  %1577 = vmatpush.msra.mxu0 %v1319_v50  ;;  %v3457_v34 = vunpack.i.l.bf16 %v5524_v45  ;;  %v1311_v9 = vsel %vm1309_vm4, %v7637_v58, %v3332_v54  ;;  %v7639_v40 = vunpack.i.h.bf16 %v5427_v60  ;;  %v7640_v32 = vunpack.i.h.bf16 %v5524_v45 }
 0x19d   :  { %1532 = vmatpush.msra.mxu1 %v1311_v9  ;;  %1578 = vmatpush.msra.mxu0 %v1312_v21  ;;  %v1258_v50 = vsel %vm1248_vm5, %v3367_v47, %v7639_v40  ;;  %v1381_v58 = vsel %vm1370_vm3, %v3378_v1, %v3457_v34  ;;  %v1382_v54 = vsel %vm1370_vm3, %v3457_v34, %v7640_v32  ;;  %v7482_v9 = vunpack.i.h.bf16 %v5330_v7 }
 0x19e   :  { %1621 = vmatpush.msrb.mxu2 %v1381_v58  ;;  %1667 = vmatpush.msrb.mxu3 %v1382_v54  ;;  %v7641_v47 = vunpack.i.h.bf16 %v5283_v31  ;;  %v7642_v21 = vunpack.i.h.bf16 %v5296_v36  ;;  %v7487_v40 = vunpack.i.h.bf16 %v5332_v48  ;;  %v3357_v32 = vunpack.i.l.bf16 %v5332_v48 }
 0x19f   :  { %1533 = vmatpush.msra.mxu1 %v1257_v14  ;;  %1579 = vmatpush.msra.mxu0 %v1258_v50  ;;  %v7643_v14 = vunpack.i.h.bf16 %v5294_v35  ;;  %v1197_v31 = vsel %vm1187_vm7, %v3362_v13, %v7480_v57  ;;  %v7485_v58 = vunpack.i.h.bf16 %v5406_v25 }
 0x1a0   :  { %v1250_v62 = vsel %vm1248_vm5, %v7641_v47, %v3327_v20  ;;  %v1251_v1 = vsel %vm1248_vm5, %v3327_v20, %v7642_v21  ;;  %v7486_v20 = vunpack.i.h.bf16 %v5408_v44  ;;  %v1190_v21 = vsel %vm1187_vm7, %v3322_v63, %v7482_v9 }
 0x1a1   :  { %1534 = vmatpush.msra.mxu1 %v1250_v62  ;;  %1580 = vmatpush.msra.mxu0 %v1251_v1  ;;  %v1196_v50 = vsel %vm1187_vm7, %v7643_v14, %v3362_v13  ;;  %v7644_v62 = vunpack.i.h.bf16 %v5226_v33  ;;  %v3317_v13 = vunpack.i.l.bf16 %v5408_v44  ;;  %v7645_v33 = vunpack.i.h.bf16 %v5315_v49 }
 0x1a2   :  { %v5558_v34 = vpop.permute.xlu0 %3435  ;;  %v5568_v54 = vpop.permute.xlu2 %3465 }
 0x1a3   :  { %v5570_v47 = vpop.permute.xlu1 %3415  ;;  %1535 = vmatpush.msra.mxu1 %v1196_v50  ;;  %1581 = vmatpush.msra.mxu0 %v1197_v31  ;;  %v1189_v35 = vsel %vm1187_vm7, %v7644_v62, %v3322_v63  ;;  %v7483_v1 = vunpack.i.l.bf16 %v5568_v54  ;;  %v1135_v50 = vsel %vm1126_vm8, %v7645_v33, %v3357_v32  ;;  %v1136_v63 = vsel %vm1126_vm8, %v3357_v32, %v7487_v40 }
 0x1a4   :  { %v7484_v14 = vunpack.i.h.bf16 %v5570_v47  ;;  %v3417_v57 = vunpack.i.l.bf16 %v5570_v47  ;;  %v3352_v31 = vunpack.i.l.bf16 %v5401_v11  ;;  %v7646_v62 = vunpack.i.h.bf16 %v5359_v23 }
 0x1a5   :  { %1536 = vmatpush.msra.mxu1 %v1189_v35  ;;  %1582 = vmatpush.msra.mxu0 %v1190_v21  ;;  %v5601_v49 = vsel %vm1004_vm10, %v7485_v58, %v7483_v1  ;;  %v3313_v32 = vunpack.i.h.bf16 %v5281_v30  ;;  %v3312_v35 = vunpack.i.l.bf16 %v5281_v30  ;;  %v7647_v23 = vunpack.i.h.bf16 %v5251_v61 }
 0x1a6   :  { %v1374_v9 = vsel %vm1370_vm3, %v7646_v62, %v3417_v57  ;;  %v1375_v24 = vsel %vm1370_vm3, %v3417_v57, %v7484_v14  ;;  %v1129_v57 = vsel %vm1126_vm8, %v3317_v13, %v7486_v20  ;;  %v3348_v33 = vunpack.i.h.bf16 %v5458_v12 }
 0x1a7   :  { %1537 = vmatpush.msra.mxu1 %v1135_v50  ;;  %1583 = vmatpush.msra.mxu0 %v1136_v63  ;;  %v1128_v21 = vsel %vm1126_vm8, %v7647_v23, %v3317_v13  ;;  %v3347_v50 = vunpack.i.l.bf16 %v5458_v12  ;;  %v7648_v62 = vunpack.i.h.bf16 %v5244_v53  ;;  %v7649_v61 = vunpack.i.h.bf16 %v5401_v11 }
 0x1a8   :  { %1622 = vmatpush.msrb.mxu2 %v1374_v9  ;;  %1668 = vmatpush.msrb.mxu3 %v1375_v24  ;;  %v3413_v23 = vunpack.i.h.bf16 %v5454_v51  ;;  %v3412_v13 = vunpack.i.l.bf16 %v5454_v51  ;;  %v3308_v53 = vunpack.i.h.bf16 %v5371_v28  ;;  %v1068_v58 = vsel %vm1065_vm9, %v3312_v35, %v3313_v32 }
 0x1a9   :  { %1538 = vmatpush.msra.mxu1 %v1128_v21  ;;  %1584 = vmatpush.msra.mxu0 %v1129_v57  ;;  %v1074_v24 = vsel %vm1065_vm9, %v7648_v62, %v3352_v31  ;;  %v1075_v9 = vsel %vm1065_vm9, %v3352_v31, %v7649_v61  ;;  %v3307_v62 = vunpack.i.l.bf16 %v5371_v28  ;;  %v7650_v31 = vunpack.i.h.bf16 %v5269_v17 }
 0x1aa   :  { %v5613_v63 = vpop.permute.xlu0 %3450  ;;  %v5623_v21 = vpop.permute.xlu2 %3480  ;;  %v7651_v20 = vunpack.i.h.bf16 %v5369_v27  ;;  %v7653_v27 = vunpack.i.h.bf16 %v5434_v10  ;;  %v7664_v12 = vunpack.i.h.bf16 %v5406_v25 }
 0x1ab   :  { %v3453_v57 = vunpack.i.h.bf16 %v5613_v63  ;;  %v3452_v1 = vunpack.i.l.bf16 %v5613_v63  ;;  %v5627_v14 = vpop.permute.xlu1 %3430  ;;  %1539 = vmatpush.msra.mxu1 %v1074_v24  ;;  %1585 = vmatpush.msra.mxu0 %v1075_v9  ;;  %v1067_v61 = vsel %vm1065_vm9, %v7650_v31, %v3312_v35  ;;  %v7652_v9 = vunpack.i.h.bf16 %v5279_v29 }
 0x1ac   :  { %v1014_v31 = vsel %vm1004_vm10, %v3347_v50, %v3348_v33  ;;  %v7654_v29 = vunpack.i.h.bf16 %v5255_v0  ;;  %v1007_v35 = vsel %vm1004_vm10, %v3307_v62, %v3308_v53  ;;  %v3408_v0 = vunpack.i.h.bf16 %v5488_v52 }
 0x1ad   :  { %1540 = vmatpush.msra.mxu1 %v1067_v61  ;;  %1586 = vmatpush.msra.mxu0 %v1068_v58  ;;  %v1320_v40 = vsel %vm1309_vm4, %v7651_v20, %v3452_v1  ;;  %v1321_v24 = vsel %vm1309_vm4, %v3452_v1, %v3453_v57  ;;  %v1013_v17 = vsel %vm1004_vm10, %v7652_v9, %v3347_v50  ;;  %v3442_v9 = vunpack.i.l.bf16 %v5492_v8 }
 0x1ae   :  { %1623 = vmatpush.msrb.mxu2 %v1320_v40  ;;  %1669 = vmatpush.msrb.mxu3 %v1321_v24  ;;  %v1313_v58 = vsel %vm1309_vm4, %v7653_v27, %v3412_v13  ;;  %v1314_v20 = vsel %vm1309_vm4, %v3412_v13, %v3413_v23  ;;  %v1006_v1 = vsel %vm1004_vm10, %v7654_v29, %v3307_v62  ;;  %v3407_v13 = vunpack.i.l.bf16 %v5488_v52 }
 0x1af   :  { %1541 = vmatpush.msra.mxu1 %v1013_v17  ;;  %1587 = vmatpush.msra.mxu0 %v1014_v31  ;;  %v7489_v24 = vunpack.i.h.bf16 %v5492_v8  ;;  %v7656_v31 = vunpack.i.h.bf16 %v5296_v36  ;;  %v7657_v29 = vunpack.i.h.bf16 %v5484_v39  ;;  %v3483_v51 = vunpack.i.h.bf16 %v5623_v21 }
 0x1b0   :  { %1624 = vmatpush.msrb.mxu2 %v1313_v58  ;;  %1670 = vmatpush.msrb.mxu3 %v1314_v20  ;;  %v3437_v58 = vunpack.i.l.bf16 %v5558_v34 }
 0x1b1   :  { %1542 = vmatpush.msra.mxu1 %v1006_v1  ;;  %1588 = vmatpush.msra.mxu0 %v1007_v35  ;;  %v1252_v27 = vsel %vm1248_vm5, %v7656_v31, %v3407_v13  ;;  %v1198_v1 = vsel %vm1187_vm7, %v7657_v29, %v3442_v9  ;;  %v1199_v36 = vsel %vm1187_vm7, %v3442_v9, %v7489_v24  ;;  %v3397_v35 = vunpack.i.l.bf16 %v5432_v59 }
 0x1b2   :  { %v5661_v40 = vpop.permute.xlu0 %3475  ;;  %v5663_v10 = vpop.permute.xlu2 %3495  ;;  %v7658_v31 = vunpack.i.h.bf16 %v5330_v7  ;;  %v3423_v29 = vunpack.i.h.bf16 %v5512_v19  ;;  %v7659_v7 = vunpack.i.h.bf16 %v5332_v48  ;;  %v3392_v48 = vunpack.i.l.bf16 %v5480_v22 }
 0x1b3   :  { %v5665_v50 = vpop.permute.xlu1 %3445  ;;  %1543 = vmatpush.msra.mxu1 %v5160_v18  ;;  %1589 = vmatpush.msra.mxu0 %v5195_v56  ;;  %v7655_v18 = vunpack.i.h.bf16 %v5427_v60  ;;  %v1253_v60 = vsel %vm1248_vm5, %v3407_v13, %v3408_v0  ;;  %v3438_v13 = vunpack.i.h.bf16 %v5558_v34  ;;  %v3393_v24 = vunpack.i.h.bf16 %v5480_v22  ;;  %v7670_v22 = vld [vmem:[#allocation4_spill] sm:$0xff] }
 0x1b4   :  { %v3448_v62 = vunpack.i.h.bf16 %v5665_v50  ;;  %v3447_v61 = vunpack.i.l.bf16 %v5665_v50  ;;  %v3477_v52 = vunpack.i.l.bf16 %v5661_v40 }
 0x1b5   :  { %1544 = vmatpush.msra.mxu1 %v5150_v5  ;;  %1590 = vmatpush.msra.mxu0 %v5182_v42  ;;  %v7488_v5 = vunpack.i.h.bf16 %v5526_v3  ;;  %v3402_v42 = vunpack.i.l.bf16 %v5526_v3 }
 0x1b6   :  { %1545 = vmatmul.f32.vlgmr.msra.gmra.mxu1 %v5446_v2  ;;  %1591 = vmatmul.f32.vlgmr.msra.gmra.mxu0 %v5446_v2  ;;  %v1259_v56 = vsel %vm1248_vm5, %v7655_v18, %v3447_v61  ;;  %v1260_v17 = vsel %vm1248_vm5, %v3447_v61, %v3448_v62  ;;  %v3422_v61 = vunpack.i.l.bf16 %v5512_v19 }
 0x1b7   :  { %1625 = vmatpush.msrb.mxu2 %v1259_v56  ;;  %1671 = vmatpush.msrb.mxu3 %v1260_v17  ;;  %v1191_v9 = vsel %vm1187_vm7, %v7658_v31, %v3402_v42  ;;  %v7660_v31 = vunpack.i.h.bf16 %v5450_v4  ;;  %v7661_v4 = vunpack.i.h.bf16 %v5408_v44  ;;  %v3427_v44 = vunpack.i.l.bf16 %v5482_v37 }
 0x1b9   :  { %1626 = vmatpush.msrb.mxu2 %v1252_v27  ;;  %1672 = vmatpush.msrb.mxu3 %v1253_v60  ;;  %v1192_v27 = vsel %vm1187_vm7, %v3402_v42, %v7488_v5  ;;  %v3398_v60 = vunpack.i.h.bf16 %v5432_v59  ;;  %v3468_v59 = vunpack.i.h.bf16 %v5568_v54 }
 0x1ba   :  { %v5694_v20 = vpop.permute.xlu0 %3490  ;;  %v5705_v18 = vpop.permute.xlu2 %3510 }
 0x1bb   :  { %v5707_v56 = vpop.permute.xlu1 %3460  ;;  %1627 = vmatpush.msrb.mxu2 %v1198_v1  ;;  %1673 = vmatpush.msrb.mxu3 %v1199_v36  ;;  %v3432_v1 = vunpack.i.l.bf16 %v5627_v14  ;;  %v1137_v36 = vsel %vm1126_vm8, %v7659_v7, %v3437_v58  ;;  %v1130_v7 = vsel %vm1126_vm8, %v7661_v4, %v3397_v35 }
 0x1bc   :  { %v3463_v39 = vunpack.i.h.bf16 %v5707_v56  ;;  %v3462_v17 = vunpack.i.l.bf16 %v5707_v56 }
 0x1bd   :  { %1628 = vmatpush.msrb.mxu2 %v1191_v9  ;;  %1674 = vmatpush.msrb.mxu3 %v1192_v27  ;;  %v3433_v9 = vunpack.i.h.bf16 %v5627_v14  ;;  %v1138_v27 = vsel %vm1126_vm8, %v3437_v58, %v3438_v13  ;;  %v1131_v58 = vsel %vm1126_vm8, %v3397_v35, %v3398_v60 }
 0x1be   :  { %1548 = vmatmul.f32.gmra.mxu1 %v5475_v15  ;;  %1594 = vmatmul.f32.gmra.mxu0 %v5475_v15  ;;  %v1442_v42 = vsel %vm1431_vm2, %v7660_v31, %v3462_v17  ;;  %v1443_v5 = vsel %vm1431_vm2, %v3462_v17, %v3463_v39  ;;  %v7662_v31 = vunpack.i.h.bf16 %v5311_v46  ;;  %v7663_v46 = vunpack.i.h.bf16 %v5401_v11 }
 0x1bf   :  { %1629 = vmatpush.msrb.mxu2 %v1137_v36  ;;  %1658 = vmatpush.msrb.mxu1 %v1442_v42  ;;  %v1077_v35 = vsel %vm1065_vm9, %v3432_v1, %v3433_v9  ;;  %v1069_v11 = vsel %vm1065_vm9, %v3313_v32, %v3392_v48 }
 0x1c0   :  { %1675 = vmatpush.msrb.mxu3 %v1138_v27  ;;  %1704 = vmatpush.msrb.mxu0 %v1443_v5  ;;  %v1435_v17 = vsel %vm1431_vm2, %v7662_v31, %v3422_v61  ;;  %v1436_v5 = vsel %vm1431_vm2, %v3422_v61, %v3423_v29  ;;  %v1076_v42 = vsel %vm1065_vm9, %v7663_v46, %v3432_v1  ;;  %v3428_v27 = vunpack.i.h.bf16 %v5482_v37  ;;  %v7672_v37 = vld [vmem:[#allocation3_spill] sm:$0xff] }
 0x1c1   :  { %1630 = vmatpush.msrb.mxu2 %v1130_v7  ;;  %1659 = vmatpush.msrb.mxu1 %v1435_v17  ;;  %v3387_v61 = vunpack.i.l.bf16 %v5406_v25  ;;  %v1070_v31 = vsel %vm1065_vm9, %v3392_v48, %v3393_v24  ;;  %v1015_v17 = vsel %vm1004_vm10, %v3348_v33, %v3427_v44  ;;  %v3498_v46 = vunpack.i.h.bf16 %v5663_v10 }
 0x1c2   :  { %1676 = vmatpush.msrb.mxu3 %v1131_v58  ;;  %1705 = vmatpush.msrb.mxu0 %v1436_v5  ;;  %v5750_v36 = vpop.permute.xlu0 %3505  ;;  %v5756_v4 = vpop.permute.xlu2 %3525  ;;  %v1016_v30 = vsel %vm1004_vm10, %v3427_v44, %v3428_v27 }
 0x1c3   :  { %v5758_v7 = vpop.permute.xlu1 %3470  ;;  %1631 = vmatpush.msrb.mxu2 %v1076_v42  ;;  %v1008_v32 = vsel %vm1004_vm10, %v3308_v53, %v3387_v61  ;;  %v1009_v33 = vsel %vm1004_vm10, %v3387_v61, %v7664_v12  ;;  %v3497_v53 = vunpack.i.l.bf16 %v5663_v10  ;;  %v7665_v42 = vunpack.i.h.bf16 %v5524_v45 }
 0x1c4   :  { %1677 = vmatpush.msrb.mxu3 %v1077_v35  ;;  %v7666_v45 = vunpack.i.h.bf16 %v5570_v47  ;;  %v3508_v34 = vunpack.i.h.bf16 %v5750_v36 }
 0x1c5   :  { %1632 = vmatpush.msrb.mxu2 %v1069_v11 }
 0x1c6   :  { %1678 = vmatpush.msrb.mxu3 %v1070_v31  ;;  %3199 = vmatmul.msk.f32.vlgmr.msrb.gmra.mxu1 %vm1476_vm6, %v5367_v26  ;;  %v1376_v10 = vsel %vm1370_vm3, %v7666_v45, %v3497_v53 }
 0x1c7   :  { %1633 = vmatpush.msrb.mxu2 %v1015_v17  ;;  %3201 = vmatmul.msk.f32.vlgmr.msrb.gmra.mxu0 %vm1476_vm6, %v5367_v26  ;;  %v1377_v17 = vsel %vm1370_vm3, %v3497_v53, %v3498_v46 }
 0x1c8   :  { %1679 = vmatpush.msrb.mxu3 %v1016_v30 }
 0x1c9   :  { %1634 = vmatpush.msrb.mxu2 %v1008_v32  ;;  %v3492_v32 = vunpack.i.l.bf16 %v5694_v20 }
 0x1ca   :  { %1680 = vmatpush.msrb.mxu3 %v1009_v33  ;;  %v5786_v1 = vpop.permute.xlu0 %3520  ;;  %v3542_v48 = vpop.permute.xlu2 %3541  ;;  %v3528_v33 = vunpack.i.h.bf16 %v5756_v4 }
 0x1cb   :  { %v5788_v58 = vpop.permute.xlu1 %3485  ;;  %1635 = vmatpush.msrb.mxu2 %v5193_v55  ;;  %v3544_v5 = vunpack.i.h.bf16 %v3542_v48  ;;  %v3543_v44 = vunpack.i.l.bf16 %v3542_v48  ;;  %v3527_v48 = vunpack.i.l.bf16 %v5756_v4  ;;  %v3523_v63 = vunpack.i.h.bf16 %v5786_v1 }
 0x1cc   :  { %1681 = vmatpush.msrb.mxu3 %v5235_v43 }
 0x1cd   :  { %1636 = vmatpush.msrb.mxu2 %v5179_v41  ;;  %v1444_v28 = vsel %vm1431_vm2, %v3463_v39, %v3543_v44  ;;  %v1445_v25 = vsel %vm1431_vm2, %v3543_v44, %v3544_v5 }
 0x1ce   :  { %1682 = vmatpush.msrb.mxu3 %v5214_v16  ;;  %1637 = vmatmul.f32.vlgmr.msrb.gmra.mxu2 %v5446_v2 }
 0x1cf   :  { %1683 = vmatmul.f32.vlgmr.msrb.gmra.mxu3 %v5446_v2  ;;  %1750 = vmatpush.msra.mxu2 %v1444_v28  ;;  %v1315_v28 = vsel %vm1309_vm4, %v3413_v23, %v3492_v32  ;;  %v3482_v23 = vunpack.i.l.bf16 %v5623_v21  ;;  %v3478_v21 = vunpack.i.h.bf16 %v5661_v40  ;;  %v3472_v40 = vunpack.i.l.bf16 %v5758_v7 }
 0x1d0   :  { %1796 = vmatpush.msra.mxu3 %v1445_v25  ;;  %3200 = vmatmul.msk.f32.gmra.mxu1 %vm1476_vm6, %v5395_v6  ;;  %v1261_v25 = vsel %vm1248_vm5, %v3448_v62, %v3527_v48  ;;  %v7667_v62 = vunpack.i.h.bf16 %v5492_v8  ;;  %v3513_v8 = vunpack.i.h.bf16 %v5705_v18 }
 0x1d1   :  { %3202 = vmatmul.msk.f32.gmra.mxu0 %vm1476_vm6, %v5395_v6  ;;  %v1194_v53 = vsel %vm1187_vm7, %v3482_v23, %v3483_v51 }
 0x1d2   :  { %v3536_v41 = vpop.permute.xlu0 %3535 }
 0x1d3   :  { %v3538_v55 = vunpack.i.h.bf16 %v3536_v41  ;;  %v3537_v16 = vunpack.i.l.bf16 %v3536_v41  ;;  %v3501_v43 = vpop.permute.xlu1 %3500 }
 0x1d4   :  { %v3503_v56 = vunpack.i.h.bf16 %v3501_v43  ;;  %v3502_v39 = vunpack.i.l.bf16 %v3501_v43 }
 0x1d5   :  { %v1383_v35 = vsel %vm1370_vm3, %v7665_v42, %v3537_v16  ;;  %v1384_v61 = vsel %vm1370_vm3, %v3537_v16, %v3538_v55  ;;  %v1132_v42 = vsel %vm1126_vm8, %v3398_v60, %v3477_v52  ;;  %v1071_v60 = vsel %vm1065_vm9, %v3393_v24, %v3472_v40  ;;  %v7671_v24 = vld [vmem:[#allocation2_spill] sm:$0xff] }
 0x1d6   :  { %1640 = vmatmul.f32.gmra.mxu2 %v5475_v15  ;;  %1713 = vmatpush.msra.mxu1 %v1383_v35  ;;  %v1437_v11 = vsel %vm1431_vm2, %v3423_v29, %v3502_v39  ;;  %v1438_v31 = vsel %vm1431_vm2, %v3502_v39, %v3503_v56  ;;  %v3493_v29 = vunpack.i.h.bf16 %v5694_v20  ;;  %v3487_v20 = vunpack.i.l.bf16 %v5788_v58 }
 0x1d7   :  { %1686 = vmatmul.f32.gmra.mxu3 %v5475_v15  ;;  %1751 = vmatpush.msra.mxu2 %v1437_v11  ;;  %v3512_v56 = vunpack.i.l.bf16 %v5705_v18  ;;  %v1133_v35 = vsel %vm1126_vm8, %v3477_v52, %v3478_v21 }
 0x1d8   :  { %1759 = vmatpush.msra.mxu0 %v1384_v61  ;;  %1797 = vmatpush.msra.mxu3 %v1438_v31  ;;  %v1316_v4 = vsel %vm1309_vm4, %v3492_v32, %v3493_v29  ;;  %v1523_v31 = vpop.f32.mrf.mxu0 }
 0x1d9   :  { %1714 = vmatpush.msra.mxu1 %v1376_v10  ;;  %v1078_v18 = vsel %vm1065_vm9, %v3433_v9, %v3512_v56  ;;  %v1079_v61 = vsel %vm1065_vm9, %v3512_v56, %v3513_v8 }
 0x1da   :  { %1760 = vmatpush.msra.mxu0 %v1377_v17  ;;  %v5906_v45 = vpop.permute.xlu0 %1468 }
 0x1db   :  { %v3516_v30 = vpop.permute.xlu1 %3515 }
 0x1dc   :  { %v3517_v50 = vunpack.i.l.bf16 %v3516_v30 }
 0x1de   :  { %3203 = vmatmul.msk.f32.vlgmr.msra.gmra.mxu2 %vm1476_vm6, %v5367_v26  ;;  %v1139_v39 = vsel %vm1126_vm8, %v3438_v13, %v3517_v50  ;;  %v3507_v13 = vunpack.i.l.bf16 %v5750_v36  ;;  %v7669_v36 = vunpack.i.l.bf16 %v5568_v54 }
 0x1df   :  { %3205 = vmatmul.msk.f32.vlgmr.msra.gmra.mxu3 %vm1476_vm6, %v5367_v26  ;;  %v3488_v26 = vunpack.i.h.bf16 %v5788_v58  ;;  %v1262_v58 = vsel %vm1248_vm5, %v3527_v48, %v3528_v33 }
 0x1e0   :  { %v1017_v14 = vsel %vm1004_vm10, %v3428_v27, %v3507_v13  ;;  %v1018_v9 = vsel %vm1004_vm10, %v3507_v13, %v3508_v34  ;;  %v1011_v11 = vsel %vm1004_vm10, %v7669_v36, %v3468_v59  ;;  %v1526_v10 = vpop.f32.mrf.mxu0 }
 0x1e1   :  { %v1255_v41 = vsel %vm1248_vm5, %v3487_v20, %v3488_v26 }
 0x1e3   :  { %v3531_v19 = vpop.permute.xlu1 %3530 }
 0x1e4   :  { %v3533_v12 = vunpack.i.h.bf16 %v3531_v19  ;;  %v3532_v47 = vunpack.i.l.bf16 %v3531_v19 }
 0x1e6   :  { %v1322_v5 = vsel %vm1309_vm4, %v3453_v57, %v3532_v47  ;;  %v1323_v44 = vsel %vm1309_vm4, %v3532_v47, %v3533_v12  ;;  %3204 = vmatmul.msk.f32.gmra.mxu2 %vm1476_vm6, %v5395_v6  ;;  %v3522_v57 = vunpack.i.l.bf16 %v5786_v1  ;;  %v3518_v1 = vunpack.i.h.bf16 %v3516_v30 }
 0x1e7   :  { %1715 = vmatpush.msra.mxu1 %v1322_v5  ;;  %1761 = vmatpush.msra.mxu0 %v1323_v44 }
 0x1e8   :  { %3206 = vmatmul.msk.f32.gmra.mxu3 %vm1476_vm6, %v5395_v6  ;;  %v1254_v6 = vsel %vm1248_vm5, %v3408_v0, %v3487_v20  ;;  %v1200_v55 = vsel %vm1187_vm7, %v7667_v62, %v3522_v57  ;;  %v1201_v16 = vsel %vm1187_vm7, %v3522_v57, %v3523_v63  ;;  %v7668_v0 = vunpack.i.h.bf16 %v5526_v3 }
 0x1e9   :  { %1716 = vmatpush.msra.mxu1 %v1315_v28  ;;  %1762 = vmatpush.msra.mxu0 %v1316_v4  ;;  %v1140_v46 = vsel %vm1126_vm8, %v3517_v50, %v3518_v1  ;;  %v3473_v3 = vunpack.i.h.bf16 %v5758_v7 }
 0x1ea   :  { %v1193_v43 = vsel %vm1187_vm7, %v7668_v0, %v3482_v23 }
 0x1eb   :  { %1717 = vmatpush.msra.mxu1 %v1261_v25  ;;  %1763 = vmatpush.msra.mxu0 %v1262_v58  ;;  %v1072_v7 = vsel %vm1065_vm9, %v3472_v40, %v3473_v3 }
 0x1ec   :  { %v5903_v54 = vpop.permute.xlu1 %1473 }
 0x1ed   :  { %1718 = vmatpush.msra.mxu1 %v1254_v6  ;;  %1764 = vmatpush.msra.mxu0 %v1255_v41 }
 0x1ef   :  { %1719 = vmatpush.msra.mxu1 %v1200_v55  ;;  %1765 = vmatpush.msra.mxu0 %v1201_v16 }
 0x1f1   :  { %1720 = vmatpush.msra.mxu1 %v1193_v43  ;;  %1766 = vmatpush.msra.mxu0 %v1194_v53 }
 0x1f3   :  { %1721 = vmatpush.msra.mxu1 %v1139_v39  ;;  %1767 = vmatpush.msra.mxu0 %v1140_v46 }
 0x1f5   :  { %1722 = vmatpush.msra.mxu1 %v1132_v42  ;;  %1768 = vmatpush.msra.mxu0 %v1133_v35 }
 0x1f7   :  { %1723 = vmatpush.msra.mxu1 %v1078_v18  ;;  %1769 = vmatpush.msra.mxu0 %v1079_v61 }
 0x1f9   :  { %1724 = vmatpush.msra.mxu1 %v1071_v60  ;;  %1770 = vmatpush.msra.mxu0 %v1072_v7 }
 0x1fb   :  { %1725 = vmatpush.msra.mxu1 %v1017_v14  ;;  %1771 = vmatpush.msra.mxu0 %v1018_v9 }
 0x1fd   :  { %1726 = vmatpush.msra.mxu1 %v5601_v49  ;;  %1772 = vmatpush.msra.mxu0 %v1011_v11 }
 0x1ff   :  { %1727 = vmatpush.msra.mxu1 %v5231_v38  ;;  %1773 = vmatpush.msra.mxu0 %v7670_v22 }
 0x201   :  { %1728 = vmatpush.msra.mxu1 %v7671_v24  ;;  %1774 = vmatpush.msra.mxu0 %v7672_v37 }
 0x202   :  { %1729 = vmatmul.f32.vlgmr.msra.gmra.mxu1 %v5446_v2  ;;  %1775 = vmatmul.f32.vlgmr.msra.gmra.mxu0 %v5446_v2 }
 0x205   :  { %v1500_v27 = vpop.f32.mrf.mxu3 }
 0x206   :  { %v1501_v17 = vadd.f32 %v1500_v27, %v5906_v45 }
 0x208   :  { %v1524_v19 = vadd.f32 %v1523_v31, %v1501_v17 }
 0x20a   :  { %1732 = vmatmul.f32.gmra.mxu1 %v5475_v15  ;;  %1778 = vmatmul.f32.gmra.mxu0 %v5475_v15 }
 0x20c   :  { %v1569_v15 = vpop.f32.mrf.mxu2 }
 0x20d   :  { %v1503_v49 = vpop.f32.mrf.mxu3 }
 0x20e   :  { %v1504_v38 = vadd.f32 %v1503_v49, %v5903_v54 }
 0x210   :  { %v1527_v30 = vadd.f32 %v1526_v10, %v1504_v38 }
 0x212   :  { %v1805_v29 = vmax.f32 %v1524_v19, %v1527_v30 }
 0x214   :  { %v1806_v2 = vrot.slane %v1805_v29, 4  ;;  %v1572_v58 = vpop.f32.mrf.mxu2 }
 0x215   :  { %v1615_v5 = vpop.f32.mrf.mxu3 }
 0x216   :  { %v1807_v32 = vmax.f32 %v1805_v29, %v1806_v2 }
 0x218   :  { %v1808_v12 = vrot.slane %v1807_v32, 2 }
 0x21a   :  { %v1809_v47 = vmax.f32 %v1807_v32, %v1808_v12 }
 0x21c   :  { %v1810_v33 = vrot.slane %v1809_v47, 1 }
 0x21d   :  { %v1618_v51 = vpop.f32.mrf.mxu3 }
 0x21e   :  { %v1811_v48 = vmax.f32 %v1809_v47, %v1810_v33 }
 0x220   :  { %v1854_v44 = vsub.f32 %v1524_v19, %v1811_v48  ;;  %v1861_v28 = vsub.f32 %v1527_v30, %v1811_v48 }
 0x222   :  { %v1868_v4 = vmul.f32 1.442695, %v1854_v44  ;;  %v1882_v63 = vmul.f32 1.442695, %v1861_v28 }
 0x224   :  { %4071 = vpow2.f32 %v1868_v4 }
 0x225   :  { %4073 = vpow2.f32 %v1882_v63 }
 0x22a   :  { %v5913_v0 = vpop.eup %4071 }
 0x22b   :  { %v5915_v43 = vpop.eup %4073 }
 0x22c   :  { %v1896_v46 = vadd.f32 %v5915_v43, %v5913_v0 }
 0x22e   :  { %v1897_v34 = vrot.slane %v1896_v46, 4 }
 0x230   :  { %v1898_v60 = vadd.f32 %v1897_v34, %v1896_v46 }
 0x232   :  { %v1899_v27 = vrot.slane %v1898_v60, 2 }
 0x233   :  { %v1546_v26 = vpop.f32.mrf.mxu1  ;;  %v1592_v20 = vpop.f32.mrf.mxu0 }
 0x234   :  { %v1547_v57 = vadd.f32 %v1546_v26, %v5906_v45  ;;  %v1593_v25 = vadd.f32 %v1592_v20, %v5906_v45  ;;  %v1900_v31 = vadd.f32 %v1899_v27, %v1898_v60 }
 0x236   :  { %v1570_v50 = vadd.f32 %v1569_v15, %v1547_v57  ;;  %v1616_v62 = vadd.f32 %v1615_v5, %v1593_v25  ;;  %v1901_v17 = vrot.slane %v1900_v31, 1  ;;  %v5931_v5 = vld [vmem:[%s7459_s6] sm:$0xff]  ;;  %s4147_s6 = smov 125  }
 0x237   :  { %v1954_v4 = vperm.slane %v5931_v5, 0 }
 0x238   :  { %v1902_v32 = vadd.f32 %v1901_v17, %v1900_v31 }
 0x23b   :  { %v1549_v23 = vpop.f32.mrf.mxu1  ;;  %v1595_v6 = vpop.f32.mrf.mxu0 }
 0x23c   :  { %v1550_v41 = vadd.f32 %v1549_v23, %v5903_v54  ;;  %v1596_v1 = vadd.f32 %v1595_v6, %v5903_v54 }
 0x23e   :  { %v1573_v55 = vadd.f32 %v1572_v58, %v1550_v41  ;;  %v1619_v16 = vadd.f32 %v1618_v51, %v1596_v1  ;;  %v1955_v58 = vperm.slane %v5931_v5, 1 }
 0x240   :  { %v1812_v21 = vmax.f32 %v1570_v50, %v1573_v55  ;;  %v1819_v52 = vmax.f32 %v1616_v62, %v1619_v16 }
 0x242   :  { %v1813_v53 = vrot.slane %v1812_v21, 4  ;;  %v1820_v8 = vrot.slane %v1819_v52, 4 }
 0x243   :  { %v1661_v20 = vpop.f32.mrf.mxu1 }
 0x244   :  { %v1814_v56 = vmax.f32 %v1812_v21, %v1813_v53  ;;  %v1821_v39 = vmax.f32 %v1819_v52, %v1820_v8 }
 0x246   :  { %v1815_v3 = vrot.slane %v1814_v56, 2  ;;  %v1822_v40 = vrot.slane %v1821_v39, 2 }
 0x248   :  { %v1816_v42 = vmax.f32 %v1814_v56, %v1815_v3  ;;  %v1823_v35 = vmax.f32 %v1821_v39, %v1822_v40 }
 0x24a   :  { %v1817_v13 = vrot.slane %v1816_v42, 1  ;;  %v1824_v18 = vrot.slane %v1823_v35, 1 }
 0x24c   :  { %v1818_v61 = vmax.f32 %v1816_v42, %v1817_v13  ;;  %v1825_v59 = vmax.f32 %v1823_v35, %v1824_v18  ;;  %v1707_v35 = vpop.f32.mrf.mxu0 }
 0x24e   :  { %v1855_v7 = vsub.f32 %v1570_v50, %v1818_v61  ;;  %v1862_v14 = vsub.f32 %v1573_v55, %v1818_v61  ;;  %v1856_v9 = vsub.f32 %v1616_v62, %v1825_v59  ;;  %v1863_v36 = vsub.f32 %v1619_v16, %v1825_v59  ;;  %v1664_v62 = vpop.f32.mrf.mxu1 }
 0x250   :  { %v1870_v11 = vmul.f32 1.442695, %v1855_v7  ;;  %v1884_v22 = vmul.f32 1.442695, %v1862_v14  ;;  %v1872_v24 = vmul.f32 1.442695, %v1856_v9 }
 0x251   :  { %v1886_v37 = vmul.f32 1.442695, %v1863_v36  ;;  %v1638_v48 = vpop.f32.mrf.mxu2 }
 0x252   :  { %4075 = vpow2.f32 %v1870_v11  ;;  %v1639_v16 = vadd.f32 %v1638_v48, %v5906_v45  ;;  %v1684_v40 = vpop.f32.mrf.mxu3 }
 0x253   :  { %4077 = vpow2.f32 %v1884_v22  ;;  %v1685_v36 = vadd.f32 %v1684_v40, %v5906_v45 }
 0x254   :  { %4079 = vpow2.f32 %v1872_v24  ;;  %v1662_v39 = vadd.f32 %v1661_v20, %v1639_v16  ;;  %v1710_v9 = vpop.f32.mrf.mxu0 }
 0x255   :  { %4081 = vpow2.f32 %v1886_v37  ;;  %v1708_v31 = vadd.f32 %v1707_v35, %v1685_v36 }
 0x256   :  { %4083 = vrcp.f32 %v1902_v32 }
 0x258   :  { %v4076_v49 = vpop.eup %4075 }
 0x259   :  { %v5919_v38 = vpop.eup %4077  ;;  %v1641_v51 = vpop.f32.mrf.mxu2 }
 0x25a   :  { %v5921_v10 = vpop.eup %4079  ;;  %v1903_v30 = vadd.f32 %v5919_v38, %v4076_v49  ;;  %v1642_v41 = vadd.f32 %v1641_v51, %v5903_v54  ;;  %v1687_v59 = vpop.f32.mrf.mxu3 }
 0x25b   :  { %v5924_v19 = vpop.eup %4081  ;;  %v1688_v7 = vadd.f32 %v1687_v59, %v5903_v54  ;;  %v1957_v59 = vperm.slane %v5931_v5, 3 }
 0x25c   :  { %v1904_v29 = vrot.slane %v1903_v30, 4  ;;  %v1910_v2 = vadd.f32 %v5924_v19, %v5921_v10  ;;  %v4084_v63 = vpop.eup %4083  ;;  %v1665_v52 = vadd.f32 %v1664_v62, %v1642_v41 }
 0x25d   :  { %v1968_v25 = vmul.f32 %v4084_v63, %v1954_v4  ;;  %v1711_v37 = vadd.f32 %v1710_v9, %v1688_v7 }
 0x25e   :  { %v1905_v12 = vadd.f32 %v1904_v29, %v1903_v30  ;;  %v1911_v33 = vrot.slane %v1910_v2, 4  ;;  %v1826_v3 = vmax.f32 %v1662_v39, %v1665_v52 }
 0x25f   :  { %v1975_v1 = vperm.slane %v1968_v25, 0  ;;  %v1833_v30 = vmax.f32 %v1708_v31, %v1711_v37 }
 0x260   :  { %v1906_v47 = vrot.slane %v1905_v12, 2  ;;  %v1912_v26 = vadd.f32 %v1911_v33, %v1910_v2  ;;  %v1827_v42 = vrot.slane %v1826_v3, 4 }
 0x261   :  { %v5938_v53 = vmul.f32 %v5913_v0, %v1975_v1  ;;  %v1956_v0 = vperm.slane %v5931_v5, 2  ;;  %v5963_v27 = vmul.f32 %v5915_v43, %v1975_v1 }
 0x262   :  { %v1907_v15 = vadd.f32 %v1906_v47, %v1905_v12  ;;  %v1913_v57 = vrot.slane %v1912_v26, 2  ;;  %v1828_v13 = vmax.f32 %v1826_v3, %v1827_v42 }
 0x263   :  { %7673 = vst [vmem:[#allocation4_spill] sm:$0xff] %v5938_v53 }
 0x264   :  { %v1908_v44 = vrot.slane %v1907_v15, 1  ;;  %v1914_v23 = vadd.f32 %v1913_v57, %v1912_v26  ;;  %v1829_v61 = vrot.slane %v1828_v13, 2 }
 0x266   :  { %v1909_v28 = vadd.f32 %v1908_v44, %v1907_v15  ;;  %v1915_v55 = vrot.slane %v1914_v23, 1  ;;  %v1830_v14 = vmax.f32 %v1828_v13, %v1829_v61  ;;  %v1799_v61 = vpop.f32.mrf.mxu3 }
 0x268   :  { %4085 = vrcp.f32 %v1909_v28  ;;  %v1916_v56 = vadd.f32 %v1915_v55, %v1914_v23  ;;  %v1831_v24 = vrot.slane %v1830_v14, 1  ;;  %v1753_v23 = vpop.f32.mrf.mxu2 }
 0x26a   :  { %4087 = vrcp.f32 %v1916_v56  ;;  %v1832_v17 = vmax.f32 %v1830_v14, %v1831_v24 }
 0x26c   :  { %v1857_v43 = vsub.f32 %v1662_v39, %v1832_v17 }
 0x26e   :  { %v4086_v6 = vpop.eup %4085  ;;  %v1874_v2 = vmul.f32 1.442695, %v1857_v43 }
 0x26f   :  { %v1969_v50 = vmul.f32 %v4086_v6, %v1955_v58 }
 0x270   :  { %v4088_v34 = vpop.eup %4087  ;;  %4089 = vpow2.f32 %v1874_v2  ;;  %v1756_v16 = vpop.f32.mrf.mxu2 }
 0x271   :  { %v1976_v21 = vperm.slane %v1969_v50, 0  ;;  %v1970_v18 = vmul.f32 %v4088_v34, %v1956_v0 }
 0x273   :  { %v5940_v8 = vmul.f32 %v4076_v49, %v1976_v21  ;;  %v1977_v60 = vperm.slane %v1970_v18, 0  ;;  %v5957_v11 = vmul.f32 %v5919_v38, %v1976_v21  ;;  %v1834_v38 = vrot.slane %v1833_v30, 4 }
 0x275   :  { %v3555_v46 = vpack.i.bf16 %v5940_v8, %v5938_v53  ;;  %v5960_v22 = vmul.f32 %v5924_v19, %v1977_v60  ;;  %v3590_v29 = vpack.i.bf16 %v5957_v11, %v5963_v27  ;;  %v1864_v19 = vsub.f32 %v1665_v52, %v1832_v17 }
 0x276   :  { %v1835_v32 = vmax.f32 %v1833_v30, %v1834_v38  ;;  %v5985_v48 = vpop.eup %4089  ;;  %v5991_v44 = vmul.f32 %v5921_v10, %v1977_v60 }
 0x277   :  { %3556 = vrot.lane.b32.xlu1 %v3555_v46, %s4147_s6  ;;  %3551 = vrot.lane.b32.xlu0 %v3555_v46, %s4144_s13  ;;  %7674 = vst [vmem:[#allocation2_spill] sm:$0xff] %v5960_v22  ;;  %v5967_v49 = vpack.i.bf16 %v5960_v22, %v5957_v11  ;;  %v1888_v12 = vmul.f32 1.442695, %v1864_v19  ;;  %v3665_v4 = vpack.i.bf16 %v5938_v53, %v5960_v22 }
 0x278   :  { %3546 = vrot.lane.b32.xlu2 %v3555_v46, %s4141_s10  ;;  %v1836_v47 = vrot.slane %v1835_v32, 2  ;;  %7675 = vst [vmem:[#allocation3_spill] sm:$0xff] %v5991_v44  ;;  %v5997_v28 = vpack.i.bf16 %v5991_v44, %v5940_v8 }
 0x279   :  { %4091 = vpow2.f32 %v1888_v12 }
 0x27a   :  { %v1837_v33 = vmax.f32 %v1835_v32, %v1836_v47 }
 0x27c   :  { %v1838_v26 = vrot.slane %v1837_v33, 1 }
 0x27e   :  { %v1839_v63 = vmax.f32 %v1837_v33, %v1838_v26 }
 0x27f   :  { %3571 = vrot.lane.b32.xlu1 %v3555_v46, %s4145_s14  ;;  %3566 = vrot.lane.b32.xlu0 %v3555_v46, %s4139_s3  ;;  %v5988_v15 = vpop.eup %4091  ;;  %v1730_v10 = vpop.f32.mrf.mxu1 }
 0x280   :  { %3561 = vrot.lane.b32.xlu2 %v3555_v46, %s4140_s30  ;;  %v1917_v20 = vadd.f32 %v5988_v15, %v5985_v48  ;;  %v1858_v25 = vsub.f32 %v1708_v31, %v1839_v63  ;;  %v1865_v58 = vsub.f32 %v1711_v37, %v1839_v63  ;;  %v1731_v56 = vadd.f32 %v1730_v10, %v5906_v45  ;;  %v1776_v34 = vpop.f32.mrf.mxu0 }
 0x281   :  { %v1777_v43 = vadd.f32 %v1776_v34, %v5906_v45 }
 0x282   :  { %v1918_v57 = vrot.slane %v1917_v20, 4  ;;  %v1876_v6 = vmul.f32 1.442695, %v1858_v25  ;;  %v1890_v41 = vmul.f32 1.442695, %v1865_v58  ;;  %v1754_v42 = vadd.f32 %v1753_v23, %v1731_v56 }
 0x284   :  { %v1919_v51 = vadd.f32 %v1918_v57, %v1917_v20  ;;  %4093 = vpow2.f32 %v1876_v6 }
 0x285   :  { %4095 = vpow2.f32 %v1890_v41 }
 0x286   :  { %v1920_v1 = vrot.slane %v1919_v51, 2 }
 0x287   :  { %3586 = vrot.lane.b32.xlu1 %v3555_v46, %s4142_s11  ;;  %3581 = vrot.lane.b32.xlu0 %v3555_v46, %s4143_s12  ;;  %v1733_v50 = vpop.f32.mrf.mxu1 }
 0x288   :  { %3576 = vrot.lane.b32.xlu2 %v3555_v46, %s4148_s27  ;;  %v1921_v62 = vadd.f32 %v1920_v1, %v1919_v51  ;;  %v1734_v55 = vadd.f32 %v1733_v50, %v5903_v54  ;;  %v1779_v36 = vpop.f32.mrf.mxu0 }
 0x289   :  { %v1780_v17 = vadd.f32 %v1779_v36, %v5903_v54  ;;  %v1800_v54 = vadd.f32 %v1799_v61, %v1777_v43 }
 0x28a   :  { %v6013_v21 = vpop.eup %4093  ;;  %v1922_v52 = vrot.slane %v1921_v62, 1  ;;  %v1757_v46 = vadd.f32 %v1756_v16, %v1734_v55 }
 0x28b   :  { %v6017_v39 = vpop.eup %4095 }
 0x28c   :  { %v1923_v3 = vadd.f32 %v1922_v52, %v1921_v62  ;;  %v1924_v40 = vadd.f32 %v6017_v39, %v6013_v21  ;;  %v1840_v0 = vmax.f32 %v1754_v42, %v1757_v46 }
 0x28e   :  { %4097 = vrcp.f32 %v1923_v3  ;;  %v1925_v35 = vrot.slane %v1924_v40, 4  ;;  %v1841_v13 = vrot.slane %v1840_v0, 4 }
 0x28f   :  { %3626 = vrot.lane.b32.xlu1 %v5967_v49, %s4144_s13  ;;  %3621 = vrot.lane.b32.xlu0 %v5967_v49, %s4141_s10 }
 0x290   :  { %3591 = vrot.lane.b32.xlu2 %v3590_v29, %s4149_s28  ;;  %v1926_v18 = vadd.f32 %v1925_v35, %v1924_v40  ;;  %v1842_v7 = vmax.f32 %v1840_v0, %v1841_v13 }
 0x292   :  { %v1927_v14 = vrot.slane %v1926_v18, 2  ;;  %v1843_v24 = vrot.slane %v1842_v7, 2 }
 0x294   :  { %v4098_v60 = vpop.eup %4097  ;;  %v1928_v37 = vadd.f32 %v1927_v14, %v1926_v18  ;;  %v1844_v30 = vmax.f32 %v1842_v7, %v1843_v24 }
 0x295   :  { %v1971_v9 = vmul.f32 %v4098_v60, %v1957_v59 }
 0x296   :  { %v1929_v38 = vrot.slane %v1928_v37, 1  ;;  %v1845_v32 = vrot.slane %v1844_v30, 1 }
 0x297   :  { %3641 = vrot.lane.b32.xlu1 %v5967_v49, %s4139_s3  ;;  %3636 = vrot.lane.b32.xlu0 %v5967_v49, %s4140_s30  ;;  %v1978_v31 = vperm.slane %v1971_v9, 0 }
 0x298   :  { %3596 = vrot.lane.b32.xlu2 %v3590_v29, %s4150_s29  ;;  %v1930_v47 = vadd.f32 %v1929_v38, %v1928_v37  ;;  %v1846_v26 = vmax.f32 %v1844_v30, %v1845_v32 }
 0x299   :  { %v6040_v19 = vmul.f32 %v5985_v48, %v1978_v31  ;;  %v6065_v62 = vmul.f32 %v5988_v15, %v1978_v31 }
 0x29a   :  { %4099 = vrcp.f32 %v1930_v47  ;;  %v1859_v48 = vsub.f32 %v1754_v42, %v1846_v26 }
 0x29b   :  { %v3730_v45 = vpack.i.bf16 %v6040_v19, %v5991_v44 }
 0x29c   :  { %v1878_v10 = vmul.f32 1.442695, %v1859_v48 }
 0x29e   :  { %4101 = vpow2.f32 %v1878_v10 }
 0x29f   :  { %3656 = vrot.lane.b32.xlu1 %v5967_v49, %s4143_s12  ;;  %3651 = vrot.lane.b32.xlu0 %v5967_v49, %s4148_s27 }
 0x2a0   :  { %3601 = vrot.lane.b32.xlu2 %v3590_v29, %s4151_s0  ;;  %v4100_v57 = vpop.eup %4099 }
 0x2a4   :  { %v6059_v1 = vpop.eup %4101 }
 0x2a7   :  { %3671 = vrot.lane.b32.xlu1 %v5997_v28, %s4149_s28  ;;  %3666 = vrot.lane.b32.xlu0 %v3665_v4, %s4149_s28 }
 0x2a8   :  { %3606 = vrot.lane.b32.xlu2 %v3590_v29, %s4152_s1 }
 0x2af   :  { %3681 = vrot.lane.b32.xlu1 %v5997_v28, %s4150_s29  ;;  %3676 = vrot.lane.b32.xlu0 %v3665_v4, %s4150_s29 }
 0x2b0   :  { %3611 = vrot.lane.b32.xlu2 %v3590_v29, %s4153_s16 }
 0x2b7   :  { %3691 = vrot.lane.b32.xlu1 %v5997_v28, %s4151_s0  ;;  %3686 = vrot.lane.b32.xlu0 %v3665_v4, %s4151_s0 }
 0x2b8   :  { %3616 = vrot.lane.b32.xlu2 %v3590_v29, %s4146_s15  ;;  %v1802_v29 = vpop.f32.mrf.mxu3 }
 0x2b9   :  { %v1803_v2 = vadd.f32 %v1802_v29, %v1780_v17 }
 0x2bb   :  { %v1847_v33 = vmax.f32 %v1800_v54, %v1803_v2 }
 0x2bf   :  { %3701 = vrot.lane.b32.xlu1 %v5997_v28, %s4152_s1  ;;  %3696 = vrot.lane.b32.xlu0 %v3665_v4, %s4152_s1 }
 0x2c0   :  { %3631 = vrot.lane.b32.xlu2 %v5967_v49, %s4147_s6 }
 0x2c7   :  { %3711 = vrot.lane.b32.xlu1 %v5997_v28, %s4153_s16  ;;  %3706 = vrot.lane.b32.xlu0 %v3665_v4, %s4153_s16 }
 0x2c8   :  { %3646 = vrot.lane.b32.xlu2 %v5967_v49, %s4145_s14 }
 0x2cf   :  { %3721 = vrot.lane.b32.xlu1 %v5997_v28, %s4146_s15  ;;  %3716 = vrot.lane.b32.xlu0 %v3665_v4, %s4146_s15  ;;  %v1866_v28 = vsub.f32 %v1757_v46, %v1846_v26  ;;  %v1958_v4 = vperm.slane %v5931_v5, 4 }
 0x2d0   :  { %3661 = vrot.lane.b32.xlu2 %v5967_v49, %s4142_s11  ;;  %v1848_v49 = vrot.slane %v1847_v33, 4 }
 0x2d1   :  { %v1892_v25 = vmul.f32 1.442695, %v1866_v28  ;;  %v1972_v58 = vmul.f32 %v4100_v57, %v1958_v4  ;;  %v1959_v28 = vperm.slane %v5931_v5, 5 }
 0x2d2   :  { %v6042_v12 = vpop.permute.xlu2 %3546  ;;  %v1849_v63 = vmax.f32 %v1847_v33, %v1848_v49 }
 0x2d3   :  { %4103 = vpow2.f32 %v1892_v25  ;;  %v1979_v6 = vperm.slane %v1972_v58, 0 }
 0x2d4   :  { %v1850_v51 = vrot.slane %v1849_v63, 2 }
 0x2d5   :  { %v6068_v55 = vmul.f32 %v6017_v39, %v1979_v6  ;;  %v6122_v43 = vmul.f32 %v6013_v21, %v1979_v6 }
 0x2d6   :  { %v1851_v41 = vmax.f32 %v1849_v63, %v1850_v51 }
 0x2d7   :  { %3731 = vrot.lane.b32.xlu1 %v3730_v45, %s4144_s13  ;;  %3726 = vrot.lane.b32.xlu0 %v3730_v45, %s4141_s10  ;;  %7676 = vst [vmem:[#allocation5_spill] sm:$0xff] %v6068_v55  ;;  %v6085_v0 = vpack.i.bf16 %v6068_v55, %v6065_v62  ;;  %v6134_v33 = vpack.i.bf16 %v6122_v43, %v6040_v19 }
 0x2d8   :  { %3736 = vrot.lane.b32.xlu2 %v3730_v45, %s4147_s6  ;;  %v1852_v16 = vrot.slane %v1851_v41, 1  ;;  %7677 = vst [vmem:[#allocation6_spill] sm:$0xff] %v6122_v43 }
 0x2d9   :  { %v6062_v50 = vpop.eup %4103 }
 0x2da   :  { %v6049_v20 = vpop.permute.xlu2 %3561  ;;  %v1931_v42 = vadd.f32 %v6062_v50, %v6059_v1  ;;  %v1853_v15 = vmax.f32 %v1851_v41, %v1852_v16 }
 0x2dc   :  { %v1932_v35 = vrot.slane %v1931_v42, 4  ;;  %v1860_v34 = vsub.f32 %v1800_v54, %v1853_v15  ;;  %v1867_v61 = vsub.f32 %v1803_v2, %v1853_v15 }
 0x2de   :  { %v1933_v60 = vadd.f32 %v1932_v35, %v1931_v42  ;;  %v1880_v7 = vmul.f32 1.442695, %v1860_v34  ;;  %v1894_v14 = vmul.f32 1.442695, %v1867_v61 }
 0x2df   :  { %3746 = vrot.lane.b32.xlu1 %v3730_v45, %s4139_s3  ;;  %3741 = vrot.lane.b32.xlu0 %v3730_v45, %s4140_s30 }
 0x2e0   :  { %3751 = vrot.lane.b32.xlu2 %v3730_v45, %s4145_s14  ;;  %v1934_v9 = vrot.slane %v1933_v60, 2  ;;  %4105 = vpow2.f32 %v1880_v7 }
 0x2e1   :  { %4107 = vpow2.f32 %v1894_v14 }
 0x2e2   :  { %v6055_v23 = vpop.permute.xlu2 %3576  ;;  %v1935_v31 = vadd.f32 %v1934_v9, %v1933_v60 }
 0x2e3   :  { %v7701_v22 = vunpack.i.h.bf16 %v6055_v23 }
 0x2e4   :  { %v1936_v29 = vrot.slane %v1935_v31, 1 }
 0x2e6   :  { %v6111_v17 = vpop.eup %4105  ;;  %v1937_v47 = vadd.f32 %v1936_v29, %v1935_v31 }
 0x2e7   :  { %3761 = vrot.lane.b32.xlu1 %v3730_v45, %s4143_s12  ;;  %3756 = vrot.lane.b32.xlu0 %v3730_v45, %s4148_s27  ;;  %v6117_v30 = vpop.eup %4107 }
 0x2e8   :  { %3766 = vrot.lane.b32.xlu2 %v3730_v45, %s4142_s11  ;;  %v1938_v54 = vadd.f32 %v6117_v30, %v6111_v17  ;;  %4109 = vrcp.f32 %v1937_v47 }
 0x2e9   :  { %v6070_v52 = vpop.permute.xlu1 %3556  ;;  %v6072_v56 = vpop.permute.xlu0 %3551 }
 0x2ea   :  { %v6074_v46 = vpop.permute.xlu2 %3591  ;;  %v1939_v45 = vrot.slane %v1938_v54, 4 }
 0x2eb   :  { %v3594_v3 = vunpack.i.h.bf16 %v6074_v46  ;;  %v3593_v40 = vunpack.i.l.bf16 %v6074_v46 }
 0x2ec   :  { %v1940_v48 = vadd.f32 %v1939_v45, %v1938_v54 }
 0x2ed   :  { %v2779_v39 = vsel %vm2772_vm11, %v3593_v40, %v3594_v3 }
 0x2ee   :  { %2825 = vmatpush.msrb.mxu1 %v2779_v39  ;;  %v4110_v4 = vpop.eup %4109  ;;  %v1941_v63 = vrot.slane %v1940_v48, 2 }
 0x2ef   :  { %3771 = vrot.lane.b32.xlu1 %v6085_v0, %s4141_s10  ;;  %3781 = vrot.lane.b32.xlu0 %v6085_v0, %s4147_s6  ;;  %v6155_v57 = vmul.f32 %v4110_v4, %v1959_v28 }
 0x2f0   :  { %3776 = vrot.lane.b32.xlu2 %v6085_v0, %s4144_s13  ;;  %v1942_v41 = vadd.f32 %v1941_v63, %v1940_v48 }
 0x2f1   :  { %v6093_v13 = vpop.permute.xlu1 %3571  ;;  %v6095_v18 = vpop.permute.xlu0 %3566  ;;  %v1980_v40 = vperm.slane %v6155_v57, 0 }
 0x2f2   :  { %v6097_v59 = vpop.permute.xlu2 %3596  ;;  %v1943_v42 = vrot.slane %v1942_v41, 1  ;;  %v7528_v44 = vunpack.i.h.bf16 %v6093_v13 }
 0x2f3   :  { %v6180_v15 = vmul.f32 %v6059_v1, %v1980_v40  ;;  %v3599_v9 = vunpack.i.h.bf16 %v6097_v59  ;;  %v3598_v31 = vunpack.i.l.bf16 %v6097_v59 }
 0x2f4   :  { %v1944_v14 = vadd.f32 %v1943_v42, %v1942_v41 }
 0x2f5   :  { %7678 = vst [vmem:[#allocation7_spill] sm:$0xff] %v6180_v15  ;;  %v6202_v47 = vpack.i.bf16 %v6180_v15, %v6122_v43  ;;  %v2726_v59 = vsel %vm2719_vm13, %v3598_v31, %v3599_v9 }
 0x2f6   :  { %4111 = vrcp.f32 %v1944_v14 }
 0x2f7   :  { %3786 = vrot.lane.b32.xlu1 %v6085_v0, %s4140_s30  ;;  %3796 = vrot.lane.b32.xlu0 %v6085_v0, %s4145_s14 }
 0x2f8   :  { %3791 = vrot.lane.b32.xlu2 %v6085_v0, %s4139_s3 }
 0x2f9   :  { %v6105_v36 = vpop.permute.xlu1 %3586  ;;  %v6107_v24 = vpop.permute.xlu0 %3581 }
 0x2fa   :  { %v6109_v37 = vpop.permute.xlu2 %3601 }
 0x2fb   :  { %v3603_v41 = vunpack.i.l.bf16 %v6109_v37 }
 0x2fc   :  { %v4112_v14 = vpop.eup %4111 }
 0x2ff   :  { %3801 = vrot.lane.b32.xlu1 %v6085_v0, %s4148_s27  ;;  %3811 = vrot.lane.b32.xlu0 %v6085_v0, %s4142_s11 }
 0x300   :  { %3806 = vrot.lane.b32.xlu2 %v6085_v0, %s4143_s12 }
 0x301   :  { %v6124_v38 = vpop.permute.xlu1 %3626  ;;  %v6126_v2 = vpop.permute.xlu0 %3621 }
 0x302   :  { %v6128_v32 = vpop.permute.xlu2 %3606 }
 0x307   :  { %3826 = vrot.lane.b32.xlu1 %v6085_v0, %s4150_s29  ;;  %3821 = vrot.lane.b32.xlu0 %v6134_v33, %s4149_s28 }
 0x308   :  { %3816 = vrot.lane.b32.xlu2 %v6085_v0, %s4149_s28 }
 0x309   :  { %v6142_v21 = vpop.permute.xlu1 %3641  ;;  %v6144_v26 = vpop.permute.xlu0 %3636 }
 0x30a   :  { %v6146_v49 = vpop.permute.xlu2 %3611 }
 0x30f   :  { %3846 = vrot.lane.b32.xlu1 %v6085_v0, %s4152_s1  ;;  %3836 = vrot.lane.b32.xlu0 %v6085_v0, %s4151_s0 }
 0x310   :  { %3831 = vrot.lane.b32.xlu2 %v6134_v33, %s4150_s29 }
 0x311   :  { %v6157_v10 = vpop.permute.xlu1 %3656  ;;  %v6159_v25 = vpop.permute.xlu0 %3651 }
 0x312   :  { %v7493_v58 = vunpack.i.h.bf16 %v6159_v25  ;;  %v7500_v51 = vunpack.i.l.bf16 %v6159_v25  ;;  %v6163_v6 = vpop.permute.xlu2 %3616  ;;  %v7698_v55 = vunpack.i.l.bf16 %v6157_v10 }
 0x313   :  { %v3619_v57 = vunpack.i.h.bf16 %v6163_v6 }
 0x314   :  { %v2359_v16 = vsel %vm2351_vm12, %v7500_v51, %v7493_v58 }
 0x315   :  { %2845 = vmatpush.msrb.mxu3 %v2359_v16 }
 0x317   :  { %3861 = vrot.lane.b32.xlu1 %v6134_v33, %s4153_s16  ;;  %3851 = vrot.lane.b32.xlu0 %v6134_v33, %s4152_s1 }
 0x318   :  { %3841 = vrot.lane.b32.xlu2 %v6134_v33, %s4151_s0 }
 0x319   :  { %v6182_v39 = vpop.permute.xlu1 %3671  ;;  %v6184_v35 = vpop.permute.xlu0 %3666 }
 0x31a   :  { %v3673_v34 = vunpack.i.l.bf16 %v6182_v39  ;;  %v3669_v61 = vunpack.i.h.bf16 %v6184_v35  ;;  %v7499_v60 = vunpack.i.l.bf16 %v6184_v35  ;;  %v6189_v7 = vpop.permute.xlu2 %3631  ;;  %v7496_v1 = vunpack.i.h.bf16 %v6182_v39 }
 0x31c   :  { %v2773_v29 = vsel %vm2772_vm11, %v3669_v61, %v3673_v34  ;;  %v2780_v54 = vsel %vm2772_vm11, %v3594_v3, %v7499_v60  ;;  %v2774_v46 = vsel %vm2772_vm11, %v3673_v34, %v7496_v1  ;;  %v1960_v61 = vperm.slane %v5931_v5, 6 }
 0x31d   :  { %2826 = vmatpush.msrb.mxu1 %v2773_v29  ;;  %2865 = vmatpush.msrb.mxu0 %v2780_v54 }
 0x31e   :  { %v1974_v5 = vmul.f32 %v4112_v14, %v1960_v61 }
 0x31f   :  { %3871 = vrot.lane.b32.xlu1 %v6202_v47, %s4141_s10  ;;  %3866 = vrot.lane.b32.xlu0 %v6085_v0, %s4146_s15 }
 0x320   :  { %3856 = vrot.lane.b32.xlu2 %v6085_v0, %s4153_s16  ;;  %2827 = vmatpush.msrb.mxu1 %v2726_v59  ;;  %v3604_v0 = vunpack.i.h.bf16 %v6109_v37  ;;  %v1981_v14 = vperm.slane %v1974_v5, 0 }
 0x321   :  { %2866 = vmatpush.msrb.mxu0 %v2774_v46  ;;  %v6214_v3 = vpop.permute.xlu1 %3681  ;;  %v6216_v45 = vpop.permute.xlu0 %3676 }
 0x322   :  { %7679 = vst [vmem:[#allocation8_spill] sm:$0xff] %v6214_v3  ;;  %v3683_v48 = vunpack.i.l.bf16 %v6214_v3  ;;  %v3679_v28 = vunpack.i.h.bf16 %v6216_v45  ;;  %v7495_v4 = vunpack.i.l.bf16 %v6216_v45  ;;  %v6221_v63 = vpop.permute.xlu2 %3646  ;;  %v7492_v16 = vunpack.i.h.bf16 %v6214_v3 }
 0x323   :  { %7680 = vst [vmem:[#allocation9_spill] sm:$0xff] %v6216_v45  ;;  %v2673_v37 = vsel %vm2666_vm14, %v3603_v41, %v3604_v0  ;;  %v3609_v41 = vunpack.i.h.bf16 %v6128_v32 }
 0x324   :  { %v2720_v42 = vsel %vm2719_vm13, %v3679_v28, %v3683_v48  ;;  %v2727_v34 = vsel %vm2719_vm13, %v3599_v9, %v7495_v4  ;;  %v2721_v9 = vsel %vm2719_vm13, %v3683_v48, %v7492_v16 }
 0x325   :  { %2828 = vmatpush.msrb.mxu1 %v2720_v42  ;;  %2867 = vmatpush.msrb.mxu0 %v2727_v34  ;;  %v3608_v42 = vunpack.i.l.bf16 %v6128_v32 }
 0x327   :  { %3886 = vrot.lane.b32.xlu1 %v6202_v47, %s4140_s30  ;;  %3881 = vrot.lane.b32.xlu0 %v6202_v47, %s4147_s6  ;;  %v2620_v32 = vsel %vm2613_vm15, %v3608_v42, %v3609_v41 }
 0x328   :  { %3876 = vrot.lane.b32.xlu2 %v6202_v47, %s4144_s13  ;;  %2829 = vmatpush.msrb.mxu1 %v2673_v37  ;;  %v6268_v37 = vmul.f32 %v6111_v17, %v1981_v14 }
 0x329   :  { %2868 = vmatpush.msrb.mxu0 %v2721_v9  ;;  %v6241_v31 = vpop.permute.xlu1 %3691  ;;  %v6243_v29 = vpop.permute.xlu0 %3686 }
 0x32a   :  { %7681 = vst [vmem:[#allocation10_spill] sm:$0xff] %v6241_v31  ;;  %v3693_v54 = vunpack.i.l.bf16 %v6241_v31  ;;  %v3689_v59 = vunpack.i.h.bf16 %v6243_v29  ;;  %v7491_v46 = vunpack.i.l.bf16 %v6243_v29  ;;  %v6248_v28 = vpop.permute.xlu2 %3661  ;;  %v7490_v48 = vunpack.i.h.bf16 %v6241_v31 }
 0x32b   :  { %7682 = vst [vmem:[#allocation11_spill] sm:$0xff] %v6243_v29  ;;  %v6290_v58 = vpack.i.bf16 %v5963_v27, %v6268_v37 }
 0x32c   :  { %v2667_v34 = vsel %vm2666_vm14, %v3689_v59, %v3693_v54  ;;  %v2674_v61 = vsel %vm2666_vm14, %v3604_v0, %v7491_v46  ;;  %v2668_v0 = vsel %vm2666_vm14, %v3693_v54, %v7490_v48  ;;  %v3613_v54 = vunpack.i.l.bf16 %v6146_v49 }
 0x32d   :  { %2830 = vmatpush.msrb.mxu1 %v2667_v34  ;;  %2869 = vmatpush.msrb.mxu0 %v2674_v61 }
 0x32f   :  { %3901 = vrot.lane.b32.xlu1 %v6202_v47, %s4148_s27  ;;  %3896 = vrot.lane.b32.xlu0 %v6202_v47, %s4145_s14 }
 0x330   :  { %3891 = vrot.lane.b32.xlu2 %v6202_v47, %s4139_s3  ;;  %2831 = vmatpush.msrb.mxu1 %v2620_v32  ;;  %v3614_v32 = vunpack.i.h.bf16 %v6146_v49 }
 0x331   :  { %2870 = vmatpush.msrb.mxu0 %v2668_v0  ;;  %v6270_v9 = vpop.permute.xlu1 %3701  ;;  %v6272_v5 = vpop.permute.xlu0 %3696 }
 0x332   :  { %7683 = vst [vmem:[#allocation12_spill] sm:$0xff] %v6270_v9  ;;  %v3703_v59 = vunpack.i.l.bf16 %v6270_v9  ;;  %v3699_v42 = vunpack.i.h.bf16 %v6272_v5  ;;  %v7494_v34 = vunpack.i.l.bf16 %v6272_v5  ;;  %v6277_v61 = vpop.permute.xlu2 %3736  ;;  %v7497_v48 = vunpack.i.h.bf16 %v6270_v9 }
 0x333   :  { %7684 = vst [vmem:[#allocation13_spill] sm:$0xff] %v6272_v5  ;;  %v7501_v17 = vunpack.i.h.bf16 %v6277_v61  ;;  %v7504_v0 = vunpack.i.l.bf16 %v6277_v61  ;;  %v7712_v5 = vunpack.i.l.bf16 %v6142_v21 }
 0x334   :  { %v2614_v46 = vsel %vm2613_vm15, %v3699_v42, %v3703_v59  ;;  %v2621_v16 = vsel %vm2613_vm15, %v3609_v41, %v7494_v34  ;;  %v6312_v41 = vmul.f32 %v6062_v50, %v1980_v40  ;;  %v1995_v42 = vmul.f32 %v6117_v30, %v1981_v14 }
 0x335   :  { %2832 = vmatpush.msrb.mxu1 %v2614_v46  ;;  %2871 = vmatpush.msrb.mxu0 %v2621_v16  ;;  %v6297_v49 = vsel %vm2142_vm0, %v7504_v0, %v7501_v17  ;;  %v2567_v46 = vsel %vm2560_vm1, %v3613_v54, %v3614_v32  ;;  %v2615_v16 = vsel %vm2613_vm15, %v3703_v59, %v7497_v48  ;;  %v3618_v50 = vunpack.i.l.bf16 %v6163_v6 }
 0x336   :  { %7685 = vst [vmem:[#allocation14_spill] sm:$0xff] %v6297_v49  ;;  %v6334_v48 = vpack.i.bf16 %v1995_v42, %v6312_v41 }
 0x337   :  { %3936 = vrot.lane.b32.xlu1 %v6290_v58, %s4147_s6  ;;  %3911 = vrot.lane.b32.xlu0 %v6202_v47, %s4142_s11  ;;  %7686 = vst [vmem:[#allocation15_spill] sm:$0xff] %v6312_v41 }
 0x338   :  { %3906 = vrot.lane.b32.xlu2 %v6202_v47, %s4143_s12  ;;  %2833 = vmatpush.msrb.mxu1 %v2567_v46 }
 0x339   :  { %2872 = vmatpush.msrb.mxu0 %v2615_v16  ;;  %v6315_v34 = vpop.permute.xlu1 %3711  ;;  %v6317_v4 = vpop.permute.xlu0 %3706 }
 0x33a   :  { %7687 = vst [vmem:[#allocation16_spill] sm:$0xff] %v6315_v34  ;;  %v3713_v54 = vunpack.i.l.bf16 %v6315_v34  ;;  %v3709_v47 = vunpack.i.h.bf16 %v6317_v4  ;;  %v7498_v46 = vunpack.i.l.bf16 %v6317_v4  ;;  %v6322_v1 = vpop.permute.xlu2 %3751  ;;  %v7502_v14 = vunpack.i.h.bf16 %v6315_v34 }
 0x33b   :  { %7688 = vst [vmem:[#allocation17_spill] sm:$0xff] %v6317_v4  ;;  %v7503_v40 = vunpack.i.h.bf16 %v6322_v1  ;;  %v7508_v30 = vunpack.i.l.bf16 %v6322_v1  ;;  %v7702_v34 = vunpack.i.h.bf16 %v6107_v24 }
 0x33c   :  { %v2561_v59 = vsel %vm2560_vm1, %v3709_v47, %v3713_v54  ;;  %v2568_v16 = vsel %vm2560_vm1, %v3614_v32, %v7498_v46  ;;  %v2514_v32 = vsel %vm1431_vm2, %v3618_v50, %v3619_v57  ;;  %v2562_v42 = vsel %vm2560_vm1, %v3713_v54, %v7502_v14 }
 0x33d   :  { %2834 = vmatpush.msrb.mxu1 %v2561_v59  ;;  %2873 = vmatpush.msrb.mxu0 %v2568_v16  ;;  %v6341_v6 = vsel %vm1248_vm5, %v7508_v30, %v7503_v40  ;;  %v7510_v14 = vunpack.i.h.bf16 %v6248_v28  ;;  %v7511_v40 = vunpack.i.l.bf16 %v6248_v28 }
 0x33e   :  { %7689 = vst [vmem:[#allocation18_spill] sm:$0xff] %v6341_v6 }
 0x33f   :  { %3941 = vrot.lane.b32.xlu1 %v6334_v48, %s4147_s6  ;;  %3926 = vrot.lane.b32.xlu0 %v6290_v58, %s4144_s13 }
 0x340   :  { %3916 = vrot.lane.b32.xlu2 %v6290_v58, %s4141_s10  ;;  %2835 = vmatpush.msrb.mxu1 %v2514_v32 }
 0x341   :  { %2874 = vmatpush.msrb.mxu0 %v2562_v42  ;;  %v6353_v47 = vpop.permute.xlu1 %3721  ;;  %v6355_v59 = vpop.permute.xlu0 %3716 }
 0x342   :  { %7690 = vst [vmem:[#allocation19_spill] sm:$0xff] %v6353_v47  ;;  %v3723_v16 = vunpack.i.l.bf16 %v6353_v47  ;;  %v3719_v46 = vunpack.i.h.bf16 %v6355_v59  ;;  %v7505_v60 = vunpack.i.l.bf16 %v6355_v59  ;;  %v6360_v50 = vpop.permute.xlu2 %3766  ;;  %v7507_v51 = vunpack.i.h.bf16 %v6353_v47 }
 0x343   :  { %7691 = vst [vmem:[#allocation20_spill] sm:$0xff] %v6355_v59  ;;  %v7506_v32 = vunpack.i.h.bf16 %v6360_v50  ;;  %v3768_v17 = vunpack.i.l.bf16 %v6360_v50  ;;  %v7531_v59 = vunpack.i.h.bf16 %v6095_v18 }
 0x344   :  { %v2508_v54 = vsel %vm1431_vm2, %v3719_v46, %v3723_v16  ;;  %v2515_v42 = vsel %vm1431_vm2, %v3619_v57, %v7505_v60  ;;  %v2509_v46 = vsel %vm1431_vm2, %v3723_v16, %v7507_v51  ;;  %v2463_v16 = vsel %vm1370_vm3, %v7511_v40, %v7510_v14 }
 0x345   :  { %2836 = vmatpush.msrb.mxu1 %v2508_v54  ;;  %2875 = vmatpush.msrb.mxu0 %v2515_v42  ;;  %v6374_v0 = vsel %vm1370_vm3, %v3768_v17, %v7506_v32  ;;  %v7694_v42 = vunpack.i.h.bf16 %v6105_v36 }
 0x346   :  { %7692 = vst [vmem:[#allocation21_spill] sm:$0xff] %v6374_v0 }
 0x347   :  { %3966 = vrot.lane.b32.xlu1 %v6290_v58, %s4145_s14  ;;  %3931 = vrot.lane.b32.xlu0 %v6334_v48, %s4144_s13  ;;  %v2457_v43 = vsel %vm1370_vm3, %v7694_v42, %v3768_v17 }
 0x348   :  { %3921 = vrot.lane.b32.xlu2 %v6334_v48, %s4141_s10  ;;  %2876 = vmatpush.msrb.mxu0 %v2509_v46 }
 0x349   :  { %v6388_v60 = vpop.permute.xlu1 %3731  ;;  %v6390_v32 = vpop.permute.xlu0 %3726 }
 0x34a   :  { %v7514_v51 = vunpack.i.h.bf16 %v6388_v60  ;;  %v7516_v46 = vunpack.i.l.bf16 %v6388_v60  ;;  %v7513_v30 = vunpack.i.h.bf16 %v6390_v32  ;;  %v7515_v54 = vunpack.i.l.bf16 %v6390_v32  ;;  %v6401_v57 = vpop.permute.xlu2 %3776  ;;  %2877 = vmatpush.msrb.mxu0 %v2463_v16 }
 0x34b   :  { %7693 = vst [vmem:[#allocation22_spill] sm:$0xff] %v6401_v57  ;;  %v7697_v16 = vunpack.i.h.bf16 %v6157_v10 }
 0x34c   :  { %2878 = vmatpush.msrb.mxu0 %v2457_v43  ;;  %v6411_v14 = vsel %vm1065_vm9, %v7516_v46, %v7514_v51  ;;  %v6418_v40 = vsel %vm1004_vm10, %v7515_v54, %v7513_v30 }
 0x34d   :  { %7695 = vst [vmem:[#allocation23_spill] sm:$0xff] %v6411_v14  ;;  %v2411_v43 = vsel %vm1309_vm4, %v7698_v55, %v7697_v16 }
 0x34e   :  { %7696 = vst [vmem:[#allocation24_spill] sm:$0xff] %v6418_v40  ;;  %2879 = vmatpush.msrb.mxu0 %v2411_v43 }
 0x34f   :  { %3971 = vrot.lane.b32.xlu1 %v6334_v48, %s4145_s14  ;;  %3956 = vrot.lane.b32.xlu0 %v6290_v58, %s4139_s3 }
 0x350   :  { %3946 = vrot.lane.b32.xlu2 %v6290_v58, %s4140_s30 }
 0x351   :  { %v6431_v17 = vpop.permute.xlu1 %3746  ;;  %v6433_v42 = vpop.permute.xlu0 %3741 }
 0x352   :  { %v7519_v30 = vunpack.i.h.bf16 %v6431_v17  ;;  %v3748_v51 = vunpack.i.l.bf16 %v6431_v17  ;;  %v7520_v55 = vunpack.i.h.bf16 %v6433_v42  ;;  %v3743_v16 = vunpack.i.l.bf16 %v6433_v42  ;;  %v6439_v43 = vpop.permute.xlu2 %3791 }
 0x354   :  { %v6444_v54 = vsel %vm1187_vm7, %v3748_v51, %v7519_v30  ;;  %v6449_v46 = vsel %vm1126_vm8, %v3743_v16, %v7520_v55 }
 0x355   :  { %7699 = vst [vmem:[#allocation25_spill] sm:$0xff] %v6444_v54 }
 0x356   :  { %7700 = vst [vmem:[#allocation26_spill] sm:$0xff] %v6449_v46 }
 0x357   :  { %4001 = vrot.lane.b32.xlu1 %v6290_v58, %s4142_s11  ;;  %3961 = vrot.lane.b32.xlu0 %v6334_v48, %s4139_s3 }
 0x358   :  { %3951 = vrot.lane.b32.xlu2 %v6334_v48, %s4140_s30 }
 0x359   :  { %v6459_v30 = vpop.permute.xlu1 %3761  ;;  %v6461_v40 = vpop.permute.xlu0 %3756 }
 0x35a   :  { %v3763_v14 = vunpack.i.l.bf16 %v6459_v30  ;;  %v7526_v0 = vunpack.i.h.bf16 %v6461_v40  ;;  %v3758_v49 = vunpack.i.l.bf16 %v6461_v40  ;;  %v6467_v47 = vpop.permute.xlu2 %3806  ;;  %v7704_v54 = vunpack.i.h.bf16 %v6459_v30 }
 0x35c   :  { %v2353_v46 = vsel %vm2351_vm12, %v7701_v22, %v3758_v49  ;;  %v2405_v55 = vsel %vm1309_vm4, %v7702_v34, %v3763_v14  ;;  %v6480_v4 = vsel %vm2351_vm12, %v3758_v49, %v7526_v0  ;;  %v6485_v9 = vsel %vm1309_vm4, %v3763_v14, %v7704_v54 }
 0x35d   :  { %7703 = vst [vmem:[#allocation27_spill] sm:$0xff] %v6480_v4  ;;  %2846 = vmatpush.msrb.mxu3 %v2353_v46  ;;  %2880 = vmatpush.msrb.mxu0 %v2405_v55  ;;  %v7706_v34 = vunpack.i.h.bf16 %v6221_v63  ;;  %v7707_v49 = vunpack.i.l.bf16 %v6221_v63  ;;  %v7710_v55 = vunpack.i.l.bf16 %v6322_v1  ;;  %v7535_v22 = vunpack.i.l.bf16 %v6189_v7 }
 0x35e   :  { %7705 = vst [vmem:[#allocation28_spill] sm:$0xff] %v6485_v9 }
 0x35f   :  { %4006 = vrot.lane.b32.xlu1 %v6334_v48, %s4142_s11  ;;  %3991 = vrot.lane.b32.xlu0 %v6290_v58, %s4143_s12  ;;  %v2306_v14 = vsel %vm1248_vm5, %v7707_v49, %v7706_v34  ;;  %v2300_v0 = vsel %vm1248_vm5, %v7528_v44, %v7710_v55  ;;  %v2248_v55 = vsel %vm1187_vm7, %v7531_v59, %v3748_v51  ;;  %v7532_v44 = vunpack.i.h.bf16 %v6049_v20 }
 0x360   :  { %3976 = vrot.lane.b32.xlu2 %v6290_v58, %s4148_s27  ;;  %2847 = vmatpush.msrb.mxu3 %v2306_v14  ;;  %v7711_v14 = vunpack.i.h.bf16 %v6142_v21  ;;  %v7533_v58 = vunpack.i.h.bf16 %v6189_v7  ;;  %v7713_v51 = vunpack.i.h.bf16 %v6144_v26 }
 0x361   :  { %v6501_v54 = vpop.permute.xlu1 %3771  ;;  %v6503_v46 = vpop.permute.xlu0 %3781 }
 0x362   :  { %7708 = vst [vmem:[#allocation29_spill] sm:$0xff] %v6501_v54  ;;  %v6512_v9 = vpop.permute.xlu2 %3816  ;;  %2848 = vmatpush.msrb.mxu3 %v2300_v0  ;;  %v2254_v6 = vsel %vm1187_vm7, %v7712_v5, %v7711_v14  ;;  %v7714_v5 = vunpack.i.l.bf16 %v6144_v26 }
 0x363   :  { %7709 = vst [vmem:[#allocation30_spill] sm:$0xff] %v6503_v46  ;;  %v7529_v34 = vunpack.i.h.bf16 %v6512_v9  ;;  %v7530_v49 = vunpack.i.l.bf16 %v6512_v9 }
 0x364   :  { %2849 = vmatpush.msrb.mxu3 %v2254_v6  ;;  %v2202_v6 = vsel %vm1126_vm8, %v7714_v5, %v7713_v51  ;;  %v2150_v5 = vsel %vm2142_vm0, %v7535_v22, %v7533_v58  ;;  %v7538_v51 = vunpack.i.h.bf16 %v6042_v12 }
 0x365   :  { %v2782_v0 = vsel %vm2772_vm11, %v7530_v49, %v7529_v34  ;;  %v7534_v49 = vunpack.i.h.bf16 %v6070_v52 }
 0x366   :  { %2850 = vmatpush.msrb.mxu3 %v2248_v55  ;;  %2945 = vmatpush.msra.mxu0 %v2782_v0  ;;  %v2196_v0 = vsel %vm1126_vm8, %v7532_v44, %v3743_v16  ;;  %v7537_v44 = vunpack.i.h.bf16 %v6072_v56 }
 0x367   :  { %4011 = vrot.lane.b32.xlu1 %v6334_v48, %s4149_s28  ;;  %3996 = vrot.lane.b32.xlu0 %v6334_v48, %s4143_s12 }
 0x368   :  { %3981 = vrot.lane.b32.xlu2 %v6334_v48, %s4148_s27  ;;  %2851 = vmatpush.msrb.mxu3 %v2202_v6  ;;  %v7718_v6 = vunpack.i.l.bf16 %v6277_v61 }
 0x369   :  { %v6544_v14 = vpop.permute.xlu1 %3786  ;;  %v6546_v55 = vpop.permute.xlu0 %3796 }
 0x36a   :  { %7715 = vst [vmem:[#allocation31_spill] sm:$0xff] %v6544_v14  ;;  %v6551_v34 = vpop.permute.xlu2 %3831  ;;  %2852 = vmatpush.msrb.mxu3 %v2196_v0  ;;  %v2144_v16 = vsel %vm2142_vm0, %v7534_v49, %v7718_v6  ;;  %v6568_v0 = vpack.i.bf16 %v6268_v37, %v6180_v15  ;;  %v7720_v6 = vunpack.i.l.bf16 %v6124_v38  ;;  %v7722_v49 = vunpack.i.l.bf16 %v6388_v60 }
 0x36b   :  { %7716 = vst [vmem:[#allocation32_spill] sm:$0xff] %v6546_v55  ;;  %v7548_v31 = vunpack.i.h.bf16 %v6551_v34 }
 0x36c   :  { %7717 = vst [vmem:[#allocation33_spill] sm:$0xff] %v6551_v34  ;;  %2853 = vmatpush.msrb.mxu3 %v2150_v5  ;;  %v7719_v5 = vunpack.i.h.bf16 %v6124_v38  ;;  %v2091_v22 = vsel %vm1065_vm9, %v7537_v44, %v7722_v49 }
 0x36e   :  { %2854 = vmatpush.msrb.mxu3 %v2144_v16  ;;  %v2097_v37 = vsel %vm1065_vm9, %v7720_v6, %v7719_v5  ;;  %v7724_v5 = vunpack.i.h.bf16 %v6126_v2 }
 0x36f   :  { %4026 = vrot.lane.b32.xlu1 %v6568_v0, %s4150_s29  ;;  %4016 = vrot.lane.b32.xlu0 %v6568_v0, %s4149_s28 }
 0x370   :  { %3986 = vrot.lane.b32.xlu2 %v6134_v33, %s4146_s15  ;;  %2855 = vmatpush.msrb.mxu3 %v2097_v37  ;;  %v7725_v33 = vunpack.i.l.bf16 %v6126_v2  ;;  %v7726_v37 = vunpack.i.l.bf16 %v6390_v32 }
 0x371   :  { %v6584_v16 = vpop.permute.xlu1 %3801  ;;  %v6586_v58 = vpop.permute.xlu0 %3811 }
 0x372   :  { %7721 = vst [vmem:[#allocation34_spill] sm:$0xff] %v6584_v16  ;;  %v6593_v59 = vpop.permute.xlu2 %3841  ;;  %2856 = vmatpush.msrb.mxu3 %v2091_v22  ;;  %v2045_v6 = vsel %vm1004_vm10, %v7725_v33, %v7724_v5  ;;  %v2039_v15 = vsel %vm1004_vm10, %v7538_v51, %v7726_v37  ;;  %v7541_v49 = vunpack.i.h.bf16 %v6584_v16  ;;  %v7543_v44 = vunpack.i.l.bf16 %v6584_v16 }
 0x373   :  { %7723 = vst [vmem:[#allocation35_spill] sm:$0xff] %v6593_v59 }
 0x374   :  { %2857 = vmatpush.msrb.mxu3 %v2045_v6  ;;  %v2361_v37 = vsel %vm2351_vm12, %v7543_v44, %v7541_v49 }
 0x376   :  { %2858 = vmatpush.msrb.mxu3 %v2039_v15 }
 0x377   :  { %4041 = vrot.lane.b32.xlu1 %v6334_v48, %s4152_s1  ;;  %4031 = vrot.lane.b32.xlu0 %v6334_v48, %s4151_s0 }
 0x378   :  { %4021 = vrot.lane.b32.xlu2 %v6334_v48, %s4150_s29  ;;  %2859 = vmatpush.msrb.mxu3 %v5957_v11 }
 0x379   :  { %v6615_v22 = vpop.permute.xlu1 %3826  ;;  %v6617_v5 = vpop.permute.xlu0 %3821 }
 0x37a   :  { %v7542_v33 = vunpack.i.h.bf16 %v6617_v5  ;;  %v7544_v6 = vunpack.i.l.bf16 %v6617_v5  ;;  %v6621_v15 = vpop.permute.xlu2 %3856  ;;  %2860 = vmatpush.msrb.mxu3 %v5940_v8  ;;  %v7546_v11 = vunpack.i.h.bf16 %v6615_v22  ;;  %v7547_v51 = vunpack.i.l.bf16 %v6615_v22 }
 0x37b   :  { %7727 = vst [vmem:[#allocation36_spill] sm:$0xff] %v6621_v15  ;;  %v7549_v8 = vunpack.i.l.bf16 %v6551_v34 }
 0x37c   :  { %2925 = vmatpush.msra.mxu3 %v2361_v37  ;;  %v2776_v41 = vsel %vm2772_vm11, %v7544_v6, %v7542_v33  ;;  %v2729_v37 = vsel %vm2719_vm13, %v7547_v51, %v7546_v11  ;;  %v7555_v11 = vunpack.i.h.bf16 %v6593_v59 }
 0x37d   :  { %2946 = vmatpush.msra.mxu0 %v2776_v41  ;;  %v2723_v41 = vsel %vm2719_vm13, %v7549_v8, %v7548_v31 }
 0x37f   :  { %4051 = vrot.lane.b32.xlu1 %v6334_v48, %s4153_s16  ;;  %4046 = vrot.lane.b32.xlu0 %v6568_v0, %s4152_s1 }
 0x380   :  { %4036 = vrot.lane.b32.xlu2 %v6568_v0, %s4151_s0  ;;  %2947 = vmatpush.msra.mxu0 %v2729_v37  ;;  %v7556_v37 = vunpack.i.l.bf16 %v6593_v59 }
 0x381   :  { %v6649_v49 = vpop.permute.xlu1 %3846  ;;  %v6651_v33 = vpop.permute.xlu0 %3836 }
 0x382   :  { %7728 = vst [vmem:[#allocation37_spill] sm:$0xff] %v6649_v49  ;;  %v7551_v44 = vunpack.i.h.bf16 %v6651_v33  ;;  %v7552_v6 = vunpack.i.l.bf16 %v6651_v33  ;;  %v6660_v29 = vpop.permute.xlu2 %3876  ;;  %2948 = vmatpush.msra.mxu0 %v2723_v41  ;;  %v7561_v8 = vunpack.i.h.bf16 %v6649_v49  ;;  %v7562_v3 = vunpack.i.l.bf16 %v6649_v49 }
 0x383   :  { %7729 = vst [vmem:[#allocation38_spill] sm:$0xff] %v6651_v33  ;;  %v7553_v51 = vunpack.i.h.bf16 %v6660_v29  ;;  %v7554_v4 = vunpack.i.l.bf16 %v6660_v29 }
 0x384   :  { %v2676_v31 = vsel %vm2666_vm14, %v7552_v6, %v7551_v44  ;;  %v2670_v44 = vsel %vm2666_vm14, %v7556_v37, %v7555_v11 }
 0x385   :  { %2949 = vmatpush.msra.mxu0 %v2676_v31  ;;  %v6678_v41 = vsel %vm1065_vm9, %v7554_v4, %v7553_v51  ;;  %v7568_v51 = vunpack.i.h.bf16 %v6621_v15  ;;  %v7569_v4 = vunpack.i.l.bf16 %v6621_v15 }
 0x386   :  { %7730 = vst [vmem:[#allocation39_spill] sm:$0xff] %v6678_v41 }
 0x387   :  { %4066 = vrot.lane.b32.xlu1 %v6568_v0, %s4146_s15  ;;  %4061 = vrot.lane.b32.xlu0 %v6334_v48, %s4146_s15  ;;  %v2623_v48 = vsel %vm2613_vm15, %v7562_v3, %v7561_v8 }
 0x388   :  { %4056 = vrot.lane.b32.xlu2 %v6568_v0, %s4153_s16  ;;  %2950 = vmatpush.msra.mxu0 %v2670_v44 }
 0x389   :  { %v6691_v31 = vpop.permute.xlu1 %3861  ;;  %v6693_v6 = vpop.permute.xlu0 %3851 }
 0x38a   :  { %7731 = vst [vmem:[#allocation40_spill] sm:$0xff] %v6691_v31  ;;  %v7565_v11 = vunpack.i.h.bf16 %v6693_v6  ;;  %v7566_v37 = vunpack.i.l.bf16 %v6693_v6  ;;  %v6704_v0 = vpop.permute.xlu2 %3891  ;;  %2951 = vmatpush.msra.mxu0 %v2623_v48  ;;  %v7572_v59 = vunpack.i.h.bf16 %v6691_v31  ;;  %v7573_v49 = vunpack.i.l.bf16 %v6691_v31 }
 0x38b   :  { %7732 = vst [vmem:[#allocation41_spill] sm:$0xff] %v6693_v6  ;;  %v7567_v44 = vunpack.i.h.bf16 %v6704_v0  ;;  %v3893_v41 = vunpack.i.l.bf16 %v6704_v0  ;;  %v2570_v48 = vsel %vm2560_vm1, %v7569_v4, %v7568_v51 }
 0x38c   :  { %v2617_v8 = vsel %vm2613_vm15, %v7566_v37, %v7565_v11  ;;  %v2564_v6 = vsel %vm2560_vm1, %v7573_v49, %v7572_v59  ;;  %v7737_v49 = vunpack.i.h.bf16 %v6459_v30 }
 0x38d   :  { %2952 = vmatpush.msra.mxu0 %v2617_v8  ;;  %v6718_v3 = vsel %vm1187_vm7, %v3893_v41, %v7567_v44 }
 0x38e   :  { %7733 = vst [vmem:[#allocation42_spill] sm:$0xff] %v6718_v3 }
 0x38f   :  { %2953 = vmatpush.msra.mxu0 %v2570_v48 }
 0x391   :  { %v6730_v11 = vpop.permute.xlu1 %3871  ;;  %v6732_v8 = vpop.permute.xlu0 %3866  ;;  %2954 = vmatpush.msra.mxu0 %v2564_v6 }
 0x392   :  { %7734 = vst [vmem:[#allocation43_spill] sm:$0xff] %v6732_v8  ;;  %v3874_v37 = vunpack.i.h.bf16 %v6730_v11  ;;  %v7584_v44 = vunpack.i.l.bf16 %v6730_v11  ;;  %v7582_v3 = vunpack.i.h.bf16 %v6732_v8  ;;  %v7583_v51 = vunpack.i.l.bf16 %v6732_v8  ;;  %v6738_v48 = vpop.permute.xlu2 %3906 }
 0x393   :  { %7735 = vst [vmem:[#allocation44_spill] sm:$0xff] %v6738_v48  ;;  %v7585_v4 = vunpack.i.h.bf16 %v6738_v48  ;;  %v3908_v31 = vunpack.i.l.bf16 %v6738_v48  ;;  %v7740_v48 = vunpack.i.h.bf16 %v6461_v40 }
 0x394   :  { %v2517_v6 = vsel %vm1431_vm2, %v7583_v51, %v7582_v3  ;;  %v6750_v59 = vsel %vm1004_vm10, %v7584_v44, %v3874_v37  ;;  %v7590_v44 = vunpack.i.h.bf16 %v6546_v55 }
 0x395   :  { %7736 = vst [vmem:[#allocation45_spill] sm:$0xff] %v6750_v59  ;;  %2955 = vmatpush.msra.mxu0 %v2517_v6  ;;  %v6755_v15 = vsel %vm1309_vm4, %v7737_v49, %v3908_v31  ;;  %v6760_v33 = vsel %vm1309_vm4, %v3908_v31, %v7585_v4  ;;  %v7591_v31 = vunpack.i.l.bf16 %v6546_v55  ;;  %v7604_v55 = vunpack.i.h.bf16 %v6401_v57 }
 0x396   :  { %7738 = vst [vmem:[#allocation46_spill] sm:$0xff] %v6760_v33  ;;  %v6797_v33 = vld [vmem:[%s7460_s7] sm:$0xff] }
 0x397   :  { %v2308_v16 = vsel %vm1248_vm5, %v7591_v31, %v7590_v44  ;;  %2861 = vmatmul.f32.vlgmr.msrb.gmra.mxu3 %v6797_v33  ;;  %v7743_v44 = vunpack.i.l.bf16 %v6439_v43 }
 0x399   :  { %v6762_v34 = vpop.permute.xlu1 %3886  ;;  %v6764_v8 = vpop.permute.xlu0 %3881 }
 0x39a   :  { %v6766_v3 = vpop.permute.xlu2 %3916  ;;  %v7600_v53 = vunpack.i.l.bf16 %v6762_v34 }
 0x39b   :  { %v3918_v51 = vunpack.i.l.bf16 %v6766_v3 }
 0x39d   :  { %v6770_v6 = vsel %vm1004_vm10, %v3874_v37, %v3918_v51  ;;  %v7596_v37 = vunpack.i.h.bf16 %v6439_v43 }
 0x39e   :  { %7739 = vst [vmem:[#allocation47_spill] sm:$0xff] %v6770_v6 }
 0x39f   :  { %v2256_v31 = vsel %vm1187_vm7, %v7743_v44, %v7596_v37  ;;  %v7605_v37 = vunpack.i.l.bf16 %v6401_v57 }
 0x3a1   :  { %v6772_v30 = vpop.permute.xlu1 %3901  ;;  %v6774_v49 = vpop.permute.xlu0 %3896 }
 0x3a2   :  { %v7589_v4 = vunpack.i.l.bf16 %v6772_v30  ;;  %v6779_v59 = vpop.permute.xlu2 %3921  ;;  %v7741_v40 = vunpack.i.l.bf16 %v6774_v49 }
 0x3a4   :  { %v2355_v51 = vsel %vm2351_vm12, %v7740_v48, %v7589_v4  ;;  %v7742_v48 = vunpack.i.h.bf16 %v6322_v1 }
 0x3a5   :  { %2926 = vmatpush.msra.mxu3 %v2355_v51 }
 0x3a6   :  { %v2302_v4 = vsel %vm1248_vm5, %v7742_v48, %v7741_v40 }
 0x3a7   :  { %2927 = vmatpush.msra.mxu3 %v2308_v16  ;;  %v7599_v16 = vunpack.i.h.bf16 %v6544_v14 }
 0x3a9   :  { %v6805_v51 = vpop.permute.xlu1 %3936  ;;  %v6807_v6 = vpop.permute.xlu0 %3911  ;;  %2928 = vmatpush.msra.mxu3 %v2302_v4  ;;  %v7744_v4 = vunpack.i.h.bf16 %v6431_v17 }
 0x3aa   :  { %v7597_v1 = vunpack.i.h.bf16 %v6807_v6  ;;  %v7598_v40 = vunpack.i.l.bf16 %v6807_v6  ;;  %v6818_v48 = vpop.permute.xlu2 %3946 }
 0x3ab   :  { %2929 = vmatpush.msra.mxu3 %v2256_v31  ;;  %v2250_v45 = vsel %vm1187_vm7, %v7744_v4, %v3893_v41  ;;  %v7746_v31 = vunpack.i.l.bf16 %v6544_v14  ;;  %v7603_v41 = vunpack.i.l.bf16 %v6764_v8  ;;  %v7747_v4 = vunpack.i.h.bf16 %v6433_v42 }
 0x3ac   :  { %v6829_v44 = vsel %vm1370_vm3, %v7598_v40, %v7597_v1  ;;  %v7750_v42 = vunpack.i.h.bf16 %v6277_v61  ;;  %v3588_v14 = vunpack.i.l.bf16 %v6105_v36 }
 0x3ad   :  { %7745 = vst [vmem:[#allocation48_spill] sm:$0xff] %v6829_v44  ;;  %2930 = vmatpush.msra.mxu3 %v2250_v45  ;;  %v2204_v17 = vsel %vm1126_vm8, %v7746_v31, %v7599_v16  ;;  %v2198_v1 = vsel %vm1126_vm8, %v7747_v4, %v7600_v53  ;;  %v7748_v31 = vunpack.i.h.bf16 %v6503_v46  ;;  %v7609_v53 = vunpack.i.l.bf16 %v6501_v54 }
 0x3ae   :  { %v2146_v4 = vsel %vm2142_vm0, %v7750_v42, %v7603_v41 }
 0x3af   :  { %2931 = vmatpush.msra.mxu3 %v2204_v17  ;;  %v7749_v17 = vunpack.i.l.bf16 %v6503_v46  ;;  %v2099_v46 = vsel %vm1065_vm9, %v7605_v37, %v7604_v55 }
 0x3b1   :  { %v6844_v45 = vpop.permute.xlu1 %3941  ;;  %v6846_v40 = vpop.permute.xlu0 %3926  ;;  %2932 = vmatpush.msra.mxu3 %v2198_v1  ;;  %v2152_v16 = vsel %vm2142_vm0, %v7749_v17, %v7748_v31  ;;  %v7608_v1 = vunpack.i.h.bf16 %v6501_v54  ;;  %v7752_v31 = vunpack.i.h.bf16 %v6388_v60  ;;  %v7753_v60 = vunpack.i.l.bf16 %v6730_v11 }
 0x3b2   :  { %v6850_v44 = vpop.permute.xlu2 %3951  ;;  %v3573_v11 = vunpack.i.l.bf16 %v6093_v13  ;;  %v3949_v54 = vunpack.i.h.bf16 %v6818_v48 }
 0x3b3   :  { %2933 = vmatpush.msra.mxu3 %v2152_v16  ;;  %v7751_v16 = vunpack.i.l.bf16 %v6660_v29  ;;  %v2047_v41 = vsel %vm1004_vm10, %v7609_v53, %v7608_v1  ;;  %v6896_v1 = vld [vmem:[%s7460_s7 + $0x8] sm:$0xff]  ;;  %v7760_v53 = vunpack.i.l.bf16 %v6142_v21 }
 0x3b4   :  { %2881 = vmatmul.f32.vlgmr.msrb.gmra.mxu0 %v6896_v1 }
 0x3b5   :  { %2934 = vmatpush.msra.mxu3 %v2146_v4  ;;  %v2093_v61 = vsel %vm1065_vm9, %v7752_v31, %v7751_v16  ;;  %v7754_v16 = vunpack.i.h.bf16 %v6390_v32  ;;  %v7756_v32 = vunpack.i.h.bf16 %v6055_v23 }
 0x3b7   :  { %2935 = vmatpush.msra.mxu3 %v2099_v46  ;;  %v3578_v46 = vunpack.i.l.bf16 %v6055_v23  ;;  %v2041_v31 = vsel %vm1004_vm10, %v7754_v16, %v7753_v60  ;;  %v7758_v16 = vunpack.i.l.bf16 %v6221_v63 }
 0x3b9   :  { %v6874_v17 = vpop.permute.xlu1 %3966  ;;  %v6876_v42 = vpop.permute.xlu0 %3931  ;;  %2936 = vmatpush.msra.mxu3 %v2093_v61  ;;  %v7755_v61 = vunpack.i.l.bf16 %v6159_v25 }
 0x3ba   :  { %v3977_v4 = vpop.permute.xlu2 %3976  ;;  %v3969_v37 = vunpack.i.h.bf16 %v6874_v17 }
 0x3bb   :  { %v3979_v55 = vunpack.i.h.bf16 %v3977_v4  ;;  %2937 = vmatpush.msra.mxu3 %v2047_v41  ;;  %v2352_v41 = vsel %vm2351_vm12, %v3578_v46, %v7756_v32 }
 0x3bd   :  { %v2358_v57 = vsel %vm2351_vm12, %v3979_v55, %v7755_v61  ;;  %2938 = vmatpush.msra.mxu3 %v2041_v31  ;;  %v2305_v31 = vsel %vm1248_vm5, %v3969_v37, %v7758_v16  ;;  %v7614_v16 = vunpack.i.h.bf16 %v6772_v30 }
 0x3be   :  { %2805 = vmatpush.msrb.mxu2 %v2358_v57  ;;  %v3568_v57 = vunpack.i.l.bf16 %v6095_v18 }
 0x3bf   :  { %2939 = vmatpush.msra.mxu3 %v6065_v62  ;;  %v3978_v62 = vunpack.i.l.bf16 %v3977_v4 }
 0x3c0   :  { %2806 = vmatpush.msrb.mxu2 %v2352_v41  ;;  %v7759_v41 = vunpack.i.h.bf16 %v6093_v13 }
 0x3c1   :  { %v6904_v60 = vpop.permute.xlu1 %3971  ;;  %v6906_v55 = vpop.permute.xlu0 %3956  ;;  %2940 = vmatpush.msra.mxu3 %v6040_v19  ;;  %v3563_v19 = vunpack.i.l.bf16 %v6049_v20 }
 0x3c2   :  { %7757 = vst [vmem:[#allocation49_spill] sm:$0xff] %v6904_v60  ;;  %v3959_v61 = vunpack.i.h.bf16 %v6906_v55  ;;  %v6914_v23 = vpop.permute.xlu2 %3981  ;;  %2807 = vmatpush.msrb.mxu2 %v2305_v31  ;;  %2941 = vmatmul.f32.vlgmr.msra.gmra.mxu3 %v6797_v33  ;;  %v2299_v37 = vsel %vm1248_vm5, %v3573_v11, %v7759_v41  ;;  %v3974_v4 = vunpack.i.h.bf16 %v6904_v60  ;;  %v3968_v11 = vunpack.i.l.bf16 %v6874_v17 }
 0x3c3   :  { %v3984_v46 = vunpack.i.h.bf16 %v6914_v23  ;;  %v7615_v32 = vunpack.i.l.bf16 %v6914_v23  ;;  %v7761_v41 = vunpack.i.h.bf16 %v6095_v18  ;;  %v3939_v18 = vunpack.i.h.bf16 %v6805_v51 }
 0x3c4   :  { %2808 = vmatpush.msrb.mxu2 %v2299_v37  ;;  %v2253_v31 = vsel %vm1187_vm7, %v3959_v61, %v7760_v53  ;;  %v2357_v53 = vsel %vm2351_vm12, %v7614_v16, %v3978_v62  ;;  %v3558_v61 = vunpack.i.l.bf16 %v6070_v52  ;;  %v7763_v62 = vunpack.i.l.bf16 %v6144_v26 }
 0x3c5   :  { %v2363_v13 = vsel %vm2351_vm12, %v7615_v32, %v3984_v46  ;;  %v2247_v37 = vsel %vm1187_vm7, %v3568_v57, %v7761_v41  ;;  %v7762_v46 = vunpack.i.h.bf16 %v6049_v20  ;;  %v7764_v16 = vunpack.i.l.bf16 %v6904_v60 }
 0x3c6   :  { %2809 = vmatpush.msrb.mxu2 %v2253_v31  ;;  %3005 = vmatpush.msrb.mxu3 %v2363_v13  ;;  %v2201_v41 = vsel %vm1126_vm8, %v3949_v54, %v7763_v62  ;;  %v3958_v20 = vunpack.i.l.bf16 %v6906_v55  ;;  %v3929_v17 = vunpack.i.h.bf16 %v6846_v40  ;;  %v7768_v62 = vunpack.i.l.bf16 %v6189_v7 }
 0x3c7   :  { %v2195_v31 = vsel %vm1126_vm8, %v3563_v19, %v7762_v46  ;;  %v7766_v46 = vunpack.i.l.bf16 %v6248_v28 }
 0x3c8   :  { %2810 = vmatpush.msrb.mxu2 %v2247_v37  ;;  %3006 = vmatpush.msrb.mxu3 %v2357_v53  ;;  %v2310_v37 = vsel %vm1248_vm5, %v7764_v16, %v3974_v4  ;;  %v7765_v16 = vunpack.i.h.bf16 %v6774_v49  ;;  %v2149_v54 = vsel %vm2142_vm0, %v3939_v18, %v7768_v62  ;;  %v7628_v18 = vunpack.i.l.bf16 %v6467_v47 }
 0x3c9   :  { %v6947_v13 = vpop.permute.xlu1 %4001  ;;  %v6949_v57 = vpop.permute.xlu0 %3961  ;;  %v7772_v62 = vunpack.i.h.bf16 %v6070_v52  ;;  %v7622_v52 = vunpack.i.h.bf16 %v6762_v34 }
 0x3ca   :  { %v4004_v19 = vunpack.i.h.bf16 %v6947_v13  ;;  %v3964_v53 = vunpack.i.h.bf16 %v6949_v57  ;;  %v6961_v32 = vpop.permute.xlu2 %3986  ;;  %2811 = vmatpush.msrb.mxu2 %v2201_v41  ;;  %3007 = vmatpush.msrb.mxu3 %v2310_v37  ;;  %v2304_v4 = vsel %vm1248_vm5, %v7765_v16, %v3968_v11  ;;  %v7767_v41 = vunpack.i.l.bf16 %v6949_v57 }
 0x3cb   :  { %v7769_v11 = vunpack.i.h.bf16 %v6961_v32  ;;  %v7770_v55 = vunpack.i.l.bf16 %v6961_v32  ;;  %v3553_v16 = vunpack.i.l.bf16 %v6072_v56 }
 0x3cc   :  { %2812 = vmatpush.msrb.mxu2 %v2195_v31  ;;  %3008 = vmatpush.msrb.mxu3 %v2304_v4  ;;  %v2462_v60 = vsel %vm1370_vm3, %v4004_v19, %v7766_v46  ;;  %v2258_v37 = vsel %vm1187_vm7, %v7767_v41, %v3964_v53  ;;  %v3954_v19 = vunpack.i.h.bf16 %v6850_v44  ;;  %v7623_v46 = vunpack.i.l.bf16 %v6850_v44 }
 0x3cd   :  { %2837 = vmatpush.msrb.mxu1 %v2462_v60  ;;  %v2511_v31 = vsel %vm1431_vm2, %v7770_v55, %v7769_v11  ;;  %v7771_v53 = vunpack.i.h.bf16 %v6105_v36  ;;  %v7618_v60 = vunpack.i.h.bf16 %v6467_v47  ;;  %v2143_v41 = vsel %vm2142_vm0, %v3558_v61, %v7772_v62 }
 0x3ce   :  { %2813 = vmatpush.msrb.mxu2 %v2149_v54  ;;  %2956 = vmatpush.msra.mxu0 %v2511_v31  ;;  %v7773_v11 = vunpack.i.h.bf16 %v6586_v58  ;;  %v7774_v55 = vunpack.i.l.bf16 %v6586_v58  ;;  %v3583_v36 = vunpack.i.l.bf16 %v6107_v24  ;;  %v7775_v31 = vunpack.i.h.bf16 %v6704_v0 }
 0x3cf   :  { %v2456_v4 = vsel %vm1370_vm3, %v3588_v14, %v7771_v53  ;;  %3009 = vmatpush.msrb.mxu3 %v2258_v37  ;;  %v3948_v14 = vunpack.i.l.bf16 %v6818_v48  ;;  %v3919_v61 = vunpack.i.h.bf16 %v6766_v3  ;;  %v7776_v62 = vunpack.i.l.bf16 %v6124_v38 }
 0x3d0   :  { %2838 = vmatpush.msrb.mxu1 %v2456_v4  ;;  %v2465_v54 = vsel %vm1370_vm3, %v7774_v55, %v7773_v11  ;;  %2814 = vmatpush.msrb.mxu2 %v2143_v41  ;;  %v2252_v37 = vsel %vm1187_vm7, %v7775_v31, %v3958_v20  ;;  %v7777_v48 = vunpack.i.l.bf16 %v6807_v6  ;;  %v7778_v41 = vunpack.i.h.bf16 %v6360_v50 }
 0x3d1   :  { %2957 = vmatpush.msra.mxu0 %v2465_v54  ;;  %3010 = vmatpush.msrb.mxu3 %v2252_v37  ;;  %v7008_v53 = vpop.permute.xlu1 %4006  ;;  %v7010_v4 = vpop.permute.xlu0 %3991  ;;  %v2096_v11 = vsel %vm1065_vm9, %v3929_v17, %v7776_v62  ;;  %v3944_v20 = vunpack.i.h.bf16 %v6844_v45  ;;  %v7621_v55 = vunpack.i.l.bf16 %v6844_v45  ;;  %v2206_v54 = vsel %vm1126_vm8, %v7623_v46, %v3954_v19  ;;  %v7841_v46 = vld [vmem:[#allocation20_spill] sm:$0xff] }
 0x3d2   :  { %v2459_v0 = vsel %vm1370_vm3, %v7778_v41, %v7777_v48  ;;  %v3994_v3 = vunpack.i.h.bf16 %v7010_v4  ;;  %2815 = vmatpush.msrb.mxu2 %v2096_v11  ;;  %v3548_v17 = vunpack.i.l.bf16 %v6042_v12  ;;  %v7779_v31 = vunpack.i.h.bf16 %v6072_v56 }
 0x3d3   :  { %2958 = vmatpush.msra.mxu0 %v2459_v0  ;;  %3011 = vmatpush.msrb.mxu3 %v2206_v54  ;;  %v2413_v37 = vsel %vm1309_vm4, %v7628_v18, %v7618_v60  ;;  %v3938_v62 = vunpack.i.l.bf16 %v6805_v51  ;;  %v2200_v19 = vsel %vm1126_vm8, %v7622_v52, %v3948_v14  ;;  %v7780_v11 = vunpack.i.l.bf16 %v6157_v10  ;;  %v7839_v52 = vld [vmem:[#allocation43_spill] sm:$0xff] }
 0x3d4   :  { %v2090_v50 = vsel %vm1065_vm9, %v3553_v16, %v7779_v31  ;;  %v7781_v16 = vunpack.i.l.bf16 %v6126_v2  ;;  %v7782_v41 = vunpack.i.h.bf16 %v6107_v24  ;;  %v7620_v0 = vunpack.i.h.bf16 %v6764_v8 }
 0x3d5   :  { %2816 = vmatpush.msrb.mxu2 %v2090_v50  ;;  %2959 = vmatpush.msra.mxu0 %v2413_v37  ;;  %v2410_v56 = vsel %vm1309_vm4, %v3994_v3, %v7780_v11  ;;  %v3934_v54 = vunpack.i.h.bf16 %v6876_v42  ;;  %v7619_v14 = vunpack.i.l.bf16 %v6876_v42  ;;  %v2154_v3 = vsel %vm2142_vm0, %v7621_v55, %v3944_v20 }
 0x3d6   :  { %3012 = vmatpush.msrb.mxu3 %v2200_v19  ;;  %v2044_v48 = vsel %vm1004_vm10, %v3919_v61, %v7781_v16  ;;  %2839 = vmatpush.msrb.mxu1 %v2410_v56  ;;  %v2404_v51 = vsel %vm1309_vm4, %v3583_v36, %v7782_v41  ;;  %v7783_v61 = vunpack.i.h.bf16 %v6042_v12  ;;  %v7784_v36 = vunpack.i.l.bf16 %v6512_v9 }
 0x3d7   :  { %2817 = vmatpush.msrb.mxu2 %v2044_v48  ;;  %2960 = vmatpush.msra.mxu0 %v6755_v15  ;;  %v7785_v31 = vunpack.i.l.bf16 %v6184_v35  ;;  %v3928_v37 = vunpack.i.l.bf16 %v6846_v40  ;;  %v2148_v15 = vsel %vm2142_vm0, %v7620_v0, %v3938_v62  ;;  %v3924_v20 = vunpack.i.h.bf16 %v6779_v59  ;;  %v7789_v48 = vld [vmem:[#allocation9_spill] sm:$0xff] }
 0x3d8   :  { %3013 = vmatpush.msrb.mxu3 %v2154_v3  ;;  %v2038_v24 = vsel %vm1004_vm10, %v3548_v17, %v7783_v61  ;;  %2840 = vmatpush.msrb.mxu1 %v2404_v51  ;;  %v7786_v19 = vunpack.i.l.bf16 %v6617_v5  ;;  %v7787_v35 = vunpack.i.h.bf16 %v6182_v39  ;;  %v7617_v40 = vunpack.i.l.bf16 %v6779_v59  ;;  %v7791_v3 = vld [vmem:[#allocation4_spill] sm:$0xff] }
 0x3d9   :  { %v2781_v50 = vsel %vm2772_vm11, %v7785_v31, %v7784_v36  ;;  %2818 = vmatpush.msrb.mxu2 %v2038_v24  ;;  %v7068_v12 = vpop.permute.xlu1 %4011  ;;  %v7070_v17 = vpop.permute.xlu0 %3996  ;;  %2841 = vmatmul.f32.vlgmr.msrb.gmra.mxu1 %v6896_v1  ;;  %v2101_v16 = vsel %vm1065_vm9, %v7619_v14, %v3934_v54  ;;  %v7788_v39 = vunpack.i.l.bf16 %v6615_v22  ;;  %v7790_v41 = vunpack.i.l.bf16 %v7789_v48  ;;  %v7793_v24 = vld [vmem:[#allocation34_spill] sm:$0xff]  ;;  %v7803_v48 = vld [vmem:[#allocation11_spill] sm:$0xff] }
 0x3da   :  { %2905 = vmatpush.msra.mxu1 %v2781_v50  ;;  %3014 = vmatpush.msrb.mxu3 %v2148_v15  ;;  %v2775_v11 = vsel %vm2772_vm11, %v7787_v35, %v7786_v19  ;;  %v4014_v62 = vunpack.i.h.bf16 %v7068_v12  ;;  %v7627_v56 = vunpack.i.l.bf16 %v7068_v12  ;;  %v7792_v61 = vunpack.i.h.bf16 %v6660_v29  ;;  %v7103_v15 = vpop.permute.xlu2 %4021  ;;  %v7796_v19 = vld [vmem:[#allocation33_spill] sm:$0xff]  ;;  %v7798_v29 = vld [vmem:[#allocation8_spill] sm:$0xff] }
 0x3db   :  { %2819 = vmatpush.msrb.mxu2 %v5963_v27  ;;  %v2728_v51 = vsel %vm2719_vm13, %v7790_v41, %v7788_v39  ;;  %2961 = vmatmul.f32.vlgmr.msra.gmra.mxu0 %v6896_v1  ;;  %v7794_v36 = vunpack.i.l.bf16 %v7793_v24  ;;  %v7795_v54 = vunpack.i.h.bf16 %v6159_v25  ;;  %v7797_v35 = vunpack.i.l.bf16 %v7796_v19 }
 0x3dc   :  { %2906 = vmatpush.msra.mxu1 %v2775_v11  ;;  %3015 = vmatpush.msrb.mxu3 %v2101_v16  ;;  %v2095_v27 = vsel %vm1065_vm9, %v7792_v61, %v3928_v37  ;;  %v2784_v50 = vsel %vm2772_vm11, %v7627_v56, %v4014_v62  ;;  %v7799_v11 = vunpack.i.h.bf16 %v7798_v29  ;;  %v2049_v25 = vsel %vm1004_vm10, %v7617_v40, %v3924_v20  ;;  %v7800_v16 = vld [vmem:[#allocation27_spill] sm:$0xff]  ;;  %v7801_v62 = vld [vmem:[#allocation38_spill] sm:$0xff] }
 0x3dd   :  { %2820 = vmatpush.msrb.mxu2 %v7791_v3  ;;  %v2360_v31 = vsel %vm2351_vm12, %v7795_v54, %v7794_v36  ;;  %3025 = vmatpush.msrb.mxu0 %v2784_v50  ;;  %v7802_v39 = vunpack.i.l.bf16 %v7801_v62  ;;  %v7804_v41 = vunpack.i.l.bf16 %v7803_v48  ;;  %v7805_v3 = vld [vmem:[#allocation32_spill] sm:$0xff]  ;;  %v7808_v20 = vld [vmem:[#allocation47_spill] sm:$0xff]  ;;  %v7811_v29 = vld [vmem:[#allocation10_spill] sm:$0xff]  ;;  %v7845_v56 = vunpack.i.h.bf16 %v6189_v7 }
 0x3de   :  { %2907 = vmatpush.msra.mxu1 %v2728_v51  ;;  %3016 = vmatpush.msrb.mxu3 %v2095_v27  ;;  %v2722_v37 = vsel %vm2719_vm13, %v7799_v11, %v7797_v35  ;;  %v7806_v61 = vunpack.i.l.bf16 %v7805_v3  ;;  %v7807_v27 = vunpack.i.h.bf16 %v6221_v63  ;;  %v7809_v50 = vld [vmem:[#allocation35_spill] sm:$0xff]  ;;  %v7812_v11 = vunpack.i.h.bf16 %v7811_v29 }
 0x3df   :  { %2885 = vmatpush.msra.mxu2 %v2360_v31  ;;  %v2675_v51 = vsel %vm2666_vm14, %v7804_v41, %v7802_v39  ;;  %v7810_v35 = vunpack.i.l.bf16 %v7809_v50  ;;  %v7625_v39 = vunpack.i.l.bf16 %v7103_v15  ;;  %v7813_v48 = vld [vmem:[#allocation15_spill] sm:$0xff]  ;;  %v7814_v41 = vld [vmem:[#allocation18_spill] sm:$0xff]  ;;  %v7820_v29 = vunpack.i.h.bf16 %v6142_v21 }
 0x3e0   :  { %2908 = vmatpush.msra.mxu1 %v2722_v37  ;;  %3017 = vmatpush.msrb.mxu3 %v2049_v25  ;;  %v2307_v36 = vsel %vm1248_vm5, %v7807_v27, %v7806_v61  ;;  %v7817_v27 = vld [vmem:[#allocation13_spill] sm:$0xff]  ;;  %v7821_v40 = vld [vmem:[#allocation7_spill] sm:$0xff] }
 0x3e1   :  { %2886 = vmatpush.msra.mxu2 %v7800_v16  ;;  %v7126_v54 = vpop.permute.xlu1 %4026  ;;  %v7128_v31 = vpop.permute.xlu0 %4016  ;;  %v2669_v37 = vsel %vm2666_vm14, %v7812_v11, %v7810_v35  ;;  %v4024_v16 = vunpack.i.h.bf16 %v7103_v15  ;;  %v7819_v35 = vunpack.i.l.bf16 %v6439_v43 }
 0x3e2   :  { %2909 = vmatpush.msra.mxu1 %v2675_v51  ;;  %2821 = vmatmul.f32.vlgmr.msrb.gmra.mxu2 %v6797_v33  ;;  %v4019_v63 = vunpack.i.h.bf16 %v7128_v31  ;;  %v7626_v25 = vunpack.i.l.bf16 %v7128_v31  ;;  %v7815_v51 = vld [vmem:[#allocation37_spill] sm:$0xff] }
 0x3e3   :  { %3018 = vmatpush.msrb.mxu3 %v7808_v20  ;;  %2887 = vmatpush.msra.mxu2 %v2307_v36  ;;  %v7816_v61 = vunpack.i.l.bf16 %v7815_v51  ;;  %v7818_v36 = vunpack.i.l.bf16 %v7817_v27  ;;  %v2255_v11 = vsel %vm1187_vm7, %v7820_v29, %v7819_v35  ;;  %v7822_v27 = vld [vmem:[#allocation41_spill] sm:$0xff]  ;;  %v7827_v29 = vld [vmem:[#allocation36_spill] sm:$0xff] }
 0x3e4   :  { %2910 = vmatpush.msra.mxu1 %v2669_v37  ;;  %v2778_v37 = vsel %vm2772_vm11, %v7626_v25, %v4019_v63  ;;  %v7826_v35 = vld [vmem:[#allocation25_spill] sm:$0xff]  ;;  %v2731_v63 = vsel %vm2719_vm13, %v7625_v39, %v4024_v16  ;;  %v7828_v14 = vunpack.i.l.bf16 %v7827_v29  ;;  %v7843_v39 = vld [vmem:[#allocation30_spill] sm:$0xff] }
 0x3e5   :  { %3019 = vmatpush.msrb.mxu3 %v7813_v48  ;;  %2888 = vmatpush.msra.mxu2 %v7814_v41  ;;  %v2622_v20 = vsel %vm2613_vm15, %v7818_v36, %v7816_v61  ;;  %v4029_v48 = vunpack.i.h.bf16 %v7126_v54  ;;  %v7624_v41 = vunpack.i.l.bf16 %v7126_v54  ;;  %v7823_v61 = vunpack.i.l.bf16 %v7822_v27  ;;  %v7824_v36 = vld [vmem:[#allocation12_spill] sm:$0xff] }
 0x3e6   :  { %2911 = vmatpush.msra.mxu1 %v2622_v20  ;;  %v7825_v60 = vunpack.i.h.bf16 %v7824_v36  ;;  %3026 = vmatpush.msrb.mxu0 %v2778_v37  ;;  %v7162_v20 = vpop.permute.xlu2 %4036  ;;  %v7844_v25 = vunpack.i.l.bf16 %v7843_v39 }
 0x3e7   :  { %3020 = vmatpush.msrb.mxu3 %v7821_v40  ;;  %2889 = vmatpush.msra.mxu2 %v2255_v11  ;;  %v7829_v40 = vld [vmem:[#allocation17_spill] sm:$0xff] }
 0x3e8   :  { %v2616_v21 = vsel %vm2613_vm15, %v7825_v60, %v7823_v61  ;;  %v7830_v11 = vunpack.i.l.bf16 %v7829_v40  ;;  %3021 = vmatmul.f32.vlgmr.msrb.gmra.mxu3 %v6797_v33  ;;  %3027 = vmatpush.msrb.mxu0 %v2731_v63  ;;  %v7831_v60 = vld [vmem:[#allocation31_spill] sm:$0xff]  ;;  %v7833_v61 = vunpack.i.h.bf16 %v6144_v26  ;;  %v4039_v26 = vunpack.i.h.bf16 %v7162_v20 }
 0x3e9   :  { %2912 = vmatpush.msra.mxu1 %v2616_v21  ;;  %2890 = vmatpush.msra.mxu2 %v7826_v35  ;;  %v7832_v37 = vunpack.i.l.bf16 %v7831_v60  ;;  %v7179_v21 = vpop.permute.xlu1 %4041  ;;  %v7181_v16 = vpop.permute.xlu0 %4031  ;;  %v2725_v35 = vsel %vm2719_vm13, %v7624_v41, %v4029_v48  ;;  %v7840_v48 = vunpack.i.l.bf16 %v7839_v52  ;;  %v7842_v41 = vunpack.i.l.bf16 %v7841_v46 }
 0x3ea   :  { %v2569_v0 = vsel %vm2560_vm1, %v7830_v11, %v7828_v14  ;;  %v7834_v14 = vld [vmem:[#allocation40_spill] sm:$0xff]  ;;  %3028 = vmatpush.msrb.mxu0 %v2725_v35  ;;  %v2151_v18 = vsel %vm2142_vm0, %v7845_v56, %v7844_v25  ;;  %v7846_v46 = vunpack.i.l.bf16 %v6961_v32  ;;  %v7850_v56 = vunpack.i.l.bf16 %v6586_v58 }
 0x3eb   :  { %v2203_v36 = vsel %vm1126_vm8, %v7833_v61, %v7832_v37  ;;  %2913 = vmatpush.msra.mxu1 %v2569_v0  ;;  %v7835_v40 = vunpack.i.l.bf16 %v7834_v14  ;;  %v7836_v11 = vld [vmem:[#allocation16_spill] sm:$0xff]  ;;  %v7630_v37 = vunpack.i.l.bf16 %v7162_v20  ;;  %v4034_v0 = vunpack.i.h.bf16 %v7181_v16 }
 0x3ec   :  { %2891 = vmatpush.msra.mxu2 %v2203_v36  ;;  %v7837_v63 = vunpack.i.h.bf16 %v7836_v11  ;;  %v4033_v61 = vunpack.i.l.bf16 %v7181_v16  ;;  %v7838_v36 = vld [vmem:[#allocation26_spill] sm:$0xff]  ;;  %v2516_v11 = vsel %vm1431_vm2, %v7842_v41, %v7840_v48  ;;  %v7847_v41 = vld [vmem:[#allocation19_spill] sm:$0xff]  ;;  %v7851_v25 = vunpack.i.h.bf16 %v6248_v28 }
 0x3ed   :  { %v7848_v35 = vunpack.i.h.bf16 %v7847_v41  ;;  %v2672_v7 = vsel %vm2666_vm14, %v7630_v37, %v4039_v26  ;;  %v7849_v48 = vld [vmem:[#allocation14_spill] sm:$0xff] }
 0x3ee   :  { %v2563_v55 = vsel %vm2560_vm1, %v7837_v63, %v7835_v40  ;;  %2892 = vmatpush.msra.mxu2 %v7838_v36  ;;  %v4044_v40 = vunpack.i.h.bf16 %v7179_v21  ;;  %v7629_v63 = vunpack.i.l.bf16 %v7179_v21  ;;  %v7237_v28 = vpop.permute.xlu2 %4056 }
 0x3ef   :  { %2914 = vmatpush.msra.mxu1 %v2563_v55  ;;  %v2678_v55 = vsel %vm2666_vm14, %v4033_v61, %v4034_v0  ;;  %v2510_v36 = vsel %vm1431_vm2, %v7848_v35, %v7846_v46  ;;  %v7852_v0 = vld [vmem:[#allocation22_spill] sm:$0xff]  ;;  %v4059_v37 = vunpack.i.h.bf16 %v7237_v28 }
 0x3f0   :  { %2893 = vmatpush.msra.mxu2 %v2151_v18  ;;  %3029 = vmatpush.msrb.mxu0 %v2678_v55  ;;  %v2464_v18 = vsel %vm1370_vm3, %v7851_v25, %v7850_v56  ;;  %v7854_v55 = vunpack.i.h.bf16 %v6124_v38  ;;  %v2625_v26 = vsel %vm2613_vm15, %v7629_v63, %v4044_v40  ;;  %v7855_v38 = vld [vmem:[#allocation21_spill] sm:$0xff]  ;;  %v7856_v25 = vld [vmem:[#allocation23_spill] sm:$0xff]  ;;  %v7857_v40 = vunpack.i.l.bf16 %v6467_v47 }
 0x3f1   :  { %2915 = vmatpush.msra.mxu1 %v2516_v11  ;;  %v7853_v11 = vunpack.i.l.bf16 %v7852_v0  ;;  %v7233_v41 = vpop.permute.xlu1 %4051  ;;  %v7235_v35 = vpop.permute.xlu0 %4046 }
 0x3f2   :  { %2894 = vmatpush.msra.mxu2 %v7849_v48  ;;  %3030 = vmatpush.msrb.mxu0 %v2672_v7  ;;  %v4048_v7 = vunpack.i.l.bf16 %v7235_v35  ;;  %v4054_v48 = vunpack.i.h.bf16 %v7233_v41  ;;  %v4053_v56 = vunpack.i.l.bf16 %v7233_v41  ;;  %v7898_v41 = vunpack.i.h.bf16 %v7834_v14 }
 0x3f3   :  { %2916 = vmatpush.msra.mxu1 %v2510_v36  ;;  %v2098_v46 = vsel %vm1065_vm9, %v7854_v55, %v7853_v11  ;;  %v4049_v36 = vunpack.i.h.bf16 %v7235_v35  ;;  %v7859_v55 = vld [vmem:[#allocation29_spill] sm:$0xff]  ;;  %v7894_v35 = vunpack.i.l.bf16 %v6850_v44  ;;  %v7900_v44 = vunpack.i.l.bf16 %v6762_v34 }
 0x3f4   :  { %2895 = vmatpush.msra.mxu2 %v2098_v46  ;;  %3031 = vmatpush.msrb.mxu0 %v2625_v26  ;;  %v7860_v46 = vunpack.i.l.bf16 %v7859_v55  ;;  %v7861_v26 = vunpack.i.h.bf16 %v6126_v2  ;;  %v7903_v14 = vunpack.i.h.bf16 %v7843_v39 }
 0x3f5   :  { %2917 = vmatpush.msra.mxu1 %v2464_v18  ;;  %v7858_v18 = vunpack.i.h.bf16 %v6157_v10  ;;  %v7862_v10 = vld [vmem:[#allocation28_spill] sm:$0xff] }
 0x3f6   :  { %2896 = vmatpush.msra.mxu2 %v7856_v25  ;;  %v2046_v63 = vsel %vm1004_vm10, %v7861_v26, %v7860_v46  ;;  %v4058_v25 = vunpack.i.l.bf16 %v7237_v28  ;;  %v7865_v46 = vld [vmem:[#allocation24_spill] sm:$0xff]  ;;  %v7868_v26 = vld [vmem:[#allocation2_spill] sm:$0xff]  ;;  %v7902_v28 = vunpack.i.l.bf16 %v6844_v45  ;;  %v7907_v45 = vunpack.i.h.bf16 %v6586_v58 }
 0x3f7   :  { %2918 = vmatpush.msra.mxu1 %v7855_v38  ;;  %v2412_v11 = vsel %vm1309_vm4, %v7858_v18, %v7857_v40  ;;  %v2619_v38 = vsel %vm2613_vm15, %v4048_v7, %v4049_v36  ;;  %v7863_v40 = vunpack.i.l.bf16 %v7068_v12  ;;  %v7864_v18 = vunpack.i.h.bf16 %v6512_v9 }
 0x3f8   :  { %2897 = vmatpush.msra.mxu2 %v2046_v63  ;;  %3032 = vmatpush.msrb.mxu0 %v2619_v38  ;;  %v2572_v36 = vsel %vm2560_vm1, %v4053_v56, %v4054_v48  ;;  %v2799_v63 = vld [vmem:[%s7461_s8] sm:$0xff]  ;;  %v7867_v12 = vunpack.i.h.bf16 %v6617_v5  ;;  %v2566_v48 = vsel %vm2560_vm1, %v4058_v25, %v4059_v37  ;;  %v7872_v37 = vunpack.i.l.bf16 %v6914_v23 }
 0x3f9   :  { %2919 = vmatpush.msra.mxu1 %v2412_v11  ;;  %v2783_v2 = vsel %vm2772_vm11, %v7864_v18, %v7863_v40  ;;  %v7866_v11 = vunpack.i.l.bf16 %v7128_v31  ;;  %v7280_v38 = vpop.permute.xlu1 %4066  ;;  %v7869_v40 = vunpack.i.l.bf16 %v7103_v15  ;;  %v7870_v31 = vunpack.i.h.bf16 %v6615_v22  ;;  %2802 = vperm.xlu2 %4070, %v2799_v63  }
 0x3fa   :  { %2898 = vmatpush.msra.mxu2 %v7865_v46  ;;  %3033 = vmatpush.msrb.mxu0 %v2572_v36  ;;  %v4069_v18 = vunpack.i.h.bf16 %v7280_v38  ;;  %v7873_v15 = vunpack.i.h.bf16 %v7793_v24  ;;  %v7876_v23 = vunpack.i.h.bf16 %v6772_v30  ;;  %v7877_v24 = vunpack.i.l.bf16 %v6772_v30 }
 0x3fb   :  { %2920 = vmatpush.msra.mxu1 %v7862_v10  ;;  %v2777_v9 = vsel %vm2772_vm11, %v7867_v12, %v7866_v11  ;;  %v7282_v10 = vpop.permute.xlu0 %4061  ;;  %v2730_v5 = vsel %vm2719_vm13, %v7870_v31, %v7869_v40  ;;  %v7871_v11 = vld [vmem:[#allocation3_spill] sm:$0xff]  ;;  %v4009_v12 = vunpack.i.h.bf16 %v7008_v53  ;;  %v4003_v40 = vunpack.i.l.bf16 %v6947_v13  ;;  %v7879_v31 = vld [vmem:[#allocation49_spill] sm:$0xff] }
 0x3fc   :  { %2921 = vmatmul.f32.vlgmr.msra.gmra.mxu1 %v6896_v1  ;;  %2899 = vmatpush.msra.mxu2 %v7868_v26  ;;  %v4064_v46 = vunpack.i.h.bf16 %v7282_v10  ;;  %v4063_v36 = vunpack.i.l.bf16 %v7282_v10  ;;  %v2362_v22 = vsel %vm2351_vm12, %v7873_v15, %v7872_v37  ;;  %v7874_v26 = vunpack.i.l.bf16 %v7126_v54 }
 0x3fd   :  { %2985 = vmatpush.msrb.mxu1 %v2783_v2  ;;  %v4068_v2 = vunpack.i.l.bf16 %v7280_v38  ;;  %3034 = vmatpush.msrb.mxu0 %v2566_v48  ;;  %v7875_v38 = vunpack.i.h.bf16 %v7796_v19  ;;  %v2356_v48 = vsel %vm2351_vm12, %v7877_v24, %v7876_v23  ;;  %v7882_v13 = vunpack.i.l.bf16 %v7162_v20 }
 0x3fe   :  { %2900 = vmatpush.msra.mxu2 %v7871_v11  ;;  %v2519_v10 = vsel %vm1431_vm2, %v4063_v36, %v4064_v46  ;;  %v7881_v46 = vunpack.i.h.bf16 %v7805_v3  ;;  %v7883_v11 = vunpack.i.h.bf16 %v7809_v50  ;;  %v7884_v37 = vunpack.i.h.bf16 %v6774_v49 }
 0x3ff   :  { %2986 = vmatpush.msrb.mxu1 %v2777_v9  ;;  %v4008_v9 = vunpack.i.l.bf16 %v7008_v53  ;;  %v2724_v63 = vsel %vm2719_vm13, %v7875_v38, %v7874_v26  ;;  %3035 = vmatpush.msrb.mxu0 %v2519_v10  ;;  %v7878_v53 = vunpack.i.h.bf16 %v7801_v62  ;;  %v2513_v54 = vsel %vm1431_vm2, %v4068_v2, %v4069_v18  ;;  %v7896_v10 = vld [vmem:[#allocation44_spill] sm:$0xff] }
 0x400   :  { %2965 = vmatpush.msrb.mxu2 %v2362_v22  ;;  %v2671_v16 = vsel %vm2666_vm14, %v7883_v11, %v7882_v13  ;;  %v3998_v18 = vunpack.i.l.bf16 %v7070_v17  ;;  %v7885_v3 = vunpack.i.l.bf16 %v6774_v49  ;;  %v7886_v20 = vunpack.i.l.bf16 %v7179_v21  ;;  %v7917_v13 = vld [vmem:[#allocation5_spill] sm:$0xff]  ;;  %v7918_v11 = vld [vmem:[#allocation6_spill] sm:$0xff] }
 0x401   :  { %2987 = vmatpush.msrb.mxu1 %v2730_v5  ;;  %v2677_v19 = vsel %vm2666_vm14, %v7878_v53, %v4033_v61  ;;  %v7880_v5 = vunpack.i.l.bf16 %v7879_v31  ;;  %3036 = vmatpush.msrb.mxu0 %v2513_v54  ;;  %v2467_v62 = vsel %vm1370_vm3, %v4008_v9, %v4009_v12  ;;  %v3999_v61 = vunpack.i.h.bf16 %v7070_v17 }
 0x402   :  { %2966 = vmatpush.msrb.mxu2 %v2356_v48  ;;  %v2303_v15 = vsel %vm1248_vm5, %v7885_v3, %v7884_v37  ;;  %v7887_v50 = vunpack.i.h.bf16 %v7815_v51  ;;  %v7888_v12 = vunpack.i.h.bf16 %v6807_v6  ;;  %v3993_v17 = vunpack.i.l.bf16 %v7010_v4  ;;  %v7892_v4 = vld [vmem:[#allocation42_spill] sm:$0xff] }
 0x403   :  { %2988 = vmatpush.msrb.mxu1 %v2724_v63  ;;  %v2309_v30 = vsel %vm1248_vm5, %v7881_v46, %v7880_v5  ;;  %3037 = vmatpush.msrb.mxu0 %v2467_v62  ;;  %v7889_v38 = vunpack.i.l.bf16 %v6949_v57  ;;  %v7890_v49 = vunpack.i.h.bf16 %v6439_v43  ;;  %v7891_v51 = vunpack.i.h.bf16 %v7822_v27  ;;  %v7911_v5 = vld [vmem:[#allocation39_spill] sm:$0xff] }
 0x404   :  { %2967 = vmatpush.msrb.mxu2 %v2309_v30  ;;  %v2624_v22 = vsel %vm2613_vm15, %v7887_v50, %v7886_v20  ;;  %v2461_v26 = vsel %vm1370_vm3, %v7888_v12, %v4003_v40  ;;  %v2415_v6 = vsel %vm1309_vm4, %v3998_v18, %v3999_v61  ;;  %v7893_v43 = vunpack.i.h.bf16 %v7827_v29  ;;  %v7916_v30 = vld [vmem:[#allocation45_spill] sm:$0xff] }
 0x405   :  { %2989 = vmatpush.msrb.mxu1 %v2677_v19  ;;  %v2257_v63 = vsel %vm1187_vm7, %v7890_v49, %v7889_v38  ;;  %3038 = vmatpush.msrb.mxu0 %v2461_v26  ;;  %v2618_v21 = vsel %vm2613_vm15, %v7891_v51, %v4048_v7  ;;  %v7895_v27 = vunpack.i.h.bf16 %v7831_v60  ;;  %v7897_v23 = vunpack.i.h.bf16 %v7896_v10 }
 0x406   :  { %2968 = vmatpush.msrb.mxu2 %v2303_v15  ;;  %v2571_v57 = vsel %vm2560_vm1, %v7893_v43, %v4053_v56  ;;  %v2565_v29 = vsel %vm2560_vm1, %v7898_v41, %v4058_v25  ;;  %v7899_v56 = vunpack.i.h.bf16 %v6762_v34  ;;  %v7901_v48 = vunpack.i.h.bf16 %v7839_v52 }
 0x407   :  { %2990 = vmatpush.msrb.mxu1 %v2671_v16  ;;  %2901 = vmatmul.f32.vlgmr.msra.gmra.mxu2 %v6797_v33  ;;  %v2205_v7 = vsel %vm1126_vm8, %v7895_v27, %v7894_v35  ;;  %v2409_v24 = vsel %vm1309_vm4, %v7897_v23, %v3993_v17  ;;  %v2153_v25 = vsel %vm2142_vm0, %v7903_v14, %v7902_v28  ;;  %v7904_v34 = vunpack.i.h.bf16 %v6961_v32 }
 0x408   :  { %2969 = vmatpush.msrb.mxu2 %v2257_v63  ;;  %3039 = vmatpush.msrb.mxu0 %v2415_v6  ;;  %v2199_v60 = vsel %vm1126_vm8, %v7900_v44, %v7899_v56  ;;  %v2518_v40 = vsel %vm1431_vm2, %v7901_v48, %v4063_v36  ;;  %v7905_v19 = vunpack.i.h.bf16 %v6764_v8  ;;  %v7906_v54 = vunpack.i.l.bf16 %v6764_v8 }
 0x409   :  { %2991 = vmatpush.msrb.mxu1 %v2624_v22  ;;  %v2512_v53 = vsel %vm1431_vm2, %v7904_v34, %v4068_v2  ;;  %v2466_v39 = vsel %vm1370_vm3, %v7907_v45, %v4008_v9  ;;  %v7908_v36 = vunpack.i.l.bf16 %v6876_v42  ;;  %v7909_v31 = vunpack.i.h.bf16 %v7852_v0  ;;  %v7910_v2 = vld [vmem:[#allocation48_spill] sm:$0xff]  ;;  %v7915_v0 = vld [vmem:[#allocation46_spill] sm:$0xff] }
 0x40a   :  { %2970 = vmatpush.msrb.mxu2 %v7892_v4  ;;  %3040 = vmatpush.msrb.mxu0 %v2409_v24  ;;  %v2147_v52 = vsel %vm2142_vm0, %v7906_v54, %v7905_v19  ;;  %v7912_v8 = vunpack.i.h.bf16 %v6467_v47  ;;  %v7913_v58 = vunpack.i.l.bf16 %v6779_v59  ;;  %v7914_v9 = vunpack.i.h.bf16 %v7859_v55 }
 0x40b   :  { %2992 = vmatpush.msrb.mxu1 %v2618_v21  ;;  %3041 = vmatmul.f32.vlgmr.msrb.gmra.mxu0 %v6896_v1  ;;  %v2100_v32 = vsel %vm1065_vm9, %v7909_v31, %v7908_v36 }
 0x40c   :  { %2971 = vmatpush.msrb.mxu2 %v2205_v7  ;;  %v2414_v46 = vsel %vm1309_vm4, %v7912_v8, %v3998_v18  ;;  %v2048_v42 = vsel %vm1004_vm10, %v7914_v9, %v7913_v58 }
 0x40d   :  { %2993 = vmatpush.msrb.mxu1 %v2571_v57 }
 0x40e   :  { %2972 = vmatpush.msrb.mxu2 %v2199_v60 }
 0x40f   :  { %2994 = vmatpush.msrb.mxu1 %v2565_v29 }
 0x410   :  { %2973 = vmatpush.msrb.mxu2 %v2153_v25 }
 0x411   :  { %2995 = vmatpush.msrb.mxu1 %v2518_v40 }
 0x412   :  { %2974 = vmatpush.msrb.mxu2 %v2147_v52 }
 0x413   :  { %2996 = vmatpush.msrb.mxu1 %v2512_v53 }
 0x414   :  { %2975 = vmatpush.msrb.mxu2 %v2100_v32 }
 0x415   :  { %2997 = vmatpush.msrb.mxu1 %v2466_v39 }
 0x416   :  { %2976 = vmatpush.msrb.mxu2 %v7911_v5 }
 0x417   :  { %2998 = vmatpush.msrb.mxu1 %v7910_v2 }
 0x418   :  { %2977 = vmatpush.msrb.mxu2 %v2048_v42 }
 0x419   :  { %2999 = vmatpush.msrb.mxu1 %v2414_v46 }
 0x41a   :  { %2978 = vmatpush.msrb.mxu2 %v7916_v30  ;;  %v2862_v59 = vpop.f32.mrf.mxu3 }
 0x41b   :  { %3000 = vmatpush.msrb.mxu1 %v7915_v0 }
 0x41c   :  { %3001 = vmatmul.f32.vlgmr.msrb.gmra.mxu1 %v6896_v1  ;;  %2979 = vmatpush.msrb.mxu2 %v7917_v13 }
 0x41e   :  { %2980 = vmatpush.msrb.mxu2 %v7918_v11 }
 0x41f   :  { %2981 = vmatmul.f32.vlgmr.msrb.gmra.mxu2 %v6797_v33 }
 0x431   :  { %v2882_v16 = vpop.f32.mrf.mxu0 }
 0x445   :  { %v2942_v17 = vpop.f32.mrf.mxu3 }
 0x453   :  { %v7426_v47 = vpop.permute.xlu2 %2802 }
 0x454   :  { %v2863_v55 = vadd.f32 %v2862_v59, %v7426_v47  ;;  %v2943_v38 = vadd.f32 %v2942_v17, %v7426_v47 }
 0x456   :  { %v2842_v61 = vpop.f32.mrf.mxu1  ;;  %v2883_v18 = vadd.f32 %v2882_v16, %v2863_v55 }
 0x458   :  { %v3046_v3 = vsub.f32 0.0, %v2883_v18  ;;  %v2962_v21 = vpop.f32.mrf.mxu0 }
 0x459   :  { %v2963_v6 = vadd.f32 %v2962_v21, %v2943_v38 }
 0x45a   :  { %v3053_v1 = vmul.f32 1.442695, %v3046_v3 }
 0x45b   :  { %v3048_v27 = vsub.f32 0.0, %v2963_v6 }
 0x45c   :  { %4113 = vpow2.f32 %v3053_v1 }
 0x45d   :  { %v3057_v29 = vmul.f32 1.442695, %v3048_v27 }
 0x462   :  { %v4114_v22 = vpop.eup %4113 }
 0x463   :  { %v3064_v33 = vadd.f32 1.0, %v4114_v22 }
 0x465   :  { %v2822_v62 = vpop.f32.mrf.mxu2  ;;  %v3095_v51 = vand.u32 2147483648, %v3064_v33  ;;  %vm3089_vm2 = vweird.f32 %v3064_v33  ;;  %v3093_v57 = vand.u32 2147483647, %v3064_v33 }
 0x466   :  { %v2823_v37 = vadd.f32 %v2822_v62, %v7426_v47 }
 0x467   :  { %v3096_v23 = vor.u32 1.1754944e-38, %v3095_v51  ;;  %vm3094_vm7 = vcmp.eq.f32.partialorder %v3093_v57, 8.507059e+37 }
 0x468   :  { %v2843_v15 = vadd.f32 %v2842_v61, %v2823_v37 }
 0x46a   :  { %v3045_v20 = vsub.f32 0.0, %v2843_v15 }
 0x46b   :  { %v3022_v60 = vpop.f32.mrf.mxu3 }
 0x46c   :  { %v3051_v50 = vmul.f32 1.442695, %v3045_v20  ;;  %v3023_v25 = vadd.f32 %v3022_v60, %v7426_v47 }
 0x46e   :  { %4115 = vpow2.f32 %v3051_v50 }
 0x46f   :  { %4117 = vrcp.f32 %v3064_v33 }
 0x474   :  { %v4116_v12 = vpop.eup %4115 }
 0x475   :  { %v3063_v26 = vadd.f32 1.0, %v4116_v12  ;;  %v4118_v49 = vpop.eup %4117 }
 0x476   :  { %v3085_v63 = vmul.f32 %v4118_v49, %v3064_v33  ;;  %vm3090_vm3 = vweird.f32 %v4118_v49 }
 0x477   :  { %4119 = vrcp.f32 %v3063_v26  ;;  %vm3074_vm4 = vweird.f32 %v3063_v26  ;;  %v3080_v7 = vand.u32 2147483648, %v3063_v26  ;;  %v3078_v41 = vand.u32 2147483647, %v3063_v26  ;;  %vm3091_vm6 = vmor %vm3089_vm2, %vm3090_vm3 }
 0x478   :  { %v3086_v43 = vsub.f32 1.0, %v3085_v63  ;;  %4121 = vpow2.f32 %v3057_v29 }
 0x479   :  { %v3081_v48 = vor.u32 1.1754944e-38, %v3080_v7  ;;  %vm3079_vm9 = vcmp.eq.f32.partialorder %v3078_v41, 8.507059e+37  ;;  %v2922_v36 = vpop.f32.mrf.mxu1 }
 0x47a   :  { %v3087_v10 = vmul.f32 %v4118_v49, %v3086_v43 }
 0x47c   :  { %v3088_v56 = vadd.f32 %v4118_v49, %v3087_v10 }
 0x47d   :  { %v4120_v4 = vpop.eup %4119 }
 0x47e   :  { %v3070_v35 = vmul.f32 %v4120_v4, %v3063_v26  ;;  %vm3075_vm5 = vweird.f32 %v4120_v4  ;;  %v3092_v40 = vsel %vm3091_vm6, %v4118_v49, %v3088_v56  ;;  %v4122_v19 = vpop.eup %4121 }
 0x47f   :  { %vm3076_vm8 = vmor %vm3074_vm4, %vm3075_vm5  ;;  %v3097_v14 = vsel %vm3094_vm7, %v3096_v23, %v3092_v40  ;;  %v3066_v52 = vadd.f32 1.0, %v4122_v19 }
 0x480   :  { %v3071_v24 = vsub.f32 1.0, %v3070_v35  ;;  %3160 = vst [vmem:[%s7462_s9 + $0x8] sm:$0xff] %v3097_v14 }
 0x481   :  { %4123 = vrcp.f32 %v3066_v52  ;;  %v3125_v42 = vand.u32 2147483648, %v3066_v52  ;;  %vm3119_vm10 = vweird.f32 %v3066_v52  ;;  %v3123_v30 = vand.u32 2147483647, %v3066_v52 }
 0x482   :  { %v3072_v44 = vmul.f32 %v4120_v4, %v3071_v24 }
 0x483   :  { %v3126_v59 = vor.u32 1.1754944e-38, %v3125_v42  ;;  %vm3124_vm13 = vcmp.eq.f32.partialorder %v3123_v30, 8.507059e+37 }
 0x484   :  { %v3073_v28 = vadd.f32 %v4120_v4, %v3072_v44 }
 0x486   :  { %v3077_v34 = vsel %vm3076_vm8, %v4120_v4, %v3073_v28 }
 0x487   :  { %v3082_v53 = vsel %vm3079_vm9, %v3081_v48, %v3077_v34  ;;  %v4124_v46 = vpop.eup %4123 }
 0x488   :  { %3159 = vst [vmem:[%s7462_s9] sm:$0xff] %v3082_v53  ;;  %v3042_v54 = vpop.f32.mrf.mxu0  ;;  %v3115_v9 = vmul.f32 %v4124_v46, %v3066_v52  ;;  %vm3120_vm11 = vweird.f32 %v4124_v46 }
 0x489   :  { %v3043_v45 = vadd.f32 %v3042_v54, %v3023_v25  ;;  %vm3121_vm12 = vmor %vm3119_vm10, %vm3120_vm11 }
 0x48a   :  { %v2902_v39 = vpop.f32.mrf.mxu2  ;;  %v3116_v0 = vsub.f32 1.0, %v3115_v9 }
 0x48b   :  { %v2903_v31 = vadd.f32 %v2902_v39, %v7426_v47  ;;  %v3050_v32 = vsub.f32 0.0, %v3043_v45 }
 0x48c   :  { %v3117_v11 = vmul.f32 %v4124_v46, %v3116_v0 }
 0x48d   :  { %v2923_v2 = vadd.f32 %v2922_v36, %v2903_v31  ;;  %v3061_v5 = vmul.f32 1.442695, %v3050_v32 }
 0x48e   :  { %v3118_v16 = vadd.f32 %v4124_v46, %v3117_v11 }
 0x48f   :  { %v3047_v8 = vsub.f32 0.0, %v2923_v2  ;;  %4125 = vpow2.f32 %v3061_v5 }
 0x490   :  { %v3122_v18 = vsel %vm3121_vm12, %v4124_v46, %v3118_v16 }
 0x491   :  { %v3055_v58 = vmul.f32 1.442695, %v3047_v8  ;;  %v3127_v37 = vsel %vm3124_vm13, %v3126_v59, %v3122_v18 }
 0x492   :  { %3162 = vst [vmem:[%s7462_s9 + $0x18] sm:$0xff] %v3127_v37 }
 0x493   :  { %4127 = vpow2.f32 %v3055_v58 }
 0x495   :  { %v4126_v13 = vpop.eup %4125 }
 0x496   :  { %v3068_v55 = vadd.f32 1.0, %v4126_v13 }
 0x498   :  { %4129 = vrcp.f32 %v3068_v55  ;;  %v3155_v1 = vand.u32 2147483648, %v3068_v55  ;;  %vm3149_vm14 = vweird.f32 %v3068_v55  ;;  %v3153_v26 = vand.u32 2147483647, %v3068_v55 }
 0x499   :  { %v4128_v62 = vpop.eup %4127  ;;  %v3002_v50 = vpop.f32.mrf.mxu1 }
 0x49a   :  { %v3065_v61 = vadd.f32 1.0, %v4128_v62  ;;  %v3156_v51 = vor.u32 1.1754944e-38, %v3155_v1  ;;  %vm3154_vm3 = vcmp.eq.f32.partialorder %v3153_v26, 8.507059e+37 }
 0x49c   :  { %4131 = vrcp.f32 %v3065_v61  ;;  %vm3104_vm0 = vweird.f32 %v3065_v61  ;;  %v3110_v49 = vand.u32 2147483648, %v3065_v61  ;;  %v3108_v6 = vand.u32 2147483647, %v3065_v61 }
 0x49e   :  { %v4130_v3 = vpop.eup %4129  ;;  %v3111_v35 = vor.u32 1.1754944e-38, %v3110_v49  ;;  %vm3109_vm5 = vcmp.eq.f32.partialorder %v3108_v6, 8.507059e+37 }
 0x49f   :  { %v3145_v15 = vmul.f32 %v4130_v3, %v3068_v55  ;;  %vm3150_vm15 = vweird.f32 %v4130_v3 }
 0x4a0   :  { %vm3151_vm2 = vmor %vm3149_vm14, %vm3150_vm15 }
 0x4a1   :  { %v3146_v12 = vsub.f32 1.0, %v3145_v15 }
 0x4a2   :  { %v2982_v20 = vpop.f32.mrf.mxu2  ;;  %v4132_v33 = vpop.eup %4131 }
 0x4a3   :  { %v2983_v22 = vadd.f32 %v2982_v20, %v7426_v47  ;;  %v3100_v17 = vmul.f32 %v4132_v33, %v3065_v61  ;;  %v3147_v63 = vmul.f32 %v4130_v3, %v3146_v12  ;;  %vm3105_vm1 = vweird.f32 %v4132_v33 }
 0x4a4   :  { %vm3106_vm4 = vmor %vm3104_vm0, %vm3105_vm1 }
 0x4a5   :  { %v3003_v38 = vadd.f32 %v3002_v50, %v2983_v22  ;;  %v3101_v21 = vsub.f32 1.0, %v3100_v17  ;;  %v3148_v43 = vadd.f32 %v4130_v3, %v3147_v63 }
 0x4a7   :  { %v3049_v4 = vsub.f32 0.0, %v3003_v38  ;;  %v3102_v57 = vmul.f32 %v4132_v33, %v3101_v21  ;;  %v3152_v27 = vsel %vm3151_vm2, %v4130_v3, %v3148_v43 }
 0x4a8   :  { %v3157_v10 = vsel %vm3154_vm3, %v3156_v51, %v3152_v27 }
 0x4a9   :  { %v3059_v47 = vmul.f32 1.442695, %v3049_v4  ;;  %v3103_v7 = vadd.f32 %v4132_v33, %v3102_v57  ;;  %3164 = vst [vmem:[%s7462_s9 + $0x28] sm:$0xff] %v3157_v10 }
 0x4ab   :  { %4133 = vpow2.f32 %v3059_v47  ;;  %v3107_v23 = vsel %vm3106_vm4, %v4132_v33, %v3103_v7 }
 0x4ac   :  { %v3112_v24 = vsel %vm3109_vm5, %v3111_v35, %v3107_v23 }
 0x4ad   :  { %3161 = vst [vmem:[%s7462_s9 + $0x10] sm:$0xff] %v3112_v24 }
 0x4b1   :  { %v4134_v41 = vpop.eup %4133 }
 0x4b2   :  { %v3067_v29 = vadd.f32 1.0, %v4134_v41 }
 0x4b4   :  { %4135 = vrcp.f32 %v3067_v29  ;;  %v3140_v48 = vand.u32 2147483648, %v3067_v29  ;;  %v3138_v28 = vand.u32 2147483647, %v3067_v29  ;;  %vm3134_vm7 = vweird.f32 %v3067_v29 }
 0x4b6   :  { %v3141_v25 = vor.u32 1.1754944e-38, %v3140_v48  ;;  %vm3139_vm9 = vcmp.eq.f32.partialorder %v3138_v28, 8.507059e+37 }
 0x4ba   :  { %v4136_v56 = vpop.eup %4135 }
 0x4bb   :  { %v3130_v44 = vmul.f32 %v4136_v56, %v3067_v29  ;;  %vm3135_vm6 = vweird.f32 %v4136_v56 }
 0x4bc   :  { %vm3136_vm8 = vmor %vm3134_vm7, %vm3135_vm6 }
 0x4bd   :  { %v3131_v60 = vsub.f32 1.0, %v3130_v44 }
 0x4bf   :  { %v3132_v40 = vmul.f32 %v4136_v56, %v3131_v60 }
 0x4c1   :  { %v3133_v14 = vadd.f32 %v4136_v56, %v3132_v40 }
 0x4c3   :  { %v3137_v34 = vsel %vm3136_vm8, %v4136_v56, %v3133_v14 }
 0x4c4   :  { %v3142_v53 = vsel %vm3139_vm9, %v3141_v25, %v3137_v34 }
 0x4c5   :  { %3163 = vst [vmem:[%s7462_s9 + $0x20] sm:$0xff] %v3142_v53 }

</bundles_post_ra>
